<compile_context>
chip_gen: v6e
topology: v6e:2x2x1
jax: 0.10.0
libtpu: 0.0.40
codegen_flags: <defaults>
</compile_context>

<pallas_src>
import jax
import jax.numpy as jnp
from jax.experimental import pallas as pl
from jax.experimental.pallas import tpu as pltpu


# Fixed network geometry implied by the PyTorch module (Linear(n_hidden*21)).
L_IN = 168                               # 168 -> 84 -> 42 -> 21
CONV_SPECS = ((11, 5), (7, 3), (5, 2))   # (kernel_size, padding) per conv layer
ALIGN = 8                                # interior row offset in padded scratch


# ---------------- fused Pallas kernel ----------------

def fused_cnn_kernel(x_ref, w1, b1, w2, b2, w3, b3, w4, b4,
                     pool1, pool2, pool3, o_ref, s1, s2, s3):
    """One grid step == BB batch elements; whole network fused in VMEM.

    x_ref:  (BB, 168, 4)      o_ref: (1, BB, n_latent)
    w*/b*:  im2col conv weights (K*Cin, Cout) / biases (1, Cout); head (21H, n_latent)
    pool*:  precomputed AvgPool1d(2) selection matrices (out_len, 2*out_len), entries 0/0.5
    s1/s2/s3: zero-padded activation scratch, interior at sublane-aligned row ALIGN.
    """
    BB = x_ref.shape[0]
    layers = ((s1, w1, b1, pool1), (s2, w2, b2, pool2), (s3, w3, b3, pool3))

    hs = [x_ref[bb] for bb in range(BB)]             # per-element (168, 4)
    length = L_IN
    for (scr, w_r, b_r, pool_r), (ksz, pad) in zip(layers, CONV_SPECS):
        cin = scr.shape[2]
        w_v = w_r[...]                               # hoisted: load once per step
        b_v = b_r[...]
        pool_v = pool_r[...]

        # Zero the (tiny) halo rows for all BB elements.  Done per step (not
        # under program_id==0) so the kernel is correct when the 'parallel'
        # grid axis is split across v7x TensorCores with separate scratch.
        halo = jnp.zeros((BB, pad, cin), jnp.float32)
        scr[:, pl.ds(ALIGN - pad, pad), :] = halo
        scr[:, pl.ds(ALIGN + length, pad), :] = halo

        # Sublane-aligned interior stores (interior starts at row ALIGN == 8).
        for bb in range(BB):
            scr[bb, pl.ds(ALIGN, length), :] = hs[bb]

        new_hs = []
        for bb in range(BB):
            # im2col: K shifted windows side-by-side along lanes -> ONE MXU
            # matmul with contraction depth K*Cin (44 / 224 / 160).
            cols = jnp.concatenate(
                [scr[bb, pl.ds(ALIGN - pad + k, length), :] for k in range(ksz)],
                axis=1)
            y = jnp.dot(cols, w_v, preferred_element_type=jnp.float32)
            y = jnp.maximum(y + b_v, 0.0)            # bias + ReLU
            # AvgPool1d(2) as a precomputed 0.5-selection-matrix matmul.
            new_hs.append(jnp.dot(pool_v, y, preferred_element_type=jnp.float32))
        hs = new_hs
        length //= 2                                 # 168 -> 84 -> 42 -> 21

    # Flatten (21, H) -> (1, 21*H); feature index = l*H + c (channels-last,
    # matching the synthetic w4 ordering below).
    # TODO(synk): h.reshape(1, 21*H) would replace the slice+concat chain with
    # a single relayout, but a (21,H)->(1,21H) value shape_cast is not a
    # guaranteed Mosaic lowering, so the conservative concat form is kept.
    n_rows = hs[0].shape[0]
    feats = [jnp.concatenate([h[l:l + 1, :] for l in range(n_rows)], axis=1)
             for h in hs]
    feat = feats[0] if BB == 1 else jnp.concatenate(feats, axis=0)   # (BB, 21H)

    # Linear head + clamp(-16, 8) + sigmoid -- all BB rows in one matmul.
    z = jnp.dot(feat, w4[...], preferred_element_type=jnp.float32) + b4[...]
    z = jnp.clip(z, -16.0, 8.0)
    o_ref[0] = 1.0 / (1.0 + jnp.exp(-z))


# ---------------- wrapper ----------------

def _pool_matrix(out_len):
    """(out_len, 2*out_len) AvgPool1d(2) selection matrix (entries 0 / 0.5)."""
    r = jax.lax.broadcasted_iota(jnp.int32, (out_len, 2 * out_len), 0)
    c = jax.lax.broadcasted_iota(jnp.int32, (out_len, 2 * out_len), 1)
    return jnp.where((c == 2 * r) | (c == 2 * r + 1), 0.5, 0.0).astype(jnp.float32)


def _cost_estimate(batch, n_hidden, n_latent):
    flops = 0
    length = L_IN
    cin = 4
    for k_size, _ in CONV_SPECS:
        flops += 2 * length * (k_size * cin) * n_hidden      # im2col conv
        flops += 2 * (length // 2) * length * n_hidden       # pool matmul
        length //= 2
        cin = n_hidden
    flops += 2 * (length * n_hidden) * n_latent              # head (length == 21)
    flops *= batch
    transcendentals = batch * n_latent                       # exp() in sigmoid
    param_bytes = 4 * (11 * 4 * n_hidden + (7 + 5) * n_hidden * n_hidden
                       + 21 * n_hidden * n_latent + 3 * n_hidden + n_latent)
    pool_bytes = 4 * (84 * 168 + 42 * 84 + 21 * 42)
    bytes_accessed = (4 * batch * L_IN * 4 + param_bytes + pool_bytes
                      + 4 * batch * n_latent)
    return pl.CostEstimate(flops=flops, transcendentals=transcendentals,
                           bytes_accessed=bytes_accessed)


def fused_forward_pallas(xc, params):
    """xc: (B, 168, 4) channels-last input; returns sigmoid head output (B, n_latent)."""
    B = xc.shape[0]
    assert xc.shape[1:] == (L_IN, 4), "NeuralCNN requires (B, 4, 168) inputs"
    H = params["b1"].shape[1]
    n_latent = params["w4"].shape[1]

    # Batch-block size BB: amortize per-step fixed costs (grid overhead, DMA
    # setup, output store) over BB elements while keeping >= 2 grid steps
    # whenever B >= 2 so ("parallel",) still feeds both v7x TensorCores
    # (v5e/v6e have one core; the extra steps are harmless there).
    BB = 1 if B <= 1 else min(8, max(1, B // 2))
    G = -(-B // BB)                                  # number of grid steps
    Bp = G * BB
    if Bp != B:                                      # pad batch to a multiple of BB
        xc = jnp.concatenate(
            [xc, jnp.zeros((Bp - B, L_IN, 4), xc.dtype)], axis=0)

    # AvgPool1d(2) selection matrices, computed once in the wrapper (constant
    # folded under jit) and passed as constant inputs -- no per-step iota/where.
    pools = (_pool_matrix(84), _pool_matrix(42), _pool_matrix(21))

    full = lambda a: pl.BlockSpec(a.shape, lambda g: (0,) * a.ndim)

    # VMEM: scratch + weights + pool matrices + double-buffered (BB,168,4)
    # input block is well under 1 MiB -> no vmem_limit override needed on any
    # generation (v7x 64 MiB physical, 32 MiB scoped default).
    out3d = pl.pallas_call(
        fused_cnn_kernel,
        out_shape=jax.ShapeDtypeStruct((G, BB, n_latent), jnp.float32),
        grid=(G,),
        in_specs=[
            pl.BlockSpec((BB, L_IN, 4), lambda g: (g, 0, 0)),
            full(params["w1"]), full(params["b1"]),
            full(params["w2"]), full(params["b2"]),
            full(params["w3"]), full(params["b3"]),
            full(params["w4"]), full(params["b4"]),
            full(pools[0]), full(pools[1]), full(pools[2]),
        ],
        out_specs=pl.BlockSpec((1, BB, n_latent), lambda g: (g, 0, 0)),
        scratch_shapes=[
            pltpu.VMEM((BB, 184, 4), jnp.float32),   # layer-1 pad: 8 + 168 + 5 rows
            pltpu.VMEM((BB, 96, H), jnp.float32),    # layer-2 pad: 8 +  84 + 3 rows
            pltpu.VMEM((BB, 56, H), jnp.float32),    # layer-3 pad: 8 +  42 + 2 rows
        ],
        compiler_params=pltpu.CompilerParams(dimension_semantics=("parallel",)),
        cost_estimate=_cost_estimate(Bp, H, n_latent),
    )(xc, params["w1"], params["b1"], params["w2"], params["b2"],
      params["w3"], params["b3"], params["w4"], params["b4"], *pools)

    return out3d.reshape(Bp, n_latent)[:B]


def neural_cnn_forward(x, params):
    # x: (B, 4, 168) float32 (PyTorch NCW convention).
    xc = jnp.transpose(x, (0, 2, 1))                 # -> (B, 168, 4) channels-last
    s = fused_forward_pallas(xc, params)             # Pallas: whole network fused
    half = s.shape[1] // 2
    p0, p1 = s[:, :half], s[:, half:]                # == out.view(B, 2, n_latent//2)
    # TODO(synk): Box-Muller epilogue (log/sqrt/sin/cos on a tiny (B, n_latent//2)
    # array) stays in plain JAX rather than relying on sin/cos Mosaic lowering.
    # Numerically safe because clamp(-16,8) keeps sigmoid output in ~[1.1e-7, 0.9997].
    r = jnp.sqrt(-2.0 * jnp.log(p0))
    return jnp.concatenate([r * jnp.cos(2.0 * jnp.pi * p1),
                            r * jnp.sin(2.0 * jnp.pi * p1)], axis=1)


# ---------------- synthetic parameters ----------------

def init_params(key, n_hidden, n_latent):
    # kaiming_normal_ (fan_in, gain=sqrt(2)); biases zero -- deterministic, synthetic.
    # Conv weights are stored im2col-style (K*Cin, Cout) with row index = k*Cin + c,
    # i.e. the torch (Cout, Cin, K) weight permuted to (K, Cin, Cout) then reshaped.
    # w4 expects the channels-last flatten (feature index = l*H + c); to load a real
    # torch Linear weight (n_latent, H*21, torch index = c*21 + l), do:
    #   w4 = torch_w.reshape(n_latent, H, 21).transpose(2, 1, 0).reshape(21*H, n_latent)
    H = n_hidden
    ks = jax.random.split(key, 4)

    def kaiming(k, shape, fan_in):
        return jnp.sqrt(2.0 / fan_in) * jax.random.normal(k, shape, jnp.float32)

    return dict(
        w1=kaiming(ks[0], (11 * 4, H), 4 * 11), b1=jnp.zeros((1, H), jnp.float32),
        w2=kaiming(ks[1], (7 * H, H), H * 7),   b2=jnp.zeros((1, H), jnp.float32),
        w3=kaiming(ks[2], (5 * H, H), H * 5),   b3=jnp.zeros((1, H), jnp.float32),
        w4=kaiming(ks[3], (21 * H, n_latent), H * 21),
        b4=jnp.zeros((1, n_latent), jnp.float32),
    )


if __name__ == "__main__":
    B, n_hidden, n_latent = 2, 32, 16            # L=168 -> 84 -> 42 -> 21 (=> H*21 flatten)
    key = jax.random.PRNGKey(0)
    kx, kp = jax.random.split(key)
    x = jax.random.normal(kx, (B, 4, L_IN), jnp.float32)
    params = init_params(kp, n_hidden, n_latent)

    out = jax.jit(neural_cnn_forward)(x, params)
    out = jax.block_until_ready(out)

    assert out.shape == (B, n_latent)
    assert bool(jnp.all(jnp.isfinite(out)))
    print("KERNEL_OK")
</pallas_src>

<mosaic_0001>
module attributes {stable_mosaic.version = 11 : i64} {
  func.func @fused_cnn_kernel(%arg0: i32, %arg1: memref<1x168x4xf32, #tpu.memory_space<vmem>>, %arg2: memref<44x32xf32, #tpu.memory_space<vmem>>, %arg3: memref<1x32xf32, #tpu.memory_space<vmem>>, %arg4: memref<224x32xf32, #tpu.memory_space<vmem>>, %arg5: memref<1x32xf32, #tpu.memory_space<vmem>>, %arg6: memref<160x32xf32, #tpu.memory_space<vmem>>, %arg7: memref<1x32xf32, #tpu.memory_space<vmem>>, %arg8: memref<672x16xf32, #tpu.memory_space<vmem>>, %arg9: memref<1x16xf32, #tpu.memory_space<vmem>>, %arg10: memref<84x168xf32, #tpu.memory_space<vmem>>, %arg11: memref<42x84xf32, #tpu.memory_space<vmem>>, %arg12: memref<21x42xf32, #tpu.memory_space<vmem>>, %arg13: memref<1x1x16xf32, #tpu.memory_space<vmem>>, %arg14: memref<1x184x4xf32, #tpu.memory_space<vmem>>, %arg15: memref<1x96x32xf32, #tpu.memory_space<vmem>>, %arg16: memref<1x56x32xf32, #tpu.memory_space<vmem>>) attributes {dimension_semantics = [#tpu.dimension_semantics<parallel>], iteration_bounds = array<i64: 2>, scalar_prefetch = 0 : i64, scratch_operands = 3 : i64, tpu.core_type = #tpu.core_type<tc>, window_params = [{transform_indices = @transform_0, window_bounds = array<i64: 1, 168, 4>}, {pipeline_mode = #tpu.pipeline_mode<synchronous>, transform_indices = @transform_1, window_bounds = array<i64: 44, 32>}, {pipeline_mode = #tpu.pipeline_mode<synchronous>, transform_indices = @transform_2, window_bounds = array<i64: 1, 32>}, {pipeline_mode = #tpu.pipeline_mode<synchronous>, transform_indices = @transform_3, window_bounds = array<i64: 224, 32>}, {pipeline_mode = #tpu.pipeline_mode<synchronous>, transform_indices = @transform_4, window_bounds = array<i64: 1, 32>}, {pipeline_mode = #tpu.pipeline_mode<synchronous>, transform_indices = @transform_5, window_bounds = array<i64: 160, 32>}, {pipeline_mode = #tpu.pipeline_mode<synchronous>, transform_indices = @transform_6, window_bounds = array<i64: 1, 32>}, {pipeline_mode = #tpu.pipeline_mode<synchronous>, transform_indices = @transform_7, window_bounds = array<i64: 672, 16>}, {pipeline_mode = #tpu.pipeline_mode<synchronous>, transform_indices = @transform_8, window_bounds = array<i64: 1, 16>}, {pipeline_mode = #tpu.pipeline_mode<synchronous>, transform_indices = @transform_9, window_bounds = array<i64: 84, 168>}, {pipeline_mode = #tpu.pipeline_mode<synchronous>, transform_indices = @transform_10, window_bounds = array<i64: 42, 84>}, {pipeline_mode = #tpu.pipeline_mode<synchronous>, transform_indices = @transform_11, window_bounds = array<i64: 21, 42>}, {transform_indices = @transform_12, window_bounds = array<i64: 1, 1, 16>}]} {
    %c0 = arith.constant 0 : index
    %c0_0 = arith.constant 0 : index
    %c0_1 = arith.constant 0 : index
    %0 = vector.load %arg1[%c0, %c0_0, %c0_1] : memref<1x168x4xf32, #tpu.memory_space<vmem>>, vector<1x168x4xf32>
    %1 = vector.shape_cast %0 : vector<1x168x4xf32> to vector<168x4xf32>
    %c0_2 = arith.constant 0 : index
    %c0_3 = arith.constant 0 : index
    %2 = vector.load %arg2[%c0_2, %c0_3] : memref<44x32xf32, #tpu.memory_space<vmem>>, vector<44x32xf32>
    %c0_4 = arith.constant 0 : index
    %c0_5 = arith.constant 0 : index
    %3 = vector.load %arg3[%c0_4, %c0_5] : memref<1x32xf32, #tpu.memory_space<vmem>>, vector<1x32xf32>
    %c0_6 = arith.constant 0 : index
    %c0_7 = arith.constant 0 : index
    %4 = vector.load %arg10[%c0_6, %c0_7] : memref<84x168xf32, #tpu.memory_space<vmem>>, vector<84x168xf32>
    %cst = arith.constant 0.000000e+00 : f32
    %5 = vector.broadcast %cst : f32 to vector<1x5x4xf32>
    %c0_8 = arith.constant 0 : index
    %c3 = arith.constant 3 : index
    %c0_9 = arith.constant 0 : index
    %6 = vector.load %arg14[%c0_8, %c3, %c0_9] : memref<1x184x4xf32, #tpu.memory_space<vmem>>, vector<1x5x4xf32>
    tpu.vector_store %arg14[%c0_8, %c3, %c0_9], %5 {strides = array<i32>} : memref<1x184x4xf32, #tpu.memory_space<vmem>>, vector<1x5x4xf32>,
    %c0_10 = arith.constant 0 : index
    %c176 = arith.constant 176 : index
    %c0_11 = arith.constant 0 : index
    %7 = vector.load %arg14[%c0_10, %c176, %c0_11] : memref<1x184x4xf32, #tpu.memory_space<vmem>>, vector<1x5x4xf32>
    tpu.vector_store %arg14[%c0_10, %c176, %c0_11], %5 {strides = array<i32>} : memref<1x184x4xf32, #tpu.memory_space<vmem>>, vector<1x5x4xf32>,
    %c0_12 = arith.constant 0 : index
    %c8 = arith.constant 8 : index
    %c0_13 = arith.constant 0 : index
    %8 = vector.load %arg14[%c0_12, %c8, %c0_13] : memref<1x184x4xf32, #tpu.memory_space<vmem>>, vector<1x168x4xf32>
    %9 = vector.shape_cast %8 : vector<1x168x4xf32> to vector<168x4xf32>
    %10 = vector.shape_cast %1 : vector<168x4xf32> to vector<1x168x4xf32>
    tpu.vector_store %arg14[%c0_12, %c8, %c0_13], %10 {strides = array<i32>} : memref<1x184x4xf32, #tpu.memory_space<vmem>>, vector<1x168x4xf32>,
    %c0_14 = arith.constant 0 : index
    %c3_15 = arith.constant 3 : index
    %c0_16 = arith.constant 0 : index
    %11 = vector.load %arg14[%c0_14, %c3_15, %c0_16] : memref<1x184x4xf32, #tpu.memory_space<vmem>>, vector<1x168x4xf32>
    %12 = vector.shape_cast %11 : vector<1x168x4xf32> to vector<168x4xf32>
    %c0_17 = arith.constant 0 : index
    %c4 = arith.constant 4 : index
    %c0_18 = arith.constant 0 : index
    %13 = vector.load %arg14[%c0_17, %c4, %c0_18] : memref<1x184x4xf32, #tpu.memory_space<vmem>>, vector<1x168x4xf32>
    %14 = vector.shape_cast %13 : vector<1x168x4xf32> to vector<168x4xf32>
    %c0_19 = arith.constant 0 : index
    %c5 = arith.constant 5 : index
    %c0_20 = arith.constant 0 : index
    %15 = vector.load %arg14[%c0_19, %c5, %c0_20] : memref<1x184x4xf32, #tpu.memory_space<vmem>>, vector<1x168x4xf32>
    %16 = vector.shape_cast %15 : vector<1x168x4xf32> to vector<168x4xf32>
    %c0_21 = arith.constant 0 : index
    %c6 = arith.constant 6 : index
    %c0_22 = arith.constant 0 : index
    %17 = vector.load %arg14[%c0_21, %c6, %c0_22] : memref<1x184x4xf32, #tpu.memory_space<vmem>>, vector<1x168x4xf32>
    %18 = vector.shape_cast %17 : vector<1x168x4xf32> to vector<168x4xf32>
    %c0_23 = arith.constant 0 : index
    %c7 = arith.constant 7 : index
    %c0_24 = arith.constant 0 : index
    %19 = vector.load %arg14[%c0_23, %c7, %c0_24] : memref<1x184x4xf32, #tpu.memory_space<vmem>>, vector<1x168x4xf32>
    %20 = vector.shape_cast %19 : vector<1x168x4xf32> to vector<168x4xf32>
    %c0_25 = arith.constant 0 : index
    %c8_26 = arith.constant 8 : index
    %c0_27 = arith.constant 0 : index
    %21 = vector.load %arg14[%c0_25, %c8_26, %c0_27] : memref<1x184x4xf32, #tpu.memory_space<vmem>>, vector<1x168x4xf32>
    %22 = vector.shape_cast %21 : vector<1x168x4xf32> to vector<168x4xf32>
    %c0_28 = arith.constant 0 : index
    %c9 = arith.constant 9 : index
    %c0_29 = arith.constant 0 : index
    %23 = vector.load %arg14[%c0_28, %c9, %c0_29] : memref<1x184x4xf32, #tpu.memory_space<vmem>>, vector<1x168x4xf32>
    %24 = vector.shape_cast %23 : vector<1x168x4xf32> to vector<168x4xf32>
    %c0_30 = arith.constant 0 : index
    %c10 = arith.constant 10 : index
    %c0_31 = arith.constant 0 : index
    %25 = vector.load %arg14[%c0_30, %c10, %c0_31] : memref<1x184x4xf32, #tpu.memory_space<vmem>>, vector<1x168x4xf32>
    %26 = vector.shape_cast %25 : vector<1x168x4xf32> to vector<168x4xf32>
    %c0_32 = arith.constant 0 : index
    %c11 = arith.constant 11 : index
    %c0_33 = arith.constant 0 : index
    %27 = vector.load %arg14[%c0_32, %c11, %c0_33] : memref<1x184x4xf32, #tpu.memory_space<vmem>>, vector<1x168x4xf32>
    %28 = vector.shape_cast %27 : vector<1x168x4xf32> to vector<168x4xf32>
    %c0_34 = arith.constant 0 : index
    %c12 = arith.constant 12 : index
    %c0_35 = arith.constant 0 : index
    %29 = vector.load %arg14[%c0_34, %c12, %c0_35] : memref<1x184x4xf32, #tpu.memory_space<vmem>>, vector<1x168x4xf32>
    %30 = vector.shape_cast %29 : vector<1x168x4xf32> to vector<168x4xf32>
    %c0_36 = arith.constant 0 : index
    %c13 = arith.constant 13 : index
    %c0_37 = arith.constant 0 : index
    %31 = vector.load %arg14[%c0_36, %c13, %c0_37] : memref<1x184x4xf32, #tpu.memory_space<vmem>>, vector<1x168x4xf32>
    %32 = vector.shape_cast %31 : vector<1x168x4xf32> to vector<168x4xf32>
    %33 = tpu.concatenate %12, %14, %16, %18, %20, %22, %24, %26, %28, %30, %32 in 1 : vector<168x4xf32>, vector<168x4xf32>, vector<168x4xf32>, vector<168x4xf32>, vector<168x4xf32>, vector<168x4xf32>, vector<168x4xf32>, vector<168x4xf32>, vector<168x4xf32>, vector<168x4xf32>, vector<168x4xf32> -> vector<168x44xf32>
    %cst_38 = arith.constant dense<0.000000e+00> : vector<168x32xf32>
    %34 = tpu.matmul %33, %2, %cst_38 {dimension_numbers = #tpu.dot_dimension_numbers<[1], [0], [0], [1], [0, 0, 1, 1], [], []>} : vector<168x44xf32>, vector<44x32xf32>, vector<168x32xf32> -> vector<168x32xf32>
    %35 = vector.broadcast %3 : vector<1x32xf32> to vector<168x32xf32>
    %36 = arith.addf %34, %35 : vector<168x32xf32>
    %cst_39 = arith.constant 0.000000e+00 : f32
    %37 = vector.broadcast %cst_39 : f32 to vector<168x32xf32>
    %38 = arith.maximumf %36, %37 : vector<168x32xf32>
    %cst_40 = arith.constant dense<0.000000e+00> : vector<84x32xf32>
    %39 = tpu.matmul %4, %38, %cst_40 {dimension_numbers = #tpu.dot_dimension_numbers<[1], [0], [0], [1], [0, 0, 1, 1], [], []>} : vector<84x168xf32>, vector<168x32xf32>, vector<84x32xf32> -> vector<84x32xf32>
    %c0_41 = arith.constant 0 : index
    %c0_42 = arith.constant 0 : index
    %40 = vector.load %arg4[%c0_41, %c0_42] : memref<224x32xf32, #tpu.memory_space<vmem>>, vector<224x32xf32>
    %c0_43 = arith.constant 0 : index
    %c0_44 = arith.constant 0 : index
    %41 = vector.load %arg5[%c0_43, %c0_44] : memref<1x32xf32, #tpu.memory_space<vmem>>, vector<1x32xf32>
    %c0_45 = arith.constant 0 : index
    %c0_46 = arith.constant 0 : index
    %42 = vector.load %arg11[%c0_45, %c0_46] : memref<42x84xf32, #tpu.memory_space<vmem>>, vector<42x84xf32>
    %cst_47 = arith.constant 0.000000e+00 : f32
    %43 = vector.broadcast %cst_47 : f32 to vector<1x3x32xf32>
    %c0_48 = arith.constant 0 : index
    %c5_49 = arith.constant 5 : index
    %c0_50 = arith.constant 0 : index
    %44 = vector.load %arg15[%c0_48, %c5_49, %c0_50] : memref<1x96x32xf32, #tpu.memory_space<vmem>>, vector<1x3x32xf32>
    tpu.vector_store %arg15[%c0_48, %c5_49, %c0_50], %43 {strides = array<i32>} : memref<1x96x32xf32, #tpu.memory_space<vmem>>, vector<1x3x32xf32>,
    %c0_51 = arith.constant 0 : index
    %c92 = arith.constant 92 : index
    %c0_52 = arith.constant 0 : index
    %45 = vector.load %arg15[%c0_51, %c92, %c0_52] : memref<1x96x32xf32, #tpu.memory_space<vmem>>, vector<1x3x32xf32>
    tpu.vector_store %arg15[%c0_51, %c92, %c0_52], %43 {strides = array<i32>} : memref<1x96x32xf32, #tpu.memory_space<vmem>>, vector<1x3x32xf32>,
    %c0_53 = arith.constant 0 : index
    %c8_54 = arith.constant 8 : index
    %c0_55 = arith.constant 0 : index
    %46 = vector.load %arg15[%c0_53, %c8_54, %c0_55] : memref<1x96x32xf32, #tpu.memory_space<vmem>>, vector<1x84x32xf32>
    %47 = vector.shape_cast %46 : vector<1x84x32xf32> to vector<84x32xf32>
    %48 = vector.shape_cast %39 : vector<84x32xf32> to vector<1x84x32xf32>
    tpu.vector_store %arg15[%c0_53, %c8_54, %c0_55], %48 {strides = array<i32>} : memref<1x96x32xf32, #tpu.memory_space<vmem>>, vector<1x84x32xf32>,
    %c0_56 = arith.constant 0 : index
    %c5_57 = arith.constant 5 : index
    %c0_58 = arith.constant 0 : index
    %49 = vector.load %arg15[%c0_56, %c5_57, %c0_58] : memref<1x96x32xf32, #tpu.memory_space<vmem>>, vector<1x84x32xf32>
    %50 = vector.shape_cast %49 : vector<1x84x32xf32> to vector<84x32xf32>
    %c0_59 = arith.constant 0 : index
    %c6_60 = arith.constant 6 : index
    %c0_61 = arith.constant 0 : index
    %51 = vector.load %arg15[%c0_59, %c6_60, %c0_61] : memref<1x96x32xf32, #tpu.memory_space<vmem>>, vector<1x84x32xf32>
    %52 = vector.shape_cast %51 : vector<1x84x32xf32> to vector<84x32xf32>
    %c0_62 = arith.constant 0 : index
    %c7_63 = arith.constant 7 : index
    %c0_64 = arith.constant 0 : index
    %53 = vector.load %arg15[%c0_62, %c7_63, %c0_64] : memref<1x96x32xf32, #tpu.memory_space<vmem>>, vector<1x84x32xf32>
    %54 = vector.shape_cast %53 : vector<1x84x32xf32> to vector<84x32xf32>
    %c0_65 = arith.constant 0 : index
    %c8_66 = arith.constant 8 : index
    %c0_67 = arith.constant 0 : index
    %55 = vector.load %arg15[%c0_65, %c8_66, %c0_67] : memref<1x96x32xf32, #tpu.memory_space<vmem>>, vector<1x84x32xf32>
    %56 = vector.shape_cast %55 : vector<1x84x32xf32> to vector<84x32xf32>
    %c0_68 = arith.constant 0 : index
    %c9_69 = arith.constant 9 : index
    %c0_70 = arith.constant 0 : index
    %57 = vector.load %arg15[%c0_68, %c9_69, %c0_70] : memref<1x96x32xf32, #tpu.memory_space<vmem>>, vector<1x84x32xf32>
    %58 = vector.shape_cast %57 : vector<1x84x32xf32> to vector<84x32xf32>
    %c0_71 = arith.constant 0 : index
    %c10_72 = arith.constant 10 : index
    %c0_73 = arith.constant 0 : index
    %59 = vector.load %arg15[%c0_71, %c10_72, %c0_73] : memref<1x96x32xf32, #tpu.memory_space<vmem>>, vector<1x84x32xf32>
    %60 = vector.shape_cast %59 : vector<1x84x32xf32> to vector<84x32xf32>
    %c0_74 = arith.constant 0 : index
    %c11_75 = arith.constant 11 : index
    %c0_76 = arith.constant 0 : index
    %61 = vector.load %arg15[%c0_74, %c11_75, %c0_76] : memref<1x96x32xf32, #tpu.memory_space<vmem>>, vector<1x84x32xf32>
    %62 = vector.shape_cast %61 : vector<1x84x32xf32> to vector<84x32xf32>
    %63 = tpu.concatenate %50, %52, %54, %56, %58, %60, %62 in 1 : vector<84x32xf32>, vector<84x32xf32>, vector<84x32xf32>, vector<84x32xf32>, vector<84x32xf32>, vector<84x32xf32>, vector<84x32xf32> -> vector<84x224xf32>
    %cst_77 = arith.constant dense<0.000000e+00> : vector<84x32xf32>
    %64 = tpu.matmul %63, %40, %cst_77 {dimension_numbers = #tpu.dot_dimension_numbers<[1], [0], [0], [1], [0, 0, 1, 1], [], []>} : vector<84x224xf32>, vector<224x32xf32>, vector<84x32xf32> -> vector<84x32xf32>
    %65 = vector.broadcast %41 : vector<1x32xf32> to vector<84x32xf32>
    %66 = arith.addf %64, %65 : vector<84x32xf32>
    %cst_78 = arith.constant 0.000000e+00 : f32
    %67 = vector.broadcast %cst_78 : f32 to vector<84x32xf32>
    %68 = arith.maximumf %66, %67 : vector<84x32xf32>
    %cst_79 = arith.constant dense<0.000000e+00> : vector<42x32xf32>
    %69 = tpu.matmul %42, %68, %cst_79 {dimension_numbers = #tpu.dot_dimension_numbers<[1], [0], [0], [1], [0, 0, 1, 1], [], []>} : vector<42x84xf32>, vector<84x32xf32>, vector<42x32xf32> -> vector<42x32xf32>
    %c0_80 = arith.constant 0 : index
    %c0_81 = arith.constant 0 : index
    %70 = vector.load %arg6[%c0_80, %c0_81] : memref<160x32xf32, #tpu.memory_space<vmem>>, vector<160x32xf32>
    %c0_82 = arith.constant 0 : index
    %c0_83 = arith.constant 0 : index
    %71 = vector.load %arg7[%c0_82, %c0_83] : memref<1x32xf32, #tpu.memory_space<vmem>>, vector<1x32xf32>
    %c0_84 = arith.constant 0 : index
    %c0_85 = arith.constant 0 : index
    %72 = vector.load %arg12[%c0_84, %c0_85] : memref<21x42xf32, #tpu.memory_space<vmem>>, vector<21x42xf32>
    %cst_86 = arith.constant 0.000000e+00 : f32
    %73 = vector.broadcast %cst_86 : f32 to vector<1x2x32xf32>
    %c0_87 = arith.constant 0 : index
    %c6_88 = arith.constant 6 : index
    %c0_89 = arith.constant 0 : index
    %74 = vector.load %arg16[%c0_87, %c6_88, %c0_89] : memref<1x56x32xf32, #tpu.memory_space<vmem>>, vector<1x2x32xf32>
    tpu.vector_store %arg16[%c0_87, %c6_88, %c0_89], %73 {strides = array<i32>} : memref<1x56x32xf32, #tpu.memory_space<vmem>>, vector<1x2x32xf32>,
    %c0_90 = arith.constant 0 : index
    %c50 = arith.constant 50 : index
    %c0_91 = arith.constant 0 : index
    %75 = vector.load %arg16[%c0_90, %c50, %c0_91] : memref<1x56x32xf32, #tpu.memory_space<vmem>>, vector<1x2x32xf32>
    tpu.vector_store %arg16[%c0_90, %c50, %c0_91], %73 {strides = array<i32>} : memref<1x56x32xf32, #tpu.memory_space<vmem>>, vector<1x2x32xf32>,
    %c0_92 = arith.constant 0 : index
    %c8_93 = arith.constant 8 : index
    %c0_94 = arith.constant 0 : index
    %76 = vector.load %arg16[%c0_92, %c8_93, %c0_94] : memref<1x56x32xf32, #tpu.memory_space<vmem>>, vector<1x42x32xf32>
    %77 = vector.shape_cast %76 : vector<1x42x32xf32> to vector<42x32xf32>
    %78 = vector.shape_cast %69 : vector<42x32xf32> to vector<1x42x32xf32>
    tpu.vector_store %arg16[%c0_92, %c8_93, %c0_94], %78 {strides = array<i32>} : memref<1x56x32xf32, #tpu.memory_space<vmem>>, vector<1x42x32xf32>,
    %c0_95 = arith.constant 0 : index
    %c6_96 = arith.constant 6 : index
    %c0_97 = arith.constant 0 : index
    %79 = vector.load %arg16[%c0_95, %c6_96, %c0_97] : memref<1x56x32xf32, #tpu.memory_space<vmem>>, vector<1x42x32xf32>
    %80 = vector.shape_cast %79 : vector<1x42x32xf32> to vector<42x32xf32>
    %c0_98 = arith.constant 0 : index
    %c7_99 = arith.constant 7 : index
    %c0_100 = arith.constant 0 : index
    %81 = vector.load %arg16[%c0_98, %c7_99, %c0_100] : memref<1x56x32xf32, #tpu.memory_space<vmem>>, vector<1x42x32xf32>
    %82 = vector.shape_cast %81 : vector<1x42x32xf32> to vector<42x32xf32>
    %c0_101 = arith.constant 0 : index
    %c8_102 = arith.constant 8 : index
    %c0_103 = arith.constant 0 : index
    %83 = vector.load %arg16[%c0_101, %c8_102, %c0_103] : memref<1x56x32xf32, #tpu.memory_space<vmem>>, vector<1x42x32xf32>
    %84 = vector.shape_cast %83 : vector<1x42x32xf32> to vector<42x32xf32>
    %c0_104 = arith.constant 0 : index
    %c9_105 = arith.constant 9 : index
    %c0_106 = arith.constant 0 : index
    %85 = vector.load %arg16[%c0_104, %c9_105, %c0_106] : memref<1x56x32xf32, #tpu.memory_space<vmem>>, vector<1x42x32xf32>
    %86 = vector.shape_cast %85 : vector<1x42x32xf32> to vector<42x32xf32>
    %c0_107 = arith.constant 0 : index
    %c10_108 = arith.constant 10 : index
    %c0_109 = arith.constant 0 : index
    %87 = vector.load %arg16[%c0_107, %c10_108, %c0_109] : memref<1x56x32xf32, #tpu.memory_space<vmem>>, vector<1x42x32xf32>
    %88 = vector.shape_cast %87 : vector<1x42x32xf32> to vector<42x32xf32>
    %89 = tpu.concatenate %80, %82, %84, %86, %88 in 1 : vector<42x32xf32>, vector<42x32xf32>, vector<42x32xf32>, vector<42x32xf32>, vector<42x32xf32> -> vector<42x160xf32>
    %cst_110 = arith.constant dense<0.000000e+00> : vector<42x32xf32>
    %90 = tpu.matmul %89, %70, %cst_110 {dimension_numbers = #tpu.dot_dimension_numbers<[1], [0], [0], [1], [0, 0, 1, 1], [], []>} : vector<42x160xf32>, vector<160x32xf32>, vector<42x32xf32> -> vector<42x32xf32>
    %91 = vector.broadcast %71 : vector<1x32xf32> to vector<42x32xf32>
    %92 = arith.addf %90, %91 : vector<42x32xf32>
    %cst_111 = arith.constant 0.000000e+00 : f32
    %93 = vector.broadcast %cst_111 : f32 to vector<42x32xf32>
    %94 = arith.maximumf %92, %93 : vector<42x32xf32>
    %cst_112 = arith.constant dense<0.000000e+00> : vector<21x32xf32>
    %95 = tpu.matmul %72, %94, %cst_112 {dimension_numbers = #tpu.dot_dimension_numbers<[1], [0], [0], [1], [0, 0, 1, 1], [], []>} : vector<21x42xf32>, vector<42x32xf32>, vector<21x32xf32> -> vector<21x32xf32>
    %96 = vector.extract_strided_slice %95 {offsets = [0, 0], sizes = [1, 32], strides = [1, 1]} : vector<21x32xf32> to vector<1x32xf32>
    %97 = vector.extract_strided_slice %95 {offsets = [1, 0], sizes = [1, 32], strides = [1, 1]} : vector<21x32xf32> to vector<1x32xf32>
    %98 = vector.extract_strided_slice %95 {offsets = [2, 0], sizes = [1, 32], strides = [1, 1]} : vector<21x32xf32> to vector<1x32xf32>
    %99 = vector.extract_strided_slice %95 {offsets = [3, 0], sizes = [1, 32], strides = [1, 1]} : vector<21x32xf32> to vector<1x32xf32>
    %100 = vector.extract_strided_slice %95 {offsets = [4, 0], sizes = [1, 32], strides = [1, 1]} : vector<21x32xf32> to vector<1x32xf32>
    %101 = vector.extract_strided_slice %95 {offsets = [5, 0], sizes = [1, 32], strides = [1, 1]} : vector<21x32xf32> to vector<1x32xf32>
    %102 = vector.extract_strided_slice %95 {offsets = [6, 0], sizes = [1, 32], strides = [1, 1]} : vector<21x32xf32> to vector<1x32xf32>
    %103 = vector.extract_strided_slice %95 {offsets = [7, 0], sizes = [1, 32], strides = [1, 1]} : vector<21x32xf32> to vector<1x32xf32>
    %104 = vector.extract_strided_slice %95 {offsets = [8, 0], sizes = [1, 32], strides = [1, 1]} : vector<21x32xf32> to vector<1x32xf32>
    %105 = vector.extract_strided_slice %95 {offsets = [9, 0], sizes = [1, 32], strides = [1, 1]} : vector<21x32xf32> to vector<1x32xf32>
    %106 = vector.extract_strided_slice %95 {offsets = [10, 0], sizes = [1, 32], strides = [1, 1]} : vector<21x32xf32> to vector<1x32xf32>
    %107 = vector.extract_strided_slice %95 {offsets = [11, 0], sizes = [1, 32], strides = [1, 1]} : vector<21x32xf32> to vector<1x32xf32>
    %108 = vector.extract_strided_slice %95 {offsets = [12, 0], sizes = [1, 32], strides = [1, 1]} : vector<21x32xf32> to vector<1x32xf32>
    %109 = vector.extract_strided_slice %95 {offsets = [13, 0], sizes = [1, 32], strides = [1, 1]} : vector<21x32xf32> to vector<1x32xf32>
    %110 = vector.extract_strided_slice %95 {offsets = [14, 0], sizes = [1, 32], strides = [1, 1]} : vector<21x32xf32> to vector<1x32xf32>
    %111 = vector.extract_strided_slice %95 {offsets = [15, 0], sizes = [1, 32], strides = [1, 1]} : vector<21x32xf32> to vector<1x32xf32>
    %112 = vector.extract_strided_slice %95 {offsets = [16, 0], sizes = [1, 32], strides = [1, 1]} : vector<21x32xf32> to vector<1x32xf32>
    %113 = vector.extract_strided_slice %95 {offsets = [17, 0], sizes = [1, 32], strides = [1, 1]} : vector<21x32xf32> to vector<1x32xf32>
    %114 = vector.extract_strided_slice %95 {offsets = [18, 0], sizes = [1, 32], strides = [1, 1]} : vector<21x32xf32> to vector<1x32xf32>
    %115 = vector.extract_strided_slice %95 {offsets = [19, 0], sizes = [1, 32], strides = [1, 1]} : vector<21x32xf32> to vector<1x32xf32>
    %116 = vector.extract_strided_slice %95 {offsets = [20, 0], sizes = [1, 32], strides = [1, 1]} : vector<21x32xf32> to vector<1x32xf32>
    %117 = tpu.concatenate %96, %97, %98, %99, %100, %101, %102, %103, %104, %105, %106, %107, %108, %109, %110, %111 in 1 : vector<1x32xf32>, vector<1x32xf32>, vector<1x32xf32>, vector<1x32xf32>, vector<1x32xf32>, vector<1x32xf32>, vector<1x32xf32>, vector<1x32xf32>, vector<1x32xf32>, vector<1x32xf32>, vector<1x32xf32>, vector<1x32xf32>, vector<1x32xf32>, vector<1x32xf32>, vector<1x32xf32>, vector<1x32xf32> -> vector<1x512xf32>
    %118 = tpu.concatenate %112, %113, %114, %115, %116 in 1 : vector<1x32xf32>, vector<1x32xf32>, vector<1x32xf32>, vector<1x32xf32>, vector<1x32xf32> -> vector<1x160xf32>
    %119 = tpu.concatenate %117, %118 in 1 : vector<1x512xf32>, vector<1x160xf32> -> vector<1x672xf32>
    %c0_113 = arith.constant 0 : index
    %c0_114 = arith.constant 0 : index
    %120 = vector.load %arg8[%c0_113, %c0_114] : memref<672x16xf32, #tpu.memory_space<vmem>>, vector<672x16xf32>
    %cst_115 = arith.constant dense<0.000000e+00> : vector<1x16xf32>
    %121 = tpu.matmul %119, %120, %cst_115 {dimension_numbers = #tpu.dot_dimension_numbers<[1], [0], [0], [1], [0, 0, 1, 1], [], []>} : vector<1x672xf32>, vector<672x16xf32>, vector<1x16xf32> -> vector<1x16xf32>
    %c0_116 = arith.constant 0 : index
    %c0_117 = arith.constant 0 : index
    %122 = vector.load %arg9[%c0_116, %c0_117] : memref<1x16xf32, #tpu.memory_space<vmem>>, vector<1x16xf32>
    %123 = arith.addf %121, %122 : vector<1x16xf32>
    %cst_118 = arith.constant -1.600000e+01 : f32
    %cst_119 = arith.constant 8.000000e+00 : f32
    %124 = vector.broadcast %cst_118 : f32 to vector<1x16xf32>
    %125 = arith.maximumf %124, %123 : vector<1x16xf32>
    %126 = vector.broadcast %cst_119 : f32 to vector<1x16xf32>
    %127 = arith.minimumf %126, %125 : vector<1x16xf32>
    %cst_120 = arith.constant 0.000000e+00 : f32
    %128 = vector.broadcast %cst_120 : f32 to vector<1x16xf32>
    %129 = arith.subf %128, %127 : vector<1x16xf32>
    %130 = math.exp %129 : vector<1x16xf32>
    %cst_121 = arith.constant 1.000000e+00 : f32
    %131 = vector.broadcast %cst_121 : f32 to vector<1x16xf32>
    %132 = arith.addf %131, %130 : vector<1x16xf32>
    %cst_122 = arith.constant 1.000000e+00 : f32
    %133 = vector.broadcast %cst_122 : f32 to vector<1x16xf32>
    %134 = arith.divf %133, %132 : vector<1x16xf32>
    %c0_123 = arith.constant 0 : index
    %c0_124 = arith.constant 0 : index
    %c0_125 = arith.constant 0 : index
    %135 = vector.load %arg13[%c0_123, %c0_124, %c0_125] : memref<1x1x16xf32, #tpu.memory_space<vmem>>, vector<1x1x16xf32>
    %136 = vector.shape_cast %135 : vector<1x1x16xf32> to vector<1x16xf32>
    %137 = vector.shape_cast %134 : vector<1x16xf32> to vector<1x1x16xf32>
    tpu.vector_store %arg13[%c0_123, %c0_124, %c0_125], %137 {strides = array<i32>} : memref<1x1x16xf32, #tpu.memory_space<vmem>>, vector<1x1x16xf32>,
    return
  }
  func.func @transform_0(%arg0: i32) -> (i32, i32, i32) {
    %c0_i32 = arith.constant 0 : i32
    %c0_i32_0 = arith.constant 0 : i32
    %c0_i32_1 = arith.constant 0 : i32
    return %arg0, %c0_i32, %c0_i32_0 : i32, i32, i32
  }
  func.func @transform_1(%arg0: i32) -> (i32, i32) {
    %c0_i32 = arith.constant 0 : i32
    %c0_i32_0 = arith.constant 0 : i32
    %c0_i32_1 = arith.constant 0 : i32
    return %c0_i32, %c0_i32_0 : i32, i32
  }
  func.func @transform_2(%arg0: i32) -> (i32, i32) {
    %c0_i32 = arith.constant 0 : i32
    %c0_i32_0 = arith.constant 0 : i32
    %c0_i32_1 = arith.constant 0 : i32
    return %c0_i32, %c0_i32_0 : i32, i32
  }
  func.func @transform_3(%arg0: i32) -> (i32, i32) {
    %c0_i32 = arith.constant 0 : i32
    %c0_i32_0 = arith.constant 0 : i32
    %c0_i32_1 = arith.constant 0 : i32
    return %c0_i32, %c0_i32_0 : i32, i32
  }
  func.func @transform_4(%arg0: i32) -> (i32, i32) {
    %c0_i32 = arith.constant 0 : i32
    %c0_i32_0 = arith.constant 0 : i32
    %c0_i32_1 = arith.constant 0 : i32
    return %c0_i32, %c0_i32_0 : i32, i32
  }
  func.func @transform_5(%arg0: i32) -> (i32, i32) {
    %c0_i32 = arith.constant 0 : i32
    %c0_i32_0 = arith.constant 0 : i32
    %c0_i32_1 = arith.constant 0 : i32
    return %c0_i32, %c0_i32_0 : i32, i32
  }
  func.func @transform_6(%arg0: i32) -> (i32, i32) {
    %c0_i32 = arith.constant 0 : i32
    %c0_i32_0 = arith.constant 0 : i32
    %c0_i32_1 = arith.constant 0 : i32
    return %c0_i32, %c0_i32_0 : i32, i32
  }
  func.func @transform_7(%arg0: i32) -> (i32, i32) {
    %c0_i32 = arith.constant 0 : i32
    %c0_i32_0 = arith.constant 0 : i32
    %c0_i32_1 = arith.constant 0 : i32
    return %c0_i32, %c0_i32_0 : i32, i32
  }
  func.func @transform_8(%arg0: i32) -> (i32, i32) {
    %c0_i32 = arith.constant 0 : i32
    %c0_i32_0 = arith.constant 0 : i32
    %c0_i32_1 = arith.constant 0 : i32
    return %c0_i32, %c0_i32_0 : i32, i32
  }
  func.func @transform_9(%arg0: i32) -> (i32, i32) {
    %c0_i32 = arith.constant 0 : i32
    %c0_i32_0 = arith.constant 0 : i32
    %c0_i32_1 = arith.constant 0 : i32
    return %c0_i32, %c0_i32_0 : i32, i32
  }
  func.func @transform_10(%arg0: i32) -> (i32, i32) {
    %c0_i32 = arith.constant 0 : i32
    %c0_i32_0 = arith.constant 0 : i32
    %c0_i32_1 = arith.constant 0 : i32
    return %c0_i32, %c0_i32_0 : i32, i32
  }
  func.func @transform_11(%arg0: i32) -> (i32, i32) {
    %c0_i32 = arith.constant 0 : i32
    %c0_i32_0 = arith.constant 0 : i32
    %c0_i32_1 = arith.constant 0 : i32
    return %c0_i32, %c0_i32_0 : i32, i32
  }
  func.func @transform_12(%arg0: i32) -> (i32, i32, i32) {
    %c0_i32 = arith.constant 0 : i32
    %c0_i32_0 = arith.constant 0 : i32
    %c0_i32_1 = arith.constant 0 : i32
    return %arg0, %c0_i32, %c0_i32_0 : i32, i32, i32
  }
}

</mosaic_0001>

<bundles_post_ra>
// kernel: neural_cnn_forward.1
= control target key start
LH: loop header
LB: loop body
LE: loop exit
PB: predicated region body
PF: predicated region fallthrough
CT: control target
= control target key end

     0   :  { %s4177_s21 = smov 0   ;;  %s5910_s0 = inlined_call_operand.vmem [shape: f32[2,168,4], index: 0, kind: input, shape index: {}]   ;;  %s5911_s1 = inlined_call_operand.vmem [shape: f32[44,32], index: 1, kind: input, shape index: {}]   ;;  %s5912_s2 = inlined_call_operand.vmem [shape: f32[1,32], index: 2, kind: input, shape index: {}]   ;;  %s5913_s3 = inlined_call_operand.vmem [shape: f32[224,32], index: 3, kind: input, shape index: {}]   ;;  %s5914_s4 = inlined_call_operand.vmem [shape: f32[1,32], index: 4, kind: input, shape index: {}]   ;;  %s5915_s5 = inlined_call_operand.vmem [shape: f32[160,32], index: 5, kind: input, shape index: {}]   ;;  %s5916_s6 = inlined_call_operand.vmem [shape: f32[1,32], index: 6, kind: input, shape index: {}]   ;;  %s5917_s7 = inlined_call_operand.vmem [shape: f32[672,16], index: 7, kind: input, shape index: {}]   ;;  %s5918_s8 = inlined_call_operand.vmem [shape: f32[1,16], index: 8, kind: input, shape index: {}]   ;;  %s5919_s9 = inlined_call_operand.vmem [shape: f32[84,168], index: 9, kind: input, shape index: {}]   ;;  %s5920_s10 = inlined_call_operand.vmem [shape: f32[42,84], index: 10, kind: input, shape index: {}]   ;;  %s5921_s11 = inlined_call_operand.vmem [shape: f32[21,42], index: 11, kind: input, shape index: {}]   ;;  %s5922_s12 = inlined_call_operand.vmem [shape: f32[2,1,16], index: 12, kind: output, shape index: {}]  }
   0x1 LB: > { %s3593_s22 = sadd.s32 4294967295, %s4096_s21   ;;  %p3597_p0 = scmp.ge.s32.totalorder %s4096_s21, 1  ;;  %s4096_s21 = sphi %s4177_s21, %s22_s21  }
   0x2   : > { %p362_p1 = scmp.lt.s32.totalorder %s4096_s21, 3 }
   0x4   : > { %p363_p2 = pnand %p3597_p0, %p362_p1 }
   0x5   : > { %p402_p3 = scmp.lt.s32.totalorder (!%p363_p2), %s3593_s22, 1  ;;  %s4099_s27 = smov (!%p363_p2), 12  }
   0x6   : > { %366 = sbr.rel (%p363_p2) target bundleno = 2534 (0x9e6), region = 68  ;;  %s4100_s28 = smov (!%p363_p2), 4  }
   0x7   : > { %s4101_s29 = smov (!%p363_p2), 16   ;;  %s4102_s30 = smov (!%p363_p2), 8  }
   0x8   : > { %s4103_s13 = smov (!%p363_p2), 20   ;;  %s4104_s14 = smov (!%p363_p2), 24  }
   0x9   : > { %s4105_s15 = smov (!%p363_p2), 28   ;;  %s4107_s20 = smov (!%p363_p2), 32  }
   0xa   : > { %s4108_s19 = smov (!%p363_p2), 36   ;;  %s4109_s25 = smov (!%p363_p2), 40  }
   0xb   : > { %vm460_vm0 = vcmask 28672   ;;  %v4098_v0 = vmov 0.0   ;;  %s5924_s22 = smov (!%p402_p3, %s3593_s22), 1  ;;  %vm463_vm1 = vcmask 31744   ;;  %vm1745_vm2 = vcmask 1043456   ;;  %v435_v22 = vld [vmem:[%s5911_s1 + $0x20] sm:$0xff] }
   0xc   : > { %461 = vst.msk [vmem:[#allocation2 + $0x3] sm:$0x1f] %vm460_vm0, %v4098_v0  ;;  %462 = vst.msk [vmem:[#allocation2 + $0xb0] sm:$0x1f] %vm460_vm0, %v4098_v0  ;;  %3789 = vmatprep.subr.mxu0 %v4098_v0  ;;  %3916 = vmatprep.subr.mxu1 %v4098_v0  ;;  %s3928_s23 = smul.u32 168, %s5924_s22  ;;  %vm4106_vm3 = vmmov 0  }
   0xd   : > { %v436_v21 = vld [vmem:[%s5911_s1 + $0x28] sm:$0xf]  ;;  %3801 = vmatprep.mubr.msk.f32.mxu0 %vm4106_vm3, %v4098_v0  ;;  %v434_v26 = vld [vmem:[%s5911_s1 + $0x18] sm:$0xff]  ;;  %v433_v27 = vld [vmem:[%s5911_s1 + $0x10] sm:$0xff]  ;;  %3843 = vmatprep.mubr.msk.f32.mxu1 %vm4106_vm3, %v4098_v0  ;;  %vm1477_vm4 = vcmask 64512   ;;  %vm1499_vm5 = vcmask 97280  }
   0xe   : > { %s4195_s26 = scalar_lea.vmem %s5910_s0, %s3928_s23  ;;  %3790 = vmatpush3.msk.msra.mxu0 %vm1745_vm2, %v436_v21  ;;  %3922 = vmatpush3.msk.msra.mxu1 %vm1745_vm2, %v436_v21  ;;  %v432_v29 = vld [vmem:[%s5911_s1 + $0x8] sm:$0xff]  ;;  %v431_v32 = vld [vmem:[%s5911_s1] sm:$0xff]  ;;  %vm1521_vm6 = vcmask 130048   ;;  %vm1543_vm7 = vcmask 162816   ;;  %vm1565_vm8 = vcmask 195584   ;;  %vm1587_vm9 = vcmask 228352  }
   0xf   : > { %v410_v1 = vld [vmem:[%s4195_s26] sm:$0xff]  ;;  %v411_v2 = vld [vmem:[%s4195_s26 + $0x8] sm:$0xff]  ;;  %v412_v3 = vld [vmem:[%s4195_s26 + $0x10] sm:$0xff]  ;;  %3791 = vmatprep.subr.mxu0 %v4098_v0  ;;  %3917 = vmatprep.subr.mxu1 %v4098_v0  ;;  %vm1609_vm10 = vcmask 261120   ;;  %vm1631_vm11 = vcmask 293888   ;;  %vm1653_vm12 = vcmask 326656  }
  0x10   : > { %464 = vst.msk [vmem:[#allocation2 + $0x8] sm:$0xff] %vm463_vm1, %v410_v1  ;;  %465 = vst.msk [vmem:[#allocation2 + $0x10] sm:$0xff] %vm463_vm1, %v411_v2  ;;  %v413_v4 = vld [vmem:[%s4195_s26 + $0x18] sm:$0xff]  ;;  %v414_v5 = vld [vmem:[%s4195_s26 + $0x20] sm:$0xff]  ;;  %3792 = vmatpush3.msra.mxu0 %v435_v22  ;;  %3923 = vmatpush3.msra.mxu1 %v435_v22  ;;  %vm1681_vm13 = vcmask 359424   ;;  %vm2128_vm14 = vcmask 256000  }
  0x11   : > { %466 = vst.msk [vmem:[#allocation2 + $0x18] sm:$0xff] %vm463_vm1, %v412_v3  ;;  %v415_v6 = vld [vmem:[%s4195_s26 + $0x28] sm:$0xff]  ;;  %467 = vst.msk [vmem:[#allocation2 + $0x20] sm:$0xff] %vm463_vm1, %v413_v4  ;;  %v416_v7 = vld [vmem:[%s4195_s26 + $0x30] sm:$0xff]  ;;  %3793 = vmatprep.subr.mxu0 %v4098_v0  ;;  %3918 = vmatprep.subr.mxu1 %v4098_v0  ;;  %s4110_s23 = smov 64   ;;  %s4111_s24 = smov 96  }
  0x12   : > { %468 = vst.msk [vmem:[#allocation2 + $0x28] sm:$0xff] %vm463_vm1, %v414_v5  ;;  %469 = vst.msk [vmem:[#allocation2 + $0x30] sm:$0xff] %vm463_vm1, %v415_v6  ;;  %v417_v8 = vld [vmem:[%s4195_s26 + $0x38] sm:$0xff]  ;;  %v418_v25 = vld [vmem:[%s4195_s26 + $0x40] sm:$0xff]  ;;  %3794 = vmatpush3.msra.mxu0 %v434_v26  ;;  %3924 = vmatpush3.msra.mxu1 %v434_v26  ;;  %vm2141_vm15 = vcmask 257024   ;;  %vm2451_vm0 = vcmask 523264  }
  0x13   : > { %470 = vst.msk [vmem:[#allocation2 + $0x38] sm:$0xff] %vm463_vm1, %v416_v7  ;;  %471 = vst.msk [vmem:[#allocation2 + $0x40] sm:$0xff] %vm463_vm1, %v417_v8  ;;  %3795 = vmatprep.subr.mxu0 %v4098_v0  ;;  %3919 = vmatprep.subr.mxu1 %v4098_v0  ;;  %v419_v30 = vld [vmem:[%s4195_s26 + $0x48] sm:$0xff]  ;;  %v420_v40 = vld [vmem:[%s4195_s26 + $0x50] sm:$0xff] }
  0x14   : > { %472 = vst.msk [vmem:[#allocation2 + $0x48] sm:$0xff] %vm463_vm1, %v418_v25  ;;  %3796 = vmatpush3.msra.mxu0 %v433_v27  ;;  %473 = vst.msk [vmem:[#allocation2 + $0x50] sm:$0xff] %vm463_vm1, %v419_v30  ;;  %3925 = vmatpush3.msra.mxu1 %v433_v27  ;;  %v421_v49 = vld [vmem:[%s4195_s26 + $0x58] sm:$0xff]  ;;  %v423_v50 = vld [vmem:[%s4195_s26 + $0x68] sm:$0xff] }
  0x15   : > { %3797 = vmatprep.subr.mxu0 %v4098_v0  ;;  %3920 = vmatprep.subr.mxu1 %v4098_v0  ;;  %474 = vst.msk [vmem:[#allocation2 + $0x58] sm:$0xff] %vm463_vm1, %v420_v40  ;;  %475 = vst.msk [vmem:[#allocation2 + $0x60] sm:$0xff] %vm463_vm1, %v421_v49  ;;  %v424_v52 = vld [vmem:[%s4195_s26 + $0x70] sm:$0xff]  ;;  %v422_v63 = vld [vmem:[%s4195_s26 + $0x60] sm:$0xff] }
  0x16   : > { %3798 = vmatpush3.msra.mxu0 %v432_v29  ;;  %3926 = vmatpush3.msra.mxu1 %v432_v29  ;;  %477 = vst.msk [vmem:[#allocation2 + $0x70] sm:$0xff] %vm463_vm1, %v423_v50  ;;  %478 = vst.msk [vmem:[#allocation2 + $0x78] sm:$0xff] %vm463_vm1, %v424_v52  ;;  %v425_v1 = vld [vmem:[%s4195_s26 + $0x78] sm:$0xff]  ;;  %v426_v49 = vld [vmem:[%s4195_s26 + $0x80] sm:$0xff] }
  0x17   : > { %v548_v9 = vld [vmem:[#allocation2 + $0x6] sm:$0xff]  ;;  %v549_v18 = vld [vmem:[#allocation2 + $0xe] sm:$0xff]  ;;  %3799 = vmatprep.subr.mxu0 %v4098_v0  ;;  %3921 = vmatprep.subr.mxu1 %v4098_v0  ;;  %476 = vst.msk [vmem:[#allocation2 + $0x68] sm:$0xff] %vm463_vm1, %v422_v63  ;;  %479 = vst.msk [vmem:[#allocation2 + $0x80] sm:$0xff] %vm463_vm1, %v425_v1 }
  0x18   : > { %v506_v10 = vld [vmem:[#allocation2 + $0x4] sm:$0xff]  ;;  %845 = vrot.lane.b32.xlu1 %v548_v9, %s4099_s27  ;;  %v507_v14 = vld [vmem:[#allocation2 + $0xc] sm:$0xff]  ;;  %v508_v23 = vld [vmem:[#allocation2 + $0x14] sm:$0xff]  ;;  %3800 = vmatpush3.msra.mxu0 %v431_v32  ;;  %480 = vst.msk [vmem:[#allocation2 + $0x88] sm:$0xff] %vm463_vm1, %v426_v49 }
  0x19   : > { %677 = vrot.lane.b32.xlu0 %v506_v10, %s4100_s28  ;;  %v569_v11 = vld [vmem:[#allocation2 + $0x7] sm:$0xff]  ;;  %v570_v19 = vld [vmem:[#allocation2 + $0xf] sm:$0xff]  ;;  %3927 = vmatpush3.msra.mxu1 %v431_v32  ;;  %v571_v35 = vld [vmem:[#allocation2 + $0x17] sm:$0xff]  ;;  %2129 = vst.msk [vmem:[#allocation3 + $0x5] sm:$0x7] %vm2128_vm14, %v4098_v0 }
  0x1a   : > { %v527_v12 = vld [vmem:[#allocation2 + $0x5] sm:$0xff]  ;;  %v528_v16 = vld [vmem:[#allocation2 + $0xd] sm:$0xff]  ;;  %v529_v28 = vld [vmem:[#allocation2 + $0x15] sm:$0xff]  ;;  %1973 = vmatprep.subr.mxu1 %v4098_v0  ;;  %2536 = vmatprep.subr.mxu0 %v4098_v0  ;;  %2130 = vst.msk [vmem:[#allocation3 + $0x5c] sm:$0x7] %vm2128_vm14, %v4098_v0 }
  0x1b   : > { %v590_v13 = vld [vmem:[#allocation2 + $0x8] sm:$0xff]  ;;  %v591_v24 = vld [vmem:[#allocation2 + $0x10] sm:$0xff]  ;;  %v509_v37 = vld [vmem:[#allocation2 + $0x1c] sm:$0xff] }
  0x1c   : > { %929 = vrot.lane.b32.xlu1 %v569_v11, %s4101_s29  ;;  %v611_v15 = vld [vmem:[#allocation2 + $0x9] sm:$0xff]  ;;  %v612_v31 = vld [vmem:[#allocation2 + $0x11] sm:$0xff]  ;;  %v530_v39 = vld [vmem:[#allocation2 + $0x1d] sm:$0xff] }
  0x1d   : > { %761 = vrot.lane.b32.xlu0 %v527_v12, %s4102_s30  ;;  %v632_v17 = vld [vmem:[#allocation2 + $0xa] sm:$0xff]  ;;  %v550_v33 = vld [vmem:[#allocation2 + $0x16] sm:$0xff]  ;;  %v551_v42 = vld [vmem:[#allocation2 + $0x1e] sm:$0xff] }
  0x1e   : > { %v4223_v20 = vld [vmem:[#allocation2 + $0xb] sm:$0xff]  ;;  %v4276_v36 = vld [vmem:[#allocation2 + $0x13] sm:$0xff]  ;;  %v572_v44 = vld [vmem:[#allocation2 + $0x1f] sm:$0xff] }
  0x1f   : > { %v633_v34 = vld [vmem:[#allocation2 + $0x12] sm:$0xff]  ;;  %v634_v43 = vld [vmem:[#allocation2 + $0x1a] sm:$0xff]  ;;  %v510_v46 = vld [vmem:[#allocation2 + $0x24] sm:$0xff] }
  0x20   : > { %1013 = vrot.lane.b32.xlu1 %v590_v13, %s4103_s13  ;;  %v592_v38 = vld [vmem:[#allocation2 + $0x18] sm:$0xff]  ;;  %v593_v47 = vld [vmem:[#allocation2 + $0x20] sm:$0xff]  ;;  %v511_v57 = vld [vmem:[#allocation2 + $0x2c] sm:$0xff] }
  0x21   : > { %679 = vrot.lane.b32.xlu0 %v507_v14, %s4100_s28  ;;  %v613_v41 = vld [vmem:[#allocation2 + $0x19] sm:$0xff]  ;;  %v531_v48 = vld [vmem:[#allocation2 + $0x25] sm:$0xff]  ;;  %v532_v59 = vld [vmem:[#allocation2 + $0x2d] sm:$0xff] }
  0x22   : > { %v4291_v45 = vld [vmem:[#allocation2 + $0x1b] sm:$0xff]  ;;  %v552_v53 = vld [vmem:[#allocation2 + $0x26] sm:$0xff]  ;;  %v553_v61 = vld [vmem:[#allocation2 + $0x2e] sm:$0xff] }
  0x23   : > { %v614_v51 = vld [vmem:[#allocation2 + $0x21] sm:$0xff]  ;;  %v615_v60 = vld [vmem:[#allocation2 + $0x29] sm:$0xff]  ;;  %v512_v4 = vld [vmem:[#allocation2 + $0x34] sm:$0xff] }
  0x24   : > { %1097 = vrot.lane.b32.xlu1 %v611_v15, %s4104_s14  ;;  %v635_v54 = vld [vmem:[#allocation2 + $0x22] sm:$0xff]  ;;  %v636_v62 = vld [vmem:[#allocation2 + $0x2a] sm:$0xff]  ;;  %v533_v6 = vld [vmem:[#allocation2 + $0x35] sm:$0xff] }
  0x25   : > { %763 = vrot.lane.b32.xlu0 %v528_v16, %s4102_s30  ;;  %v573_v55 = vld [vmem:[#allocation2 + $0x27] sm:$0xff]  ;;  %v574_v2 = vld [vmem:[#allocation2 + $0x2f] sm:$0xff]  ;;  %v575_v12 = vld [vmem:[#allocation2 + $0x37] sm:$0xff] }
  0x26   : > { %v4310_v56 = vld [vmem:[#allocation2 + $0x23] sm:$0xff]  ;;  %v4325_v3 = vld [vmem:[#allocation2 + $0x2b] sm:$0xff]  ;;  %v554_v8 = vld [vmem:[#allocation2 + $0x36] sm:$0xff] }
  0x27   : > { %v594_v58 = vld [vmem:[#allocation2 + $0x28] sm:$0xff]  ;;  %v595_v5 = vld [vmem:[#allocation2 + $0x30] sm:$0xff]  ;;  %v534_v21 = vld [vmem:[#allocation2 + $0x3d] sm:$0xff] }
  0x28   : > { %1181 = vrot.lane.b32.xlu1 %v632_v17, %s4105_s15  ;;  %v616_v7 = vld [vmem:[#allocation2 + $0x31] sm:$0xff]  ;;  %v617_v25 = vld [vmem:[#allocation2 + $0x39] sm:$0xff]  ;;  %v577_v1 = vld [vmem:[#allocation2 + $0x47] sm:$0xff] }
  0x29   : > { %847 = vrot.lane.b32.xlu0 %v549_v18, %s4099_s27  ;;  %v637_v9 = vld [vmem:[#allocation2 + $0x32] sm:$0xff]  ;;  %v555_v30 = vld [vmem:[#allocation2 + $0x3e] sm:$0xff] }
  0x2a   : > { %v4340_v13 = vld [vmem:[#allocation2 + $0x33] sm:$0xff] }
  0x2b   : > { %v596_v17 = vld [vmem:[#allocation2 + $0x38] sm:$0xff] }
  0x2c   : > { %1265 = vrot.lane.b32.xlu1 %v4223_v20, %s4107_s20  ;;  %v537_v49 = vld [vmem:[#allocation2 + $0x55] sm:$0xff] }
  0x2d   : > { %931 = vrot.lane.b32.xlu0 %v570_v19, %s4101_s29 }
  0x30   : > { %1015 = vrot.lane.b32.xlu1 %v591_v24, %s4103_s13  ;;  %v485_v24 = vld [vmem:[#allocation2 + $0x3] sm:$0xff] }
  0x31   : > { %681 = vrot.lane.b32.xlu0 %v508_v23, %s4100_s28 }
  0x34   : > { %765 = vrot.lane.b32.xlu1 %v529_v28, %s4102_s30 }
  0x35   : > { %1329 = vrot.lane.b32.xlu0 %v507_v14, %s4108_s19 }
  0x38   : > { %1393 = vrot.lane.b32.xlu1 %v528_v16, %s4109_s25  ;;  %v513_v16 = vld [vmem:[#allocation2 + $0x3c] sm:$0xff] }
  0x39   : > { %1099 = vrot.lane.b32.xlu0 %v612_v31, %s4104_s14  ;;  %v638_v31 = vld [vmem:[#allocation2 + $0x3a] sm:$0xff] }
  0x3c   : > { %1183 = vrot.lane.b32.xlu1 %v633_v34, %s4105_s15 }
  0x3d   : > { %849 = vrot.lane.b32.xlu0 %v550_v33, %s4099_s27 }
  0x40   : > { %1267 = vrot.lane.b32.xlu1 %v4276_v36, %s4107_s20 }
  0x41   : > { %933 = vrot.lane.b32.xlu0 %v571_v35, %s4101_s29  ;;  %v576_v35 = vld [vmem:[#allocation2 + $0x3f] sm:$0xff] }
  0x44   : > { %1017 = vrot.lane.b32.xlu1 %v592_v38, %s4103_s13 }
  0x45   : > { %683 = vrot.lane.b32.xlu0 %v509_v37, %s4100_s28 }
  0x48   : > { %767 = vrot.lane.b32.xlu1 %v530_v39, %s4102_s30 }
  0x49   : > { %1331 = vrot.lane.b32.xlu0 %v508_v23, %s4108_s19 }
  0x4c   : > { %1395 = vrot.lane.b32.xlu1 %v529_v28, %s4109_s25 }
  0x4d   : > { %1101 = vrot.lane.b32.xlu0 %v613_v41, %s4104_s14  ;;  %v514_v41 = vld [vmem:[#allocation2 + $0x44] sm:$0xff] }
  0x50   : > { %1185 = vrot.lane.b32.xlu1 %v634_v43, %s4105_s15 }
  0x51   : > { %851 = vrot.lane.b32.xlu0 %v551_v42, %s4099_s27  ;;  %v597_v42 = vld [vmem:[#allocation2 + $0x40] sm:$0xff] }
  0x54   : > { %1269 = vrot.lane.b32.xlu1 %v4291_v45, %s4107_s20 }
  0x55   : > { %935 = vrot.lane.b32.xlu0 %v572_v44, %s4101_s29 }
  0x58   : > { %1019 = vrot.lane.b32.xlu1 %v593_v47, %s4103_s13 }
  0x59   : > { %685 = vrot.lane.b32.xlu0 %v510_v46, %s4100_s28 }
  0x5c   : > { %769 = vrot.lane.b32.xlu1 %v531_v48, %s4102_s30 }
  0x5d   : > { %1333 = vrot.lane.b32.xlu0 %v509_v37, %s4108_s19  ;;  %v4362_v37 = vld [vmem:[#allocation2 + $0x3b] sm:$0xff] }
  0x60   : > { %1397 = vrot.lane.b32.xlu1 %v530_v39, %s4109_s25 }
  0x61   : > { %1103 = vrot.lane.b32.xlu0 %v614_v51, %s4104_s14  ;;  %v535_v51 = vld [vmem:[#allocation2 + $0x45] sm:$0xff] }
  0x64   : > { %1187 = vrot.lane.b32.xlu1 %v635_v54, %s4105_s15 }
  0x65   : > { %853 = vrot.lane.b32.xlu0 %v552_v53, %s4099_s27 }
  0x68   : > { %1271 = vrot.lane.b32.xlu1 %v4310_v56, %s4107_s20 }
  0x69   : > { %937 = vrot.lane.b32.xlu0 %v573_v55, %s4101_s29 }
  0x6c   : > { %1021 = vrot.lane.b32.xlu1 %v594_v58, %s4103_s13 }
  0x6d   : > { %687 = vrot.lane.b32.xlu0 %v511_v57, %s4100_s28 }
  0x70   : > { %771 = vrot.lane.b32.xlu1 %v532_v59, %s4102_s30 }
  0x71   : > { %1335 = vrot.lane.b32.xlu0 %v510_v46, %s4108_s19 }
  0x74   : > { %1399 = vrot.lane.b32.xlu1 %v531_v48, %s4109_s25 }
  0x75   : > { %1105 = vrot.lane.b32.xlu0 %v615_v60, %s4104_s14  ;;  %v556_v60 = vld [vmem:[#allocation2 + $0x46] sm:$0xff] }
  0x78   : > { %1189 = vrot.lane.b32.xlu1 %v636_v62, %s4105_s15 }
  0x79   : > { %855 = vrot.lane.b32.xlu0 %v553_v61, %s4099_s27  ;;  %v639_v61 = vld [vmem:[#allocation2 + $0x42] sm:$0xff] }
  0x7c   : > { %1273 = vrot.lane.b32.xlu1 %v4325_v3, %s4107_s20 }
  0x7d   : > { %939 = vrot.lane.b32.xlu0 %v574_v2, %s4101_s29  ;;  %v4391_v2 = vld [vmem:[#allocation2 + $0x43] sm:$0xff] }
  0x80   : > { %1023 = vrot.lane.b32.xlu1 %v595_v5, %s4103_s13 }
  0x81   : > { %689 = vrot.lane.b32.xlu0 %v512_v4, %s4100_s28 }
  0x84   : > { %773 = vrot.lane.b32.xlu1 %v533_v6, %s4102_s30 }
  0x85   : > { %1337 = vrot.lane.b32.xlu0 %v511_v57, %s4108_s19  ;;  %v618_v57 = vld [vmem:[#allocation2 + $0x41] sm:$0xff] }
  0x88   : > { %1401 = vrot.lane.b32.xlu1 %v532_v59, %s4109_s25 }
  0x89   : > { %1107 = vrot.lane.b32.xlu0 %v616_v7, %s4104_s14 }
  0x8a   : > { %v846_v10 = vpop.permute.xlu1 %845 }
  0x8b   : > { %v678_v11 = vpop.permute.xlu0 %677 }
  0x8c   : > { %1191 = vrot.lane.b32.xlu1 %v637_v9, %s4105_s15  ;;  %v1456_v28 = vsel %vm463_vm1, %v485_v24, %v678_v11  ;;  %v598_v11 = vld [vmem:[#allocation2 + $0x48] sm:$0xff] }
  0x8d   : > { %857 = vrot.lane.b32.xlu0 %v554_v8, %s4099_s27  ;;  %v619_v24 = vld [vmem:[#allocation2 + $0x49] sm:$0xff] }
  0x8e   : > { %v930_v14 = vpop.permute.xlu1 %929 }
  0x8f   : > { %v762_v15 = vpop.permute.xlu0 %761 }
  0x90   : > { %1275 = vrot.lane.b32.xlu1 %v4340_v13, %s4107_s20  ;;  %v1478_v29 = vsel %vm1477_vm4, %v1456_v28, %v762_v15  ;;  %v640_v28 = vld [vmem:[#allocation2 + $0x4a] sm:$0xff] }
  0x91   : > { %941 = vrot.lane.b32.xlu0 %v575_v12, %s4101_s29  ;;  %v1500_v34 = vsel %vm1499_vm5, %v1478_v29, %v846_v10  ;;  %v515_v10 = vld [vmem:[#allocation2 + $0x4c] sm:$0xff] }
  0x92   : > { %v1014_v18 = vpop.permute.xlu1 %1013  ;;  %v1522_v40 = vsel %vm1521_vm6, %v1500_v34, %v930_v14 }
  0x93   : > { %v4345_v19 = vpop.permute.xlu0 %679  ;;  %v1544_v43 = vsel %vm1543_vm7, %v1522_v40, %v1014_v18  ;;  %v536_v18 = vld [vmem:[#allocation2 + $0x4d] sm:$0xff] }
  0x94   : > { %1025 = vrot.lane.b32.xlu1 %v596_v17, %s4103_s13 }
  0x95   : > { %691 = vrot.lane.b32.xlu0 %v513_v16, %s4100_s28 }
  0x96   : > { %v1098_v22 = vpop.permute.xlu1 %1097 }
  0x97   : > { %v4349_v23 = vpop.permute.xlu0 %763  ;;  %v1566_v47 = vsel %vm1565_vm8, %v1544_v43, %v1098_v22  ;;  %v599_v43 = vld [vmem:[#allocation2 + $0x50] sm:$0xff] }
  0x98   : > { %775 = vrot.lane.b32.xlu1 %v534_v21, %s4102_s30 }
  0x99   : > { %1339 = vrot.lane.b32.xlu0 %v512_v4, %s4108_s19  ;;  %v1457_v4 = vsel %vm463_vm1, %v4223_v20, %v4345_v19 }
  0x9a   : > { %v1182_v26 = vpop.permute.xlu1 %1181  ;;  %v1479_v7 = vsel %vm1477_vm4, %v1457_v4, %v4349_v23 }
  0x9b   : > { %v4353_v27 = vpop.permute.xlu0 %847  ;;  %v1588_v48 = vsel %vm1587_vm9, %v1566_v47, %v1182_v26 }
  0x9c   : > { %1403 = vrot.lane.b32.xlu1 %v533_v6, %s4109_s25  ;;  %v1501_v8 = vsel %vm1499_vm5, %v1479_v7, %v4353_v27  ;;  %v557_v27 = vld [vmem:[#allocation2 + $0x4e] sm:$0xff] }
  0x9d   : > { %1109 = vrot.lane.b32.xlu0 %v617_v25, %s4104_s14 }
  0x9e   : > { %v1266_v33 = vpop.permute.xlu1 %1265 }
  0x9f   : > { %v932_v32 = vpop.permute.xlu0 %931  ;;  %v1610_v50 = vsel %vm1609_vm10, %v1588_v48, %v1266_v33 }
  0xa0   : > { %1193 = vrot.lane.b32.xlu1 %v638_v31, %s4105_s15  ;;  %v1523_v9 = vsel %vm1521_vm6, %v1501_v8, %v932_v32  ;;  %v578_v31 = vld [vmem:[#allocation2 + $0x4f] sm:$0xff] }
  0xa1   : > { %859 = vrot.lane.b32.xlu0 %v555_v30, %s4099_s27  ;;  %v4425_v32 = vld [vmem:[#allocation2 + $0x4b] sm:$0xff] }
  0xa2   : > { %v1016_v39 = vpop.permute.xlu1 %1015 }
  0xa3   : > { %v4364_v38 = vpop.permute.xlu0 %681  ;;  %v1545_v20 = vsel %vm1543_vm7, %v1523_v9, %v1016_v39 }
  0xa4   : > { %1277 = vrot.lane.b32.xlu1 %v4362_v37, %s4107_s20  ;;  %v1458_v33 = vsel %vm463_vm1, %v4276_v36, %v4364_v38 }
  0xa5   : > { %943 = vrot.lane.b32.xlu0 %v576_v35, %s4101_s29 }
  0xa6   : > { %v4371_v46 = vpop.permute.xlu1 %765 }
  0xa7   : > { %v1330_v44 = vpop.permute.xlu0 %1329  ;;  %v1480_v39 = vsel %vm1477_vm4, %v1458_v33, %v4371_v46  ;;  %v562_v33 = vld [vmem:[#allocation2 + $0x76] sm:$0xff] }
  0xa8   : > { %1027 = vrot.lane.b32.xlu1 %v597_v42, %s4103_s13  ;;  %v1632_v52 = vsel %vm1631_vm11, %v1610_v50, %v1330_v44  ;;  %v516_v42 = vld [vmem:[#allocation2 + $0x54] sm:$0xff] }
  0xa9   : > { %693 = vrot.lane.b32.xlu0 %v514_v41, %s4100_s28 }
  0xaa   : > { %v1394_v54 = vpop.permute.xlu1 %1393 }
  0xab   : > { %v1100_v53 = vpop.permute.xlu0 %1099  ;;  %v1654_v55 = vsel %vm1653_vm12, %v1632_v52, %v1394_v54  ;;  %v620_v54 = vld [vmem:[#allocation2 + $0x51] sm:$0xff] }
  0xac   : > { %777 = vrot.lane.b32.xlu1 %v535_v51, %s4102_s30  ;;  %3802 = vmatmul.mubr.msk.f32.vlgmr.msra.gmra.mxu0 %vm1681_vm13, %v1654_v55  ;;  %v1567_v15 = vsel %vm1565_vm8, %v1545_v20, %v1100_v53  ;;  %v4476_v20 = vld [vmem:[#allocation2 + $0x74] sm:$0xff] }
  0xad   : > { %1341 = vrot.lane.b32.xlu0 %v513_v16, %s4108_s19  ;;  %3804 = vmatprep.mubr.msk.f32.mxu0 %vm4106_vm3, %v4098_v0 }
  0xae   : > { %v1184_v59 = vpop.permute.xlu1 %1183 }
  0xaf   : > { %v850_v58 = vpop.permute.xlu0 %849  ;;  %v1589_v16 = vsel %vm1587_vm9, %v1567_v15, %v1184_v59  ;;  %v558_v59 = vld [vmem:[#allocation2 + $0x56] sm:$0xff] }
  0xb0   : > { %1405 = vrot.lane.b32.xlu1 %v534_v21, %s4109_s25  ;;  %v1502_v40 = vsel %vm1499_vm5, %v1480_v39, %v850_v58  ;;  %v427_v58 = vld [vmem:[%s4195_s26 + $0x88] sm:$0xff] }
  0xb1   : > { %1111 = vrot.lane.b32.xlu0 %v618_v57, %s4104_s14  ;;  %481 = vst.msk [vmem:[#allocation2 + $0x90] sm:$0xff] %vm463_vm1, %v427_v58  ;;  %v4537_v58 = vld [vmem:[#allocation2 + $0x7c] sm:$0xff] }
  0xb2   : > { %v1268_v63 = vpop.permute.xlu1 %1267 }
  0xb3   : > { %v934_v62 = vpop.permute.xlu0 %933  ;;  %v1611_v17 = vsel %vm1609_vm10, %v1589_v16, %v1268_v63  ;;  %v579_v63 = vld [vmem:[#allocation2 + $0x57] sm:$0xff] }
  0xb4   : > { %1195 = vrot.lane.b32.xlu1 %v639_v61, %s4105_s15 }
  0xb5   : > { %861 = vrot.lane.b32.xlu0 %v556_v60, %s4099_s27  ;;  %v641_v60 = vld [vmem:[#allocation2 + $0x52] sm:$0xff] }
  0xb6   : > { %v1018_v6 = vpop.permute.xlu1 %1017 }
  0xb7   : > { %v4396_v5 = vpop.permute.xlu0 %683 }
  0xb8   : > { %1279 = vrot.lane.b32.xlu1 %v4391_v2, %s4107_s20  ;;  %v1459_v4 = vsel %vm463_vm1, %v4291_v45, %v4396_v5 }
  0xb9   : > { %945 = vrot.lane.b32.xlu0 %v577_v1, %s4101_s29  ;;  %v4460_v1 = vld [vmem:[#allocation2 + $0x53] sm:$0xff] }
  0xba   : > { %v4407_v14 = vpop.permute.xlu1 %767 }
  0xbb   : > { %v1332_v12 = vpop.permute.xlu0 %1331  ;;  %v1481_v8 = vsel %vm1477_vm4, %v1459_v4, %v4407_v14 }
  0xbc   : > { %1029 = vrot.lane.b32.xlu1 %v598_v11, %s4103_s13  ;;  %v1633_v19 = vsel %vm1631_vm11, %v1611_v17, %v1332_v12  ;;  %v4474_v11 = vld [vmem:[#allocation2 + $0x5c] sm:$0xff] }
  0xbd   : > { %695 = vrot.lane.b32.xlu0 %v515_v10, %s4100_s28  ;;  %v600_v17 = vld [vmem:[#allocation2 + $0x58] sm:$0xff] }
  0xbe   : > { %v1396_v22 = vpop.permute.xlu1 %1395 }
  0xbf   : > { %v1102_v21 = vpop.permute.xlu0 %1101  ;;  %v1655_v23 = vsel %vm1653_vm12, %v1633_v19, %v1396_v22 }
  0xc0   : > { %779 = vrot.lane.b32.xlu1 %v536_v18, %s4102_s30  ;;  %3805 = vmatmul.mubr.msk.f32.gmra.mxu0 %vm1681_vm13, %v1655_v23  ;;  %v428_v23 = vld [vmem:[%s4195_s26 + $0x90] sm:$0xff] }
  0xc1   : > { %1343 = vrot.lane.b32.xlu0 %v514_v41, %s4108_s19  ;;  %3807 = vmatprep.mubr.msk.f32.mxu0 %vm4106_vm3, %v4098_v0  ;;  %v1524_v41 = vsel %vm1521_vm6, %v1502_v40, %v934_v62  ;;  %482 = vst.msk [vmem:[#allocation2 + $0x98] sm:$0xff] %vm463_vm1, %v428_v23 }
  0xc2   : > { %v1186_v26 = vpop.permute.xlu1 %1185  ;;  %v1546_v44 = vsel %vm1543_vm7, %v1524_v41, %v1018_v6 }
  0xc3   : > { %v852_v25 = vpop.permute.xlu0 %851  ;;  %v1568_v47 = vsel %vm1565_vm8, %v1546_v44, %v1102_v21  ;;  %v642_v44 = vld [vmem:[#allocation2 + $0x5a] sm:$0xff] }
  0xc4   : > { %1407 = vrot.lane.b32.xlu1 %v535_v51, %s4109_s25  ;;  %v1590_v46 = vsel %vm1587_vm9, %v1568_v47, %v1186_v26  ;;  %v1503_v9 = vsel %vm1499_vm5, %v1481_v8, %v852_v25  ;;  %v4496_v25 = vld [vmem:[#allocation2 + $0x75] sm:$0xff] }
  0xc5   : > { %1113 = vrot.lane.b32.xlu0 %v619_v24, %s4104_s14  ;;  %v4494_v24 = vld [vmem:[#allocation2 + $0x5d] sm:$0xff] }
  0xc6   : > { %v1270_v30 = vpop.permute.xlu1 %1269 }
  0xc7   : > { %v936_v29 = vpop.permute.xlu0 %935  ;;  %v1612_v48 = vsel %vm1609_vm10, %v1590_v46, %v1270_v30 }
  0xc8   : > { %1197 = vrot.lane.b32.xlu1 %v640_v28, %s4105_s15  ;;  %v621_v28 = vld [vmem:[#allocation2 + $0x59] sm:$0xff] }
  0xc9   : > { %863 = vrot.lane.b32.xlu0 %v557_v27, %s4099_s27 }
  0xca   : > { %v1020_v35 = vpop.permute.xlu1 %1019 }
  0xcb   : > { %v4430_v34 = vpop.permute.xlu0 %685 }
  0xcc   : > { %1281 = vrot.lane.b32.xlu1 %v4425_v32, %s4107_s20 }
  0xcd   : > { %947 = vrot.lane.b32.xlu0 %v578_v31, %s4101_s29  ;;  %v559_v31 = vld [vmem:[#allocation2 + $0x5e] sm:$0xff] }
  0xce   : > { %v4440_v38 = vpop.permute.xlu1 %769 }
  0xcf   : > { %v1334_v36 = vpop.permute.xlu0 %1333 }
  0xd0   : > { %1031 = vrot.lane.b32.xlu1 %v599_v43, %s4103_s13  ;;  %v1634_v50 = vsel %vm1631_vm11, %v1612_v48, %v1334_v36  ;;  %v580_v36 = vld [vmem:[#allocation2 + $0x5f] sm:$0xff] }
  0xd1   : > { %697 = vrot.lane.b32.xlu0 %v516_v42, %s4100_s28 }
  0xd2   : > { %v1398_v52 = vpop.permute.xlu1 %1397 }
  0xd3   : > { %v1104_v51 = vpop.permute.xlu0 %1103  ;;  %v1656_v53 = vsel %vm1653_vm12, %v1634_v50, %v1398_v52  ;;  %v4526_v50 = vld [vmem:[#allocation2 + $0x5b] sm:$0xff] }
  0xd4   : > { %781 = vrot.lane.b32.xlu1 %v537_v49, %s4102_s30  ;;  %3808 = vmatmul.mubr.msk.f32.gmra.mxu0 %vm1681_vm13, %v1656_v53 }
  0xd5   : > { %1345 = vrot.lane.b32.xlu0 %v515_v10, %s4108_s19  ;;  %3810 = vmatprep.mubr.msk.f32.mxu0 %vm4106_vm3, %v4098_v0  ;;  %v1525_v10 = vsel %vm1521_vm6, %v1503_v9, %v936_v29 }
  0xd6   : > { %v1188_v57 = vpop.permute.xlu1 %1187  ;;  %v1547_v45 = vsel %vm1543_vm7, %v1525_v10, %v1020_v35  ;;  %v1460_v35 = vsel %vm463_vm1, %v4310_v56, %v4430_v34 }
  0xd7   : > { %v854_v55 = vpop.permute.xlu0 %853  ;;  %v1569_v14 = vsel %vm1565_vm8, %v1547_v45, %v1104_v51  ;;  %v1482_v41 = vsel %vm1477_vm4, %v1460_v35, %v4440_v38  ;;  %v646_v35 = vld [vmem:[#allocation2 + $0x7a] sm:$0xff] }
  0xd8   : > { %1409 = vrot.lane.b32.xlu1 %v536_v18, %s4109_s25  ;;  %v1591_v15 = vsel %vm1587_vm9, %v1569_v14, %v1188_v57  ;;  %v4535_v57 = vld [vmem:[#allocation2 + $0x64] sm:$0xff] }
  0xd9   : > { %1115 = vrot.lane.b32.xlu0 %v620_v54, %s4104_s14 }
  0xda   : > { %v1272_v62 = vpop.permute.xlu1 %1271 }
  0xdb   : > { %v938_v61 = vpop.permute.xlu0 %937  ;;  %v1613_v16 = vsel %vm1609_vm10, %v1591_v15, %v1272_v62  ;;  %v604_v62 = vld [vmem:[#allocation2 + $0x78] sm:$0xff] }
  0xdc   : > { %1199 = vrot.lane.b32.xlu1 %v641_v60, %s4105_s15  ;;  %v4563_v15 = vld [vmem:[#allocation2 + $0x7d] sm:$0xff] }
  0xdd   : > { %865 = vrot.lane.b32.xlu0 %v558_v59, %s4099_s27 }
  0xde   : > { %v1022_v7 = vpop.permute.xlu1 %1021 }
  0xdf   : > { %v4465_v6 = vpop.permute.xlu0 %687 }
  0xe0   : > { %1283 = vrot.lane.b32.xlu1 %v4460_v1, %s4107_s20  ;;  %v1461_v8 = vsel %vm463_vm1, %v4325_v3, %v4465_v6 }
  0xe1   : > { %949 = vrot.lane.b32.xlu0 %v579_v63, %s4101_s29 }
  0xe2   : > { %v4479_v12 = vpop.permute.xlu1 %771 }
  0xe3   : > { %v1336_v5 = vpop.permute.xlu0 %1335  ;;  %v1483_v45 = vsel %vm1477_vm4, %v1461_v8, %v4479_v12  ;;  %v4626_v8 = vld [vmem:[#allocation2 + $0x6d] sm:$0xff] }
  0xe4   : > { %705 = vrot.lane.b32.xlu1 %v4476_v20, %s4100_s28  ;;  %v1635_v18 = vsel %vm1631_vm11, %v1613_v16, %v1336_v5  ;;  %v622_v16 = vld [vmem:[#allocation2 + $0x61] sm:$0xff] }
  0xe5   : > { %699 = vrot.lane.b32.xlu0 %v4474_v11, %s4100_s28 }
  0xe6   : > { %v1400_v21 = vpop.permute.xlu1 %1399 }
  0xe7   : > { %v1106_v19 = vpop.permute.xlu0 %1105  ;;  %v1657_v22 = vsel %vm1653_vm12, %v1635_v18, %v1400_v21 }
  0xe8   : > { %1347 = vrot.lane.b32.xlu1 %v516_v42, %s4108_s19  ;;  %3811 = vmatmul.mubr.msk.f32.gmra.mxu0 %vm1681_vm13, %v1657_v22  ;;  %v1504_v42 = vsel %vm1499_vm5, %v1482_v41, %v854_v55  ;;  %v429_v55 = vld [vmem:[%s4195_s26 + $0x98] sm:$0xff]  ;;  %v581_v41 = vld [vmem:[#allocation2 + $0x67] sm:$0xff] }
  0xe9   : > { %1033 = vrot.lane.b32.xlu0 %v600_v17, %s4103_s13  ;;  %3813 = vmatprep.mubr.msk.f32.mxu0 %vm4106_vm3, %v4098_v0  ;;  %v1526_v43 = vsel %vm1521_vm6, %v1504_v42, %v938_v61  ;;  %483 = vst.msk [vmem:[#allocation2 + $0xa0] sm:$0xff] %vm463_vm1, %v429_v55  ;;  %v601_v61 = vld [vmem:[#allocation2 + $0x60] sm:$0xff] }
  0xea   : > { %v1190_v27 = vpop.permute.xlu1 %1189  ;;  %v1548_v47 = vsel %vm1543_vm7, %v1526_v43, %v1022_v7  ;;  %v4548_v7 = vld [vmem:[#allocation2 + $0x65] sm:$0xff] }
  0xeb   : > { %v856_v26 = vpop.permute.xlu0 %855  ;;  %v1570_v46 = vsel %vm1565_vm8, %v1548_v47, %v1106_v19  ;;  %v625_v19 = vld [vmem:[#allocation2 + $0x79] sm:$0xff] }
  0xec   : > { %789 = vrot.lane.b32.xlu1 %v4496_v25, %s4102_s30  ;;  %v1592_v38 = vsel %vm1587_vm9, %v1570_v46, %v1190_v27  ;;  %v1505_v5 = vsel %vm1499_vm5, %v1483_v45, %v856_v26  ;;  %v430_v27 = vld [vmem:[%s4195_s26 + $0xa0] sm:$0xff] }
  0xed   : > { %783 = vrot.lane.b32.xlu0 %v4494_v24, %s4102_s30  ;;  %484 = vst.msk [vmem:[#allocation2 + $0xa8] sm:$0xff] %vm463_vm1, %v430_v27  ;;  %v584_v42 = vld [vmem:[#allocation2 + $0x7f] sm:$0xff] }
  0xee   : > { %v1274_v30 = vpop.permute.xlu1 %1273 }
  0xef   : > { %v940_v29 = vpop.permute.xlu0 %939  ;;  %v1614_v48 = vsel %vm1609_vm10, %v1592_v38, %v1274_v30  ;;  %v4599_v38 = vld [vmem:[#allocation2 + $0x63] sm:$0xff] }
  0xf0   : > { %1411 = vrot.lane.b32.xlu1 %v537_v49, %s4109_s25  ;;  %v583_v49 = vld [vmem:[#allocation2 + $0x77] sm:$0xff]  ;;  %v1527_v14 = vsel %vm1521_vm6, %v1505_v5, %v940_v29  ;;  %v623_v5 = vld [vmem:[#allocation2 + $0x69] sm:$0xff] }
  0xf1   : > { %1117 = vrot.lane.b32.xlu0 %v621_v28, %s4104_s14  ;;  %v560_v28 = vld [vmem:[#allocation2 + $0x66] sm:$0xff]  ;;  %v563_v29 = vld [vmem:[#allocation2 + $0x7e] sm:$0xff] }
  0xf2   : > { %v1024_v40 = vpop.permute.xlu1 %1023 }
  0xf3   : > { %v4510_v39 = vpop.permute.xlu0 %689  ;;  %v1549_v3 = vsel %vm1543_vm7, %v1527_v14, %v1024_v40  ;;  %v626_v14 = vld [vmem:[#allocation2 + $0x81] sm:$0xff] }
  0xf4   : > { %873 = vrot.lane.b32.xlu1 %v562_v33, %s4099_s27  ;;  %v643_v33 = vld [vmem:[#allocation2 + $0x62] sm:$0xff]  ;;  %v1462_v43 = vsel %vm463_vm1, %v4340_v13, %v4510_v39 }
  0xf5   : > { %867 = vrot.lane.b32.xlu0 %v559_v31, %s4099_s27 }
  0xf6   : > { %v4519_v34 = vpop.permute.xlu1 %773 }
  0xf7   : > { %v1338_v56 = vpop.permute.xlu0 %1337  ;;  %v1484_v47 = vsel %vm1477_vm4, %v1462_v43, %v4519_v34 }
  0xf8   : > { %951 = vrot.lane.b32.xlu1 %v580_v36, %s4101_s29  ;;  %v1636_v51 = vsel %vm1631_vm11, %v1614_v48, %v1338_v56  ;;  %v4601_v48 = vld [vmem:[#allocation2 + $0x7b] sm:$0xff] }
  0xf9   : > { %1201 = vrot.lane.b32.xlu0 %v642_v44, %s4105_s15 }
  0xfa   : > { %v1402_v53 = vpop.permute.xlu1 %1401 }
  0xfb   : > { %v1108_v52 = vpop.permute.xlu0 %1107  ;;  %v1658_v54 = vsel %vm1653_vm12, %v1636_v51, %v1402_v53  ;;  %v4613_v53 = vld [vmem:[#allocation2 + $0x6c] sm:$0xff] }
  0xfc   : > { %1285 = vrot.lane.b32.xlu1 %v4526_v50, %s4107_s20  ;;  %3814 = vmatmul.mubr.msk.f32.gmra.mxu0 %vm1681_vm13, %v1658_v54  ;;  %v1571_v12 = vsel %vm1565_vm8, %v1549_v3, %v1108_v52  ;;  %v602_v54 = vld [vmem:[#allocation2 + $0x68] sm:$0xff] }
  0xfd   : > { %957 = vrot.lane.b32.xlu0 %v583_v49, %s4101_s29  ;;  %3816 = vmatprep.mubr.msk.f32.mxu0 %vm4106_vm3, %v4098_v0 }
  0xfe   : > { %v1192_v60 = vpop.permute.xlu1 %1191 }
  0xff   : > { %v858_v59 = vpop.permute.xlu0 %857  ;;  %v1593_v18 = vsel %vm1587_vm9, %v1571_v12, %v1192_v60 }
 0x100   : > { %707 = vrot.lane.b32.xlu1 %v4537_v58, %s4100_s28  ;;  %v1506_v56 = vsel %vm1499_vm5, %v1484_v47, %v858_v59 }
 0x101   : > { %701 = vrot.lane.b32.xlu0 %v4535_v57, %s4100_s28 }
 0x102   : > { %v1276_v4 = vpop.permute.xlu1 %1275 }
 0x103   : > { %v942_v63 = vpop.permute.xlu0 %941 }
 0x104   : > { %1041 = vrot.lane.b32.xlu1 %v604_v62, %s4103_s13  ;;  %v1528_v46 = vsel %vm1521_vm6, %v1506_v56, %v942_v63  ;;  %v605_v62 = vld [vmem:[#allocation2 + $0x80] sm:$0xff] }
 0x105   : > { %1035 = vrot.lane.b32.xlu0 %v601_v61, %s4103_s13 }
 0x106   : > { %v1026_v10 = vpop.permute.xlu1 %1025 }
 0x107   : > { %v4553_v9 = vpop.permute.xlu0 %691  ;;  %v1550_v13 = vsel %vm1543_vm7, %v1528_v46, %v1026_v10  ;;  %v522_v46 = vld [vmem:[#allocation2 + $0x84] sm:$0xff] }
 0x108   : > { %785 = vrot.lane.b32.xlu1 %v4548_v7, %s4102_s30 }
 0x109   : > { %1349 = vrot.lane.b32.xlu0 %v4474_v11, %s4108_s19  ;;  %v1615_v11 = vsel %vm1609_vm10, %v1593_v18, %v1276_v4 }
 0x10a   : > { %v4566_v17 = vpop.permute.xlu1 %775 }
 0x10b   : > { %v1340_v6 = vpop.permute.xlu0 %1339 }
 0x10c   : > { %1119 = vrot.lane.b32.xlu1 %v622_v16, %s4104_s14  ;;  %v1637_v21 = vsel %vm1631_vm11, %v1615_v11, %v1340_v6  ;;  %v1463_v16 = vsel %vm463_vm1, %v4362_v37, %v4553_v9 }
 0x10d   : > { %791 = vrot.lane.b32.xlu0 %v4563_v15, %s4102_s30 }
 0x10e   : > { %v1404_v23 = vpop.permute.xlu1 %1403 }
 0x10f   : > { %v1110_v22 = vpop.permute.xlu0 %1109  ;;  %v1659_v26 = vsel %vm1653_vm12, %v1637_v21, %v1404_v23  ;;  %v561_v21 = vld [vmem:[#allocation2 + $0x6e] sm:$0xff] }
 0x110   : > { %1413 = vrot.lane.b32.xlu1 %v4494_v24, %s4109_s25  ;;  %3817 = vmatmul.mubr.msk.f32.gmra.mxu0 %vm1681_vm13, %v1659_v26  ;;  %v1572_v51 = vsel %vm1565_vm8, %v1550_v13, %v1110_v22  ;;  %v644_v22 = vld [vmem:[#allocation2 + $0x6a] sm:$0xff] }
 0x111   : > { %1125 = vrot.lane.b32.xlu0 %v625_v19, %s4104_s14  ;;  %3819 = vmatprep.mubr.msk.f32.mxu0 %vm4106_vm3, %v4098_v0  ;;  %v624_v13 = vld [vmem:[#allocation2 + $0x71] sm:$0xff] }
 0x112   : > { %v1194_v31 = vpop.permute.xlu1 %1193 }
 0x113   : > { %v860_v30 = vpop.permute.xlu0 %859  ;;  %v1594_v34 = vsel %vm1587_vm9, %v1572_v51, %v1194_v31  ;;  %v4662_v31 = vld [vmem:[#allocation2 + $0x6b] sm:$0xff] }
 0x114   : > { %875 = vrot.lane.b32.xlu1 %v563_v29, %s4099_s27  ;;  %v582_v29 = vld [vmem:[#allocation2 + $0x6f] sm:$0xff] }
 0x115   : > { %869 = vrot.lane.b32.xlu0 %v560_v28, %s4099_s27 }
 0x116   : > { %v1278_v24 = vpop.permute.xlu1 %1277 }
 0x117   : > { %v944_v40 = vpop.permute.xlu0 %943  ;;  %v1616_v52 = vsel %vm1609_vm10, %v1594_v34, %v1278_v24  ;;  %v603_v24 = vld [vmem:[#allocation2 + $0x70] sm:$0xff] }
 0x118   : > { %1209 = vrot.lane.b32.xlu1 %v646_v35, %s4105_s15 }
 0x119   : > { %1203 = vrot.lane.b32.xlu0 %v643_v33, %s4105_s15  ;;  %v4664_v33 = vld [vmem:[#allocation2 + $0x83] sm:$0xff] }
 0x11a   : > { %v1028_v36 = vpop.permute.xlu1 %1027 }
 0x11b   : > { %v4591_v44 = vpop.permute.xlu0 %693 }
 0x11c   : > { %959 = vrot.lane.b32.xlu1 %v584_v42, %s4101_s29 }
 0x11d   : > { %953 = vrot.lane.b32.xlu0 %v581_v41, %s4101_s29  ;;  %v1464_v41 = vsel %vm463_vm1, %v4391_v2, %v4591_v44 }
 0x11e   : > { %v4604_v49 = vpop.permute.xlu1 %777 }
 0x11f   : > { %v1342_v39 = vpop.permute.xlu0 %1341 }
 0x120   : > { %1293 = vrot.lane.b32.xlu1 %v4601_v48, %s4107_s20  ;;  %v1638_v55 = vsel %vm1631_vm11, %v1616_v52, %v1342_v39  ;;  %v543_v52 = vld [vmem:[#allocation2 + $0x85] sm:$0xff] }
 0x121   : > { %1287 = vrot.lane.b32.xlu0 %v4599_v38, %s4107_s20 }
 0x122   : > { %v1406_v60 = vpop.permute.xlu1 %1405 }
 0x123   : > { %v1112_v59 = vpop.permute.xlu0 %1111  ;;  %v1660_v61 = vsel %vm1653_vm12, %v1638_v55, %v1406_v60  ;;  %v645_v60 = vld [vmem:[#allocation2 + $0x72] sm:$0xff] }
 0x124   : > { %1037 = vrot.lane.b32.xlu1 %v602_v54, %s4103_s13  ;;  %3820 = vmatmul.mubr.msk.f32.gmra.mxu0 %vm1681_vm13, %v1660_v61  ;;  %v4696_v61 = vld [vmem:[#allocation2 + $0x73] sm:$0xff] }
 0x125   : > { %703 = vrot.lane.b32.xlu0 %v4613_v53, %s4100_s28  ;;  %3822 = vmatprep.mubr.msk.f32.mxu0 %vm4106_vm3, %v4098_v0 }
 0x126   : > { %v1196_v4 = vpop.permute.xlu1 %1195 }
 0x127   : > { %v862_v63 = vpop.permute.xlu0 %861 }
 0x128   : > { %1351 = vrot.lane.b32.xlu1 %v4535_v57, %s4108_s19  ;;  %v1485_v57 = vsel %vm1477_vm4, %v1463_v16, %v4566_v17 }
 0x129   : > { %1043 = vrot.lane.b32.xlu0 %v605_v62, %s4103_s13  ;;  %v1507_v12 = vsel %vm1499_vm5, %v1485_v57, %v860_v30 }
 0x12a   : > { %v1280_v45 = vpop.permute.xlu1 %1279 }
 0x12b   : > { %v946_v10 = vpop.permute.xlu0 %945 }
 0x12c   : > { %787 = vrot.lane.b32.xlu1 %v4626_v8, %s4102_s30 }
 0x12d   : > { %1357 = vrot.lane.b32.xlu0 %v4537_v58, %s4108_s19  ;;  %v1529_v58 = vsel %vm1521_vm6, %v1507_v12, %v944_v40 }
 0x12e   : > { %v1030_v6 = vpop.permute.xlu1 %1029  ;;  %v1551_v18 = vsel %vm1543_vm7, %v1529_v58, %v1028_v36  ;;  %v1486_v36 = vsel %vm1477_vm4, %v1464_v41, %v4604_v49  ;;  %v523_v58 = vld [vmem:[#allocation2 + $0x8c] sm:$0xff] }
 0x12f   : > { %v4635_v3 = vpop.permute.xlu0 %695  ;;  %v1573_v37 = vsel %vm1565_vm8, %v1551_v18, %v1112_v59  ;;  %v1508_v47 = vsel %vm1499_vm5, %v1486_v36, %v862_v63  ;;  %v606_v18 = vld [vmem:[#allocation2 + $0x88] sm:$0xff]  ;;  %v607_v36 = vld [vmem:[#allocation2 + $0x90] sm:$0xff] }
 0x130   : > { %1127 = vrot.lane.b32.xlu1 %v626_v14, %s4104_s14  ;;  %v1595_v9 = vsel %vm1587_vm9, %v1573_v37, %v1196_v4  ;;  %v1530_v56 = vsel %vm1521_vm6, %v1508_v47, %v946_v10  ;;  %v585_v14 = vld [vmem:[#allocation2 + $0x87] sm:$0xff]  ;;  %v1465_v16 = vsel %vm463_vm1, %v4425_v32, %v4635_v3 }
 0x131   : > { %1121 = vrot.lane.b32.xlu0 %v623_v5, %s4104_s14  ;;  %v1617_v17 = vsel %vm1609_vm10, %v1595_v9, %v1280_v45  ;;  %v1552_v39 = vsel %vm1543_vm7, %v1530_v56, %v1030_v6  ;;  %v564_v5 = vld [vmem:[#allocation2 + $0x86] sm:$0xff] }
 0x132   : > { %v4644_v19 = vpop.permute.xlu1 %779 }
 0x133   : > { %v1344_v11 = vpop.permute.xlu0 %1343 }
 0x134   : > { %1421 = vrot.lane.b32.xlu1 %v4563_v15, %s4109_s25  ;;  %v1639_v23 = vsel %vm1631_vm11, %v1617_v17, %v1344_v11  ;;  %v544_v17 = vld [vmem:[#allocation2 + $0x8d] sm:$0xff] }
 0x135   : > { %1415 = vrot.lane.b32.xlu0 %v4548_v7, %s4109_s25  ;;  %v647_v7 = vld [vmem:[#allocation2 + $0x82] sm:$0xff] }
 0x136   : > { %v1408_v27 = vpop.permute.xlu1 %1407 }
 0x137   : > { %v1114_v26 = vpop.permute.xlu0 %1113  ;;  %v1661_v28 = vsel %vm1653_vm12, %v1639_v23, %v1408_v27 }
 0x138   : > { %1205 = vrot.lane.b32.xlu1 %v644_v22, %s4105_s15  ;;  %3823 = vmatmul.mubr.msk.f32.gmra.mxu0 %vm1681_vm13, %v1661_v28  ;;  %v1574_v51 = vsel %vm1565_vm8, %v1552_v39, %v1114_v26  ;;  %v565_v28 = vld [vmem:[#allocation2 + $0x8e] sm:$0xff] }
 0x139   : > { %871 = vrot.lane.b32.xlu0 %v561_v21, %s4099_s27  ;;  %3825 = vmatprep.mubr.msk.f32.mxu0 %vm4106_vm3, %v4098_v0  ;;  %v627_v21 = vld [vmem:[#allocation2 + $0x89] sm:$0xff] }
 0x13a   : > { %v1198_v15 = vpop.permute.xlu1 %1197 }
 0x13b   : > { %v864_v30 = vpop.permute.xlu0 %863  ;;  %v1596_v49 = vsel %vm1587_vm9, %v1574_v51, %v1198_v15  ;;  %v586_v15 = vld [vmem:[#allocation2 + $0x8f] sm:$0xff] }
 0x13c   : > { %955 = vrot.lane.b32.xlu1 %v582_v29, %s4101_s29  ;;  %v628_v51 = vld [vmem:[#allocation2 + $0x91] sm:$0xff] }
 0x13d   : > { %1211 = vrot.lane.b32.xlu0 %v647_v7, %s4105_s15  ;;  %v648_v7 = vld [vmem:[#allocation2 + $0x8a] sm:$0xff] }
 0x13e   : > { %v1282_v40 = vpop.permute.xlu1 %1281 }
 0x13f   : > { %v948_v35 = vpop.permute.xlu0 %947  ;;  %v1618_v34 = vsel %vm1609_vm10, %v1596_v49, %v1282_v40 }
 0x140   : > { %1295 = vrot.lane.b32.xlu1 %v4664_v33, %s4107_s20 }
 0x141   : > { %1289 = vrot.lane.b32.xlu0 %v4662_v31, %s4107_s20 }
 0x142   : > { %v1032_v43 = vpop.permute.xlu1 %1031 }
 0x143   : > { %v4673_v42 = vpop.permute.xlu0 %697 }
 0x144   : > { %1353 = vrot.lane.b32.xlu1 %v4613_v53, %s4108_s19 }
 0x145   : > { %1039 = vrot.lane.b32.xlu0 %v603_v24, %s4103_s13 }
 0x146   : > { %v4683_v44 = vpop.permute.xlu1 %781 }
 0x147   : > { %v1346_v2 = vpop.permute.xlu0 %1345 }
 0x148   : > { %1123 = vrot.lane.b32.xlu1 %v624_v13, %s4104_s14  ;;  %v1640_v53 = vsel %vm1631_vm11, %v1618_v34, %v1346_v2  ;;  %v545_v13 = vld [vmem:[#allocation2 + $0x95] sm:$0xff] }
 0x149   : > { %1359 = vrot.lane.b32.xlu0 %v522_v46, %s4108_s19 }
 0x14a   : > { %v1410_v55 = vpop.permute.xlu1 %1409 }
 0x14b   : > { %v1116_v54 = vpop.permute.xlu0 %1115  ;;  %v1662_v59 = vsel %vm1653_vm12, %v1640_v53, %v1410_v55  ;;  %v649_v53 = vld [vmem:[#allocation2 + $0x92] sm:$0xff] }
 0x14c   : > { %1423 = vrot.lane.b32.xlu1 %v543_v52, %s4109_s25  ;;  %3826 = vmatmul.mubr.msk.f32.gmra.mxu0 %vm1681_vm13, %v1662_v59 }
 0x14d   : > { %1417 = vrot.lane.b32.xlu0 %v4626_v8, %s4109_s25  ;;  %3828 = vmatprep.mubr.msk.f32.mxu0 %vm4106_vm3, %v4098_v0 }
 0x14e   : > { %v1200_v63 = vpop.permute.xlu1 %1199 }
 0x14f   : > { %v4698_v62 = vpop.permute.xlu0 %865 }
 0x150   : > { %1291 = vrot.lane.b32.xlu1 %v4696_v61, %s4107_s20 }
 0x151   : > { %1207 = vrot.lane.b32.xlu0 %v645_v60, %s4105_s15 }
 0x152   : > { %v1284_v8 = vpop.permute.xlu1 %1283 }
 0x153   : > { %v4705_v4 = vpop.permute.xlu0 %949 }
 0x154   : > { %1419 = vrot.lane.b32.xlu1 %v4496_v25, %s4109_s25  ;;  %v1487_v25 = vsel %vm1477_vm4, %v1465_v16, %v4644_v19 }
 0x155   : > { %1355 = vrot.lane.b32.xlu0 %v4476_v20, %s4108_s19  ;;  %v1509_v57 = vsel %vm1499_vm5, %v1487_v25, %v864_v30  ;;  %v525_v25 = vld [vmem:[#allocation2 + $0x9c] sm:$0xff] }
 0x156   : > { %v4713_v45 = vpop.permute.xlu1 %705  ;;  %v1531_v12 = vsel %vm1521_vm6, %v1509_v57, %v948_v35  ;;  %v4751_v35 = vld [vmem:[#allocation2 + $0x8b] sm:$0xff]  ;;  %v608_v57 = vld [vmem:[#allocation2 + $0x98] sm:$0xff] }
 0x157   : > { %v4711_v10 = vpop.permute.xlu0 %699  ;;  %v1553_v11 = vsel %vm1543_vm7, %v1531_v12, %v1032_v43  ;;  %v524_v43 = vld [vmem:[#allocation2 + $0x94] sm:$0xff] }
 0x158   : > { %793 = vrot.lane.b32.xlu1 %v543_v52, %s4102_s30  ;;  %v1575_v3 = vsel %vm1565_vm8, %v1553_v11, %v1116_v54  ;;  %v566_v52 = vld [vmem:[#allocation2 + $0x96] sm:$0xff]  ;;  %v1466_v54 = vsel %vm463_vm1, %v4460_v1, %v4673_v42 }
 0x159   : > { %709 = vrot.lane.b32.xlu0 %v522_v46, %s4100_s28  ;;  %v1597_v19 = vsel %vm1587_vm9, %v1575_v3, %v1200_v63  ;;  %v1488_v60 = vsel %vm1477_vm4, %v1466_v54, %v4683_v44  ;;  %v546_v3 = vld [vmem:[#allocation2 + $0x9d] sm:$0xff] }
 0x15a   : > { %v1348_v20 = vpop.permute.xlu1 %1347  ;;  %v1619_v9 = vsel %vm1609_vm10, %v1597_v19, %v1284_v8  ;;  %v1510_v63 = vsel %vm1499_vm5, %v1488_v60, %v4698_v62  ;;  %v630_v60 = vld [vmem:[#allocation2 + $0xa1] sm:$0xff] }
 0x15b   : > { %v4720_v6 = vpop.permute.xlu0 %1033  ;;  %v1641_v22 = vsel %vm1631_vm11, %v1619_v9, %v1348_v20  ;;  %v1532_v8 = vsel %vm1521_vm6, %v1510_v63, %v4705_v4  ;;  %v1467_v63 = vsel %vm463_vm1, %v4526_v50, %v4711_v10  ;;  %v568_v10 = vld [vmem:[#allocation2 + $0xa6] sm:$0xff] }
 0x15c   : > { %961 = vrot.lane.b32.xlu1 %v585_v14, %s4101_s29  ;;  %v4789_v14 = vld [vmem:[#allocation2 + $0x93] sm:$0xff]  ;;  %v1554_v1 = vsel %vm1543_vm7, %v1532_v8, %v4720_v6  ;;  %v1470_v8 = vsel %vm463_vm1, %v4696_v61, %v4713_v45  ;;  %v651_v45 = vld [vmem:[#allocation2 + $0xa2] sm:$0xff] }
 0x15d   : > { %877 = vrot.lane.b32.xlu0 %v564_v5, %s4099_s27  ;;  %v587_v5 = vld [vmem:[#allocation2 + $0x97] sm:$0xff] }
 0x15e   : > { %v4731_v32 = vpop.permute.xlu1 %789 }
 0x15f   : > { %v4729_v37 = vpop.permute.xlu0 %783 }
 0x160   : > { %1045 = vrot.lane.b32.xlu1 %v606_v18, %s4103_s13 }
 0x161   : > { %711 = vrot.lane.b32.xlu0 %v523_v58, %s4100_s28 }
 0x162   : > { %v1412_v26 = vpop.permute.xlu1 %1411 }
 0x163   : > { %v1118_v23 = vpop.permute.xlu0 %1117  ;;  %v1663_v27 = vsel %vm1653_vm12, %v1641_v22, %v1412_v26  ;;  %v650_v26 = vld [vmem:[#allocation2 + $0x9a] sm:$0xff] }
 0x164   : > { %1129 = vrot.lane.b32.xlu1 %v627_v21, %s4104_s14  ;;  %3829 = vmatmul.mubr.msk.f32.gmra.mxu0 %vm1681_vm13, %v1663_v27  ;;  %v1576_v44 = vsel %vm1565_vm8, %v1554_v1, %v1118_v23  ;;  %v567_v23 = vld [vmem:[#allocation2 + $0x9e] sm:$0xff] }
 0x165   : > { %795 = vrot.lane.b32.xlu0 %v544_v17, %s4102_s30  ;;  %3831 = vmatprep.mubr.msk.f32.mxu0 %vm4106_vm3, %v4098_v0 }
 0x166   : > { %v4745_v30 = vpop.permute.xlu1 %873 }
 0x167   : > { %v4743_v29 = vpop.permute.xlu0 %867 }
 0x168   : > { %1213 = vrot.lane.b32.xlu1 %v648_v7, %s4105_s15  ;;  %v588_v7 = vld [vmem:[#allocation2 + $0x9f] sm:$0xff] }
 0x169   : > { %879 = vrot.lane.b32.xlu0 %v565_v28, %s4099_s27 }
 0x16a   : > { %v4753_v24 = vpop.permute.xlu1 %951 }
 0x16b   : > { %v1202_v40 = vpop.permute.xlu0 %1201 }
 0x16c   : > { %1297 = vrot.lane.b32.xlu1 %v4751_v35, %s4107_s20  ;;  %v4758_v41 = vpop.f32.mrf.mxu0  ;;  %v1598_v62 = vsel %vm1587_vm9, %v1576_v44, %v1202_v40  ;;  %v1489_v44 = vsel %vm1477_vm4, %v1467_v63, %v4729_v37 }
 0x16d   : > { %963 = vrot.lane.b32.xlu0 %v586_v15, %s4101_s29  ;;  %v4828_v15 = vld [vmem:[#allocation2 + $0x9b] sm:$0xff] }
 0x16e   : > { %v1286_v56 = vpop.permute.xlu1 %1285  ;;  %v3803_v46 = vpop.f32.mrf.mxu0 }
 0x16f   : > { %v4760_v47 = vpop.permute.xlu0 %957  ;;  %v1620_v4 = vsel %vm1609_vm10, %v1598_v62, %v1286_v56  ;;  %v526_v56 = vld [vmem:[#allocation2 + $0xa4] sm:$0xff]  ;;  %v1492_v62 = vsel %vm1477_vm4, %v1470_v8, %v4731_v32 }
 0x170   : > { %1047 = vrot.lane.b32.xlu1 %v607_v36, %s4103_s13  ;;  %v609_v46 = vld [vmem:[#allocation2 + $0xa0] sm:$0xff] }
 0x171   : > { %713 = vrot.lane.b32.xlu0 %v524_v43, %s4100_s28 }
 0x172   : > { %v4766_v2 = vpop.permute.xlu1 %707 }
 0x173   : > { %v4764_v39 = vpop.permute.xlu0 %701 }
 0x174   : > { %797 = vrot.lane.b32.xlu1 %v545_v13, %s4102_s30 }
 0x175   : > { %1361 = vrot.lane.b32.xlu0 %v523_v58, %s4108_s19 }
 0x176   : > { %v4772_v34 = vpop.permute.xlu1 %1041 }
 0x177   : > { %v4770_v49 = vpop.permute.xlu0 %1035 }
 0x178   : > { %1425 = vrot.lane.b32.xlu1 %v544_v17, %s4109_s25  ;;  %v629_v17 = vld [vmem:[#allocation2 + $0x99] sm:$0xff] }
 0x179   : > { %1131 = vrot.lane.b32.xlu0 %v628_v51, %s4104_s14 }
 0x17a   : > { %v4779_v59 = vpop.permute.xlu1 %785 }
 0x17b   : > { %v1350_v55 = vpop.permute.xlu0 %1349 }
 0x17c   : > { %1215 = vrot.lane.b32.xlu1 %v649_v53, %s4105_s15  ;;  %v1642_v6 = vsel %vm1631_vm11, %v1620_v4, %v1350_v55  ;;  %v547_v53 = vld [vmem:[#allocation2 + $0xa5] sm:$0xff]  ;;  %v1511_v4 = vsel %vm1499_vm5, %v1489_v44, %v4743_v29  ;;  %v655_v44 = vld [vmem:[#allocation2 + $0xad] sm:$0xff] }
 0x17d   : > { %881 = vrot.lane.b32.xlu0 %v566_v52, %s4099_s27  ;;  %v1533_v50 = vsel %vm1521_vm6, %v1511_v4, %v4753_v24 }
 0x17e   : > { %v4795_v16 = vpop.permute.xlu1 %1119  ;;  %v1555_v37 = vsel %vm1543_vm7, %v1533_v50, %v4770_v49 }
 0x17f   : > { %v4793_v42 = vpop.permute.xlu0 %791 }
 0x180   : > { %1299 = vrot.lane.b32.xlu1 %v4789_v14, %s4107_s20  ;;  %v4803_v20 = vpop.f32.mrf.mxu0 }
 0x181   : > { %965 = vrot.lane.b32.xlu0 %v587_v5, %s4101_s29 }
 0x182   : > { %v1414_v58 = vpop.permute.xlu1 %1413  ;;  %v3806_v11 = vpop.f32.mrf.mxu0 }
 0x183   : > { %v4806_v12 = vpop.permute.xlu0 %1125  ;;  %v1664_v18 = vsel %vm1653_vm12, %v1642_v6, %v1414_v58  ;;  %v589_v58 = vld [vmem:[#allocation2 + $0xa7] sm:$0xff] }
 0x184   : > { %1049 = vrot.lane.b32.xlu1 %v608_v57, %s4103_s13  ;;  %3832 = vmatmul.mubr.msk.f32.gmra.mxu0 %vm1681_vm13, %v1664_v18  ;;  %v1577_v57 = vsel %vm1565_vm8, %v1555_v37, %v4795_v16  ;;  %v4881_v18 = vld [vmem:[#allocation2 + $0xa3] sm:$0xff] }
 0x185   : > { %715 = vrot.lane.b32.xlu0 %v525_v25, %s4100_s28  ;;  %3834 = vmatprep.mubr.msk.f32.mxu0 %vm4106_vm3, %v4098_v0 }
 0x186   : > { %v4814_v9 = vpop.permute.xlu1 %875 }
 0x187   : > { %v4812_v19 = vpop.permute.xlu0 %869 }
 0x188   : > { %799 = vrot.lane.b32.xlu1 %v546_v3, %s4102_s30 }
 0x189   : > { %1363 = vrot.lane.b32.xlu0 %v524_v43, %s4108_s19 }
 0x18a   : > { %v1210_v22 = vpop.permute.xlu1 %1209 }
 0x18b   : > { %v1204_v21 = vpop.permute.xlu0 %1203 }
 0x18c   : > { %1427 = vrot.lane.b32.xlu1 %v545_v13, %s4109_s25  ;;  %v1599_v24 = vsel %vm1587_vm9, %v1577_v57, %v1204_v21 }
 0x18d   : > { %1133 = vrot.lane.b32.xlu0 %v629_v17, %s4104_s14 }
 0x18e   : > { %v4824_v28 = vpop.permute.xlu1 %959 }
 0x18f   : > { %v4822_v27 = vpop.permute.xlu0 %953 }
 0x190   : > { %1217 = vrot.lane.b32.xlu1 %v650_v26, %s4105_s15 }
 0x191   : > { %883 = vrot.lane.b32.xlu0 %v567_v23, %s4099_s27  ;;  %v610_v23 = vld [vmem:[#allocation2 + $0xa8] sm:$0xff] }
 0x192   : > { %v1294_v43 = vpop.permute.xlu1 %1293 }
 0x193   : > { %v1288_v40 = vpop.permute.xlu0 %1287 }
 0x194   : > { %1301 = vrot.lane.b32.xlu1 %v4828_v15, %s4107_s20  ;;  %v4833_v36 = vpop.f32.mrf.mxu0  ;;  %v1621_v49 = vsel %vm1609_vm10, %v1599_v24, %v1288_v40 }
 0x195   : > { %967 = vrot.lane.b32.xlu0 %v588_v7, %s4101_s29 }
 0x196   : > { %v4837_v51 = vpop.permute.xlu1 %1037  ;;  %v3809_v52 = vpop.f32.mrf.mxu0 }
 0x197   : > { %v4835_v13 = vpop.permute.xlu0 %703 }
 0x198   : > { %1051 = vrot.lane.b32.xlu1 %v609_v46, %s4103_s13 }
 0x199   : > { %717 = vrot.lane.b32.xlu0 %v526_v56, %s4100_s28 }
 0x19a   : > { %v1352_v55 = vpop.permute.xlu1 %1351 }
 0x19b   : > { %v4841_v54 = vpop.permute.xlu0 %1043  ;;  %v1643_v16 = vsel %vm1631_vm11, %v1621_v49, %v1352_v55  ;;  %v652_v55 = vld [vmem:[#allocation2 + $0xaa] sm:$0xff] }
 0x19c   : > { %801 = vrot.lane.b32.xlu1 %v547_v53, %s4102_s30 }
 0x19d   : > { %1365 = vrot.lane.b32.xlu0 %v525_v25, %s4108_s19  ;;  %v1514_v25 = vsel %vm1499_vm5, %v1492_v62, %v4745_v30  ;;  %v1471_v62 = vsel %vm463_vm1, %v4601_v48, %v4766_v2 }
 0x19e   : > { %v4851_v1 = vpop.permute.xlu1 %787  ;;  %v1536_v61 = vsel %vm1521_vm6, %v1514_v25, %v4760_v47  ;;  %v1493_v50 = vsel %vm1477_vm4, %v1471_v62, %v4793_v42 }
 0x19f   : > { %v1358_v5 = vpop.permute.xlu0 %1357  ;;  %v1558_v32 = vsel %vm1543_vm7, %v1536_v61, %v4772_v34 }
 0x1a0   : > { %1429 = vrot.lane.b32.xlu1 %v546_v3, %s4109_s25  ;;  %v1580_v6 = vsel %vm1565_vm8, %v1558_v32, %v4806_v12 }
 0x1a1   : > { %1135 = vrot.lane.b32.xlu0 %v630_v60, %s4104_s14  ;;  %v1602_v47 = vsel %vm1587_vm9, %v1580_v6, %v1210_v22  ;;  %v653_v60 = vld [vmem:[#allocation2 + $0xab] sm:$0xff] }
 0x1a2   : > { %v1128_v30 = vpop.permute.xlu1 %1127  ;;  %v1624_v34 = vsel %vm1609_vm10, %v1602_v47, %v1294_v43  ;;  %v631_v43 = vld [vmem:[#allocation2 + $0xa9] sm:$0xff] }
 0x1a3   : > { %v1122_v29 = vpop.permute.xlu0 %1121  ;;  %v1646_v11 = vsel %vm1631_vm11, %v1624_v34, %v1358_v5  ;;  %v654_v5 = vld [vmem:[#allocation2 + $0xac] sm:$0xff] }
 0x1a4   : > { %1219 = vrot.lane.b32.xlu1 %v651_v45, %s4105_s15 }
 0x1a5   : > { %885 = vrot.lane.b32.xlu0 %v568_v10, %s4099_s27  ;;  %v1515_v10 = vsel %vm1499_vm5, %v1493_v50, %v4814_v9 }
 0x1a6   : > { %v1422_v3 = vpop.permute.xlu1 %1421  ;;  %v1537_v48 = vsel %vm1521_vm6, %v1515_v10, %v4824_v28 }
 0x1a7   : > { %v1416_v12 = vpop.permute.xlu0 %1415  ;;  %v1668_v21 = vsel %vm1653_vm12, %v1646_v11, %v1422_v3  ;;  %v1559_v2 = vsel %vm1543_vm7, %v1537_v48, %v4841_v54 }
 0x1a8   : > { %v1665_v17 = vsel %vm1653_vm12, %v1643_v16, %v1416_v12  ;;  %1303 = vrot.lane.b32.xlu1 %v4881_v18, %s4107_s20  ;;  %v4890_v22 = vpop.f32.mrf.mxu0  ;;  %3844 = vmatmul.mubr.msk.f32.vlgmr.msra.gmra.mxu1 %vm1681_vm13, %v1668_v21  ;;  %v1581_v9 = vsel %vm1565_vm8, %v1559_v2, %v1128_v30 }
 0x1a9   : > { %969 = vrot.lane.b32.xlu0 %v589_v58, %s4101_s29  ;;  %3835 = vmatmul.mubr.msk.f32.gmra.mxu0 %vm1681_vm13, %v1665_v17  ;;  %s409_s29 = scalar_lea.vmem %s5922_s12, %s5924_s22 }
 0x1aa   : > { %v1206_v7 = vpop.permute.xlu1 %1205  ;;  %3837 = vmatprep.mubr.msk.f32.mxu0 %vm4106_vm3, %v4098_v0  ;;  %3846 = vmatprep.mubr.msk.f32.mxu1 %vm4106_vm3, %v4098_v0  ;;  %v3812_v40 = vpop.f32.mrf.mxu0 }
 0x1ab   : > { %v872_v26 = vpop.permute.xlu0 %871 }
 0x1ac   : > { %1367 = vrot.lane.b32.xlu1 %v526_v56, %s4108_s19  ;;  %v1468_v56 = vsel %vm463_vm1, %v4599_v38, %v4764_v39 }
 0x1ad   : > { %1053 = vrot.lane.b32.xlu0 %v610_v23, %s4103_s13  ;;  %v1490_v25 = vsel %vm1477_vm4, %v1468_v56, %v4779_v59 }
 0x1ae   : > { %v956_v52 = vpop.permute.xlu1 %955  ;;  %v1512_v61 = vsel %vm1499_vm5, %v1490_v25, %v4812_v19 }
 0x1af   : > { %v1212_v46 = vpop.permute.xlu0 %1211  ;;  %v1534_v38 = vsel %vm1521_vm6, %v1512_v61, %v4822_v27  ;;  %v1469_v27 = vsel %vm463_vm1, %v4662_v31, %v4835_v13 }
 0x1b0   : > { %1431 = vrot.lane.b32.xlu1 %v547_v53, %s4109_s25  ;;  %v1556_v39 = vsel %vm1543_vm7, %v1534_v38, %v4837_v51  ;;  %v1603_v37 = vsel %vm1587_vm9, %v1581_v9, %v1212_v46  ;;  %v1491_v54 = vsel %vm1477_vm4, %v1469_v27, %v4851_v1 }
 0x1b1   : > { %1137 = vrot.lane.b32.xlu0 %v631_v43, %s4104_s14  ;;  %v1578_v19 = vsel %vm1565_vm8, %v1556_v39, %v1122_v29  ;;  %v1513_v24 = vsel %vm1499_vm5, %v1491_v54, %v872_v26 }
 0x1b2   : > { %v1296_v8 = vpop.permute.xlu1 %1295  ;;  %v1600_v45 = vsel %vm1587_vm9, %v1578_v19, %v1206_v7  ;;  %v1535_v49 = vsel %vm1521_vm6, %v1513_v24, %v956_v52 }
 0x1b3   : > { %v1290_v63 = vpop.permute.xlu0 %1289  ;;  %v1625_v51 = vsel %vm1609_vm10, %v1603_v37, %v1296_v8 }
 0x1b4   : > { %1305 = vrot.lane.b32.xlu1 %v653_v60, %s4107_s20  ;;  %v1622_v28 = vsel %vm1609_vm10, %v1600_v45, %v1290_v63 }
 0x1b5   : > { %1221 = vrot.lane.b32.xlu0 %v652_v55, %s4105_s15 }
 0x1b6   : > { %v1354_v53 = vpop.permute.xlu1 %1353 }
 0x1b7   : > { %v1040_v4 = vpop.permute.xlu0 %1039  ;;  %v1644_v29 = vsel %vm1631_vm11, %v1622_v28, %v1354_v53 }
 0x1b8   : > { %1433 = vrot.lane.b32.xlu1 %v655_v44, %s4109_s25  ;;  %v1557_v1 = vsel %vm1543_vm7, %v1535_v49, %v1040_v4 }
 0x1b9   : > { %1369 = vrot.lane.b32.xlu0 %v654_v5, %s4108_s19 }
 0x1ba   : > { %v1124_v42 = vpop.permute.xlu1 %1123 }
 0x1bb   : > { %v1360_v59 = vpop.permute.xlu0 %1359  ;;  %v1579_v34 = vsel %vm1565_vm8, %v1557_v1, %v1124_v42 }
 0x1bc   : > { %v4937_v32 = vpop.f32.mrf.mxu0  ;;  %v1647_v30 = vsel %vm1631_vm11, %v1625_v51, %v1360_v59 }
 0x1be   : > { %v1424_v6 = vpop.permute.xlu1 %1423  ;;  %v3815_v13 = vpop.f32.mrf.mxu0 }
 0x1bf   : > { %v1418_v57 = vpop.permute.xlu0 %1417  ;;  %v1669_v31 = vsel %vm1653_vm12, %v1647_v30, %v1424_v6 }
 0x1c0   : > { %v1666_v47 = vsel %vm1653_vm12, %v1644_v29, %v1418_v57  ;;  %3847 = vmatmul.mubr.msk.f32.gmra.mxu1 %vm1681_vm13, %v1669_v31 }
 0x1c1   : > { %3838 = vmatmul.mubr.msk.f32.gmra.mxu0 %vm1681_vm13, %v1666_v47  ;;  %3849 = vmatprep.mubr.msk.f32.mxu1 %vm4106_vm3, %v4098_v0 }
 0x1c2   : > { %3840 = vmatprep.mubr.msk.f32.mxu0 %vm4106_vm3, %v4098_v0  ;;  %v1292_v16 = vpop.permute.xlu1 %1291 }
 0x1c3   : > { %v1208_v58 = vpop.permute.xlu0 %1207 }
 0x1c4   : > { %v1601_v11 = vsel %vm1587_vm9, %v1579_v34, %v1208_v58 }
 0x1c5   : > { %v1623_v12 = vsel %vm1609_vm10, %v1601_v11, %v1292_v16 }
 0x1c6   : > { %v1420_v17 = vpop.permute.xlu1 %1419 }
 0x1c7   : > { %v1356_v3 = vpop.permute.xlu0 %1355 }
 0x1c8   : > { %v1645_v21 = vsel %vm1631_vm11, %v1623_v12, %v1356_v3 }
 0x1c9   : > { %v1667_v23 = vsel %vm1653_vm12, %v1645_v21, %v1420_v17 }
 0x1ca   : > { %3841 = vmatmul.mubr.msk.f32.gmra.mxu0 %vm1681_vm13, %v1667_v23  ;;  %v794_v7 = vpop.permute.xlu1 %793 }
 0x1cb   : > { %v710_v26 = vpop.permute.xlu0 %709 }
 0x1cc   : > { %v1472_v56 = vsel %vm463_vm1, %v4664_v33, %v710_v26 }
 0x1cd   : > { %v1494_v53 = vsel %vm1477_vm4, %v1472_v56, %v794_v7 }
 0x1ce   : > { %v962_v43 = vpop.permute.xlu1 %961 }
 0x1cf   : > { %v878_v40 = vpop.permute.xlu0 %877 }
 0x1d0   : > { %v4960_v46 = vpop.f32.mrf.mxu0  ;;  %v1516_v25 = vsel %vm1499_vm5, %v1494_v53, %v878_v40 }
 0x1d1   : > { %v1538_v10 = vsel %vm1521_vm6, %v1516_v25, %v962_v43 }
 0x1d2   : > { %v1046_v55 = vpop.permute.xlu1 %1045  ;;  %v3818_v60 = vpop.f32.mrf.mxu0 }
 0x1d3   : > { %v712_v52 = vpop.permute.xlu0 %711  ;;  %v1560_v48 = vsel %vm1543_vm7, %v1538_v10, %v1046_v55 }
 0x1d4   : > { %v1473_v30 = vsel %vm463_vm1, %v4751_v35, %v712_v52 }
 0x1d6   : > { %v1130_v8 = vpop.permute.xlu1 %1129 }
 0x1d7   : > { %v796_v63 = vpop.permute.xlu0 %795  ;;  %v1582_v59 = vsel %vm1565_vm8, %v1560_v48, %v1130_v8 }
 0x1d8   : > { %v1495_v24 = vsel %vm1477_vm4, %v1473_v30, %v796_v63 }
 0x1da   : > { %v1214_v44 = vpop.permute.xlu1 %1213 }
 0x1db   : > { %v880_v5 = vpop.permute.xlu0 %879  ;;  %v1604_v33 = vsel %vm1587_vm9, %v1582_v59, %v1214_v44 }
 0x1dc   : > { %v1517_v47 = vsel %vm1499_vm5, %v1495_v24, %v880_v5 }
 0x1de   : > { %v1298_v4 = vpop.permute.xlu1 %1297 }
 0x1df   : > { %v964_v62 = vpop.permute.xlu0 %963  ;;  %v1626_v19 = vsel %vm1609_vm10, %v1604_v33, %v1298_v4 }
 0x1e0   : > { %v1539_v31 = vsel %vm1521_vm6, %v1517_v47, %v964_v62 }
 0x1e2   : > { %v1048_v61 = vpop.permute.xlu1 %1047 }
 0x1e3   : > { %v714_v50 = vpop.permute.xlu0 %713  ;;  %v1561_v49 = vsel %vm1543_vm7, %v1539_v31, %v1048_v61 }
 0x1e4   : > { %v4967_v38 = vpop.f32.mrf.mxu0  ;;  %v1474_v43 = vsel %vm463_vm1, %v4789_v14, %v714_v50 }
 0x1e6   : > { %v798_v2 = vpop.permute.xlu1 %797  ;;  %v3821_v42 = vpop.f32.mrf.mxu0 }
 0x1e7   : > { %v1362_v39 = vpop.permute.xlu0 %1361  ;;  %v1496_v60 = vsel %vm1477_vm4, %v1474_v43, %v798_v2 }
 0x1e8   : > { %v1648_v9 = vsel %vm1631_vm11, %v1626_v19, %v1362_v39 }
 0x1ea   : > { %v1426_v37 = vpop.permute.xlu1 %1425 }
 0x1eb   : > { %v1132_v45 = vpop.permute.xlu0 %1131  ;;  %v1670_v27 = vsel %vm1653_vm12, %v1648_v9, %v1426_v37 }
 0x1ec   : > { %3850 = vmatmul.mubr.msk.f32.gmra.mxu1 %vm1681_vm13, %v1670_v27  ;;  %v1583_v58 = vsel %vm1565_vm8, %v1561_v49, %v1132_v45 }
 0x1ed   : > { %3852 = vmatprep.mubr.msk.f32.mxu1 %vm4106_vm3, %v4098_v0 }
 0x1ee   : > { %v1216_v51 = vpop.permute.xlu1 %1215 }
 0x1ef   : > { %v882_v28 = vpop.permute.xlu0 %881  ;;  %v1605_v11 = vsel %vm1587_vm9, %v1583_v58, %v1216_v51 }
 0x1f0   : > { %v1518_v63 = vsel %vm1499_vm5, %v1496_v60, %v882_v28  ;;  %v439_v60 = vld [vmem:[%s5919_s9 + $0x8] sm:$0xff] }
 0x1f2   : > { %v1300_v29 = vpop.permute.xlu1 %1299 }
 0x1f3   : > { %v966_v54 = vpop.permute.xlu0 %965  ;;  %v1627_v35 = vsel %vm1609_vm10, %v1605_v11, %v1300_v29 }
 0x1f4   : > { %v1540_v8 = vsel %vm1521_vm6, %v1518_v63, %v966_v54  ;;  %v5043_v63 = vld [vmem:[%s5912_s2] ss:$0 sm:$0xff] }
 0x1f6   : > { %v1050_v6 = vpop.permute.xlu1 %1049 }
 0x1f7   : > { %v716_v57 = vpop.permute.xlu0 %715  ;;  %v1562_v44 = vsel %vm1543_vm7, %v1540_v8, %v1050_v6 }
 0x1f8   : > { %v4983_v13 = vpop.f32.mrf.mxu0  ;;  %v1475_v59 = vsel %vm463_vm1, %v4828_v15, %v716_v57 }
 0x1fa   : > { %v800_v34 = vpop.permute.xlu1 %799  ;;  %v3824_v16 = vpop.f32.mrf.mxu0 }
 0x1fb   : > { %v1364_v1 = vpop.permute.xlu0 %1363  ;;  %v1497_v19 = vsel %vm1477_vm4, %v1475_v59, %v800_v34 }
 0x1fc   : > { %v1649_v12 = vsel %vm1631_vm11, %v1627_v35, %v1364_v1 }
 0x1fe   : > { %v1428_v17 = vpop.permute.xlu1 %1427 }
 0x1ff   : > { %v1134_v3 = vpop.permute.xlu0 %1133  ;;  %v1671_v21 = vsel %vm1653_vm12, %v1649_v12, %v1428_v17 }
 0x200   : > { %3853 = vmatmul.mubr.msk.f32.gmra.mxu1 %vm1681_vm13, %v1671_v21  ;;  %v1584_v4 = vsel %vm1565_vm8, %v1562_v44, %v1134_v3 }
 0x201   : > { %3855 = vmatprep.mubr.msk.f32.mxu1 %vm4106_vm3, %v4098_v0 }
 0x202   : > { %v1218_v26 = vpop.permute.xlu1 %1217 }
 0x203   : > { %v884_v23 = vpop.permute.xlu0 %883  ;;  %v1606_v25 = vsel %vm1587_vm9, %v1584_v4, %v1218_v26 }
 0x204   : > { %v1519_v9 = vsel %vm1499_vm5, %v1497_v19, %v884_v23 }
 0x206   : > { %v1302_v40 = vpop.permute.xlu1 %1301 }
 0x207   : > { %v968_v7 = vpop.permute.xlu0 %967  ;;  %v1628_v14 = vsel %vm1609_vm10, %v1606_v25, %v1302_v40 }
 0x208   : > { %v1541_v45 = vsel %vm1521_vm6, %v1519_v9, %v968_v7 }
 0x20a   : > { %v1052_v55 = vpop.permute.xlu1 %1051 }
 0x20b   : > { %v718_v52 = vpop.permute.xlu0 %717  ;;  %v1563_v37 = vsel %vm1543_vm7, %v1541_v45, %v1052_v55 }
 0x20c   : > { %v4999_v5 = vpop.f32.mrf.mxu0  ;;  %v1476_v29 = vsel %vm463_vm1, %v4881_v18, %v718_v52  ;;  %vm2463_vm1 = vcmask 785408  }
 0x20d   : > { %v1856_v9 = vadd.f32 %v5043_v63, %v4999_v5  ;;  %v1841_v5 = vadd.f32 %v5043_v63, %v4960_v46  ;;  %v1826_v46 = vadd.f32 %v5043_v63, %v4833_v36 }
 0x20e   : > { %v802_v62 = vpop.permute.xlu1 %801  ;;  %v3827_v53 = vpop.f32.mrf.mxu0 }
 0x20f   : > { %v1366_v56 = vpop.permute.xlu0 %1365  ;;  %v1498_v30 = vsel %vm1477_vm4, %v1476_v29, %v802_v62  ;;  %vm2667_vm4 = vcmask 687104  }
 0x210   : > { %v1650_v50 = vsel %vm1631_vm11, %v1628_v14, %v1366_v56 }
 0x212   : > { %v1430_v10 = vpop.permute.xlu1 %1429 }
 0x213   : > { %v1136_v61 = vpop.permute.xlu0 %1135  ;;  %v1672_v48 = vsel %vm1653_vm12, %v1650_v50, %v1430_v10 }
 0x214   : > { %3856 = vmatmul.mubr.msk.f32.gmra.mxu1 %vm1681_vm13, %v1672_v48  ;;  %v1585_v51 = vsel %vm1565_vm8, %v1563_v37, %v1136_v61  ;;  %v1851_v37 = vadd.f32 %v5043_v63, %v4983_v13  ;;  %v1836_v13 = vadd.f32 %v5043_v63, %v4937_v32  ;;  %v1821_v32 = vadd.f32 %v5043_v63, %v4803_v20 }
 0x215   : > { %3858 = vmatprep.mubr.msk.f32.mxu1 %vm4106_vm3, %v4098_v0 }
 0x216   : > { %v1220_v2 = vpop.permute.xlu1 %1219 }
 0x217   : > { %v886_v39 = vpop.permute.xlu0 %885  ;;  %v1607_v54 = vsel %vm1587_vm9, %v1585_v51, %v1220_v2  ;;  %v1927_v51 = vmax.f32 %v1856_v9, 0.0  ;;  %v2106_v9 = vld [vmem:[%s5913_s3 + $0x68] sm:$0xff] }
 0x218   : > { %v1520_v47 = vsel %vm1499_vm5, %v1498_v30, %v886_v39  ;;  %v1923_v30 = vmax.f32 %v1836_v13, 0.0  ;;  %v2098_v13 = vld [vmem:[%s5913_s3 + $0x28] sm:$0xff]  ;;  %vm3072_vm5 = vcmask 1041408  }
 0x21a   : > { %v1304_v33 = vpop.permute.xlu1 %1303 }
 0x21b   : > { %v970_v42 = vpop.permute.xlu0 %969  ;;  %v1629_v15 = vsel %vm1609_vm10, %v1607_v54, %v1304_v33  ;;  %v1926_v54 = vmax.f32 %v1851_v37, 0.0  ;;  %v2104_v37 = vld [vmem:[%s5913_s3 + $0x58] sm:$0xff] }
 0x21c   : > { %v1542_v49 = vsel %vm1521_vm6, %v1520_v47, %v970_v42  ;;  %vm3062_vm6 = vcmask 343040  }
 0x21e   : > { %v1368_v28 = vpop.permute.xlu1 %1367 }
 0x21f   : > { %v1054_v27 = vpop.permute.xlu0 %1053  ;;  %v1651_v57 = vsel %vm1631_vm11, %v1629_v15, %v1368_v28  ;;  %v1846_v28 = vadd.f32 %v5043_v63, %v4967_v38  ;;  %v1831_v38 = vadd.f32 %v5043_v63, %v4890_v22  ;;  %v1924_v15 = vmax.f32 %v1841_v5, 0.0  ;;  %v2100_v5 = vld [vmem:[%s5913_s3 + $0x38] sm:$0xff] }
 0x220   : > { %v1564_v1 = vsel %vm1543_vm7, %v1542_v49, %v1054_v27  ;;  %v1816_v22 = vadd.f32 %v5043_v63, %v4758_v41 }
 0x221   : > { %v1925_v29 = vmax.f32 %v1846_v28, 0.0  ;;  %v2102_v28 = vld [vmem:[%s5913_s3 + $0x48] sm:$0xff] }
 0x222   : > { %v1432_v24 = vpop.permute.xlu1 %1431  ;;  %v1919_v36 = vmax.f32 %v1816_v22, 0.0  ;;  %v2118_v22 = vld [vmem:[%s5913_s3 + $0xc8] sm:$0xff] }
 0x223   : > { %v1138_v6 = vpop.permute.xlu0 %1137  ;;  %v1673_v31 = vsel %vm1653_vm12, %v1651_v57, %v1432_v24  ;;  %v1922_v57 = vmax.f32 %v1831_v38, 0.0  ;;  %v1920_v24 = vmax.f32 %v1821_v32, 0.0  ;;  %v2096_v38 = vld [vmem:[%s5913_s3 + $0x18] sm:$0xff] }
 0x224   : > { %3859 = vmatmul.mubr.msk.f32.gmra.mxu1 %vm1681_vm13, %v1673_v31  ;;  %v1860_v34 = vpop.f32.mrf.mxu0  ;;  %v1586_v18 = vsel %vm1565_vm8, %v1564_v1, %v1138_v6  ;;  %v1921_v6 = vmax.f32 %v1826_v46, 0.0  ;;  %v2094_v46 = vld [vmem:[%s5913_s3 + $0x8] sm:$0xff]  ;;  %v2120_v32 = vld [vmem:[%s5913_s3 + $0xd8] sm:$0xff] }
 0x225   : > { %3861 = vmatprep.mubr.msk.f32.mxu1 %vm4106_vm3, %v4098_v0  ;;  %v1861_v33 = vadd.f32 %v5043_v63, %v1860_v34 }
 0x226   : > { %v1306_v16 = vpop.permute.xlu1 %1305  ;;  %v3830_v35 = vpop.f32.mrf.mxu0 }
 0x227   : > { %v1222_v58 = vpop.permute.xlu0 %1221  ;;  %v1928_v27 = vmax.f32 %v1861_v33, 0.0  ;;  %v2108_v33 = vld [vmem:[%s5913_s3 + $0x78] sm:$0xff] }
 0x228   : > { %v1608_v11 = vsel %vm1587_vm9, %v1586_v18, %v1222_v58  ;;  %2537 = vmatpush1.msra.mxu0 %v2108_v33 }
 0x229   : > { %v1630_v12 = vsel %vm1609_vm10, %v1608_v11, %v1306_v16  ;;  %2538 = vmatprep.subr.mxu0 %v4098_v0 }
 0x22a   : > { %v1434_v17 = vpop.permute.xlu1 %1433 }
 0x22b   : > { %v1370_v3 = vpop.permute.xlu0 %1369 }
 0x22c   : > { %v1652_v21 = vsel %vm1631_vm11, %v1630_v12, %v1370_v3 }
 0x22d   : > { %v1674_v23 = vsel %vm1653_vm12, %v1652_v21, %v1434_v17 }
 0x22e   : > { %3862 = vmatmul.mubr.msk.f32.gmra.mxu1 %vm1681_vm13, %v1674_v23 }
 0x22f   : > { %3622 = vmatprep.mubr.msk.f32.mxu1 %vm1653_vm12, %v439_v60  ;;  %v443_v60 = vld [vmem:[%s5919_s9 + $0x28] sm:$0xff] }
 0x244   : > { %v1865_v26 = vpop.f32.mrf.mxu0 }
 0x245   : > { %v1866_v59 = vadd.f32 %v5043_v63, %v1865_v26 }
 0x246   : > { %v3833_v7 = vpop.f32.mrf.mxu0 }
 0x247   : > { %v1929_v45 = vmax.f32 %v1866_v59, 0.0  ;;  %v459_v59 = vld [vmem:[%s5919_s9 + $0xa8] sm:$0xf] }
 0x268   : > { %v1885_v43 = vpop.f32.mrf.mxu1 }
 0x269   : > { %v1870_v40 = vpop.f32.mrf.mxu0  ;;  %v1886_v56 = vadd.f32 %v5043_v63, %v1885_v43  ;;  %v438_v43 = vld [vmem:[%s5919_s9] sm:$0xff] }
 0x26a   : > { %v3845_v55 = vpop.f32.mrf.mxu1  ;;  %v1871_v39 = vadd.f32 %v5043_v63, %v1870_v40 }
 0x26b   : > { %v3836_v52 = vpop.f32.mrf.mxu0  ;;  %v1933_v14 = vmax.f32 %v1886_v56, 0.0  ;;  %v440_v55 = vld [vmem:[%s5919_s9 + $0x10] sm:$0xff]  ;;  %v447_v56 = vld [vmem:[%s5919_s9 + $0x48] sm:$0xff] }
 0x26c   : > { %v1930_v19 = vmax.f32 %v1871_v39, 0.0  ;;  %v441_v52 = vld [vmem:[%s5919_s9 + $0x18] sm:$0xff] }
 0x26d   : > { %v457_v39 = vld [vmem:[%s5919_s9 + $0x98] sm:$0xff] }
 0x280   : > { %v1890_v44 = vpop.f32.mrf.mxu1 }
 0x281   : > { %v1875_v8 = vpop.f32.mrf.mxu0  ;;  %v1891_v62 = vadd.f32 %v5043_v63, %v1890_v44  ;;  %v444_v44 = vld [vmem:[%s5919_s9 + $0x30] sm:$0xff] }
 0x282   : > { %v3848_v53 = vpop.f32.mrf.mxu1  ;;  %v1876_v61 = vadd.f32 %v5043_v63, %v1875_v8  ;;  %v445_v8 = vld [vmem:[%s5919_s9 + $0x38] sm:$0xff] }
 0x283   : > { %v3839_v4 = vpop.f32.mrf.mxu0  ;;  %v1934_v25 = vmax.f32 %v1891_v62, 0.0  ;;  %v446_v62 = vld [vmem:[%s5919_s9 + $0x40] sm:$0xff]  ;;  %v448_v53 = vld [vmem:[%s5919_s9 + $0x50] sm:$0xff] }
 0x284   : > { %v1931_v42 = vmax.f32 %v1876_v61, 0.0  ;;  %v449_v4 = vld [vmem:[%s5919_s9 + $0x58] sm:$0xff]  ;;  %v452_v61 = vld [vmem:[%s5919_s9 + $0x70] sm:$0xff] }
 0x285   : > { %1974 = vmatpush1.msra.mxu1 %v1934_v25  ;;  %v451_v25 = vld [vmem:[%s5919_s9 + $0x68] sm:$0xff] }
 0x286   : > { %1975 = vmatprep.subr.mxu1 %v4098_v0 }
 0x287   : > { %1976 = vmatpush1.msra.mxu1 %v1933_v14  ;;  %v450_v14 = vld [vmem:[%s5919_s9 + $0x60] sm:$0xff] }
 0x288   : > { %1977 = vmatprep.subr.mxu1 %v4098_v0 }
 0x28a   : > { %v1880_v50 = vpop.f32.mrf.mxu0 }
 0x28b   : > { %v1881_v10 = vadd.f32 %v5043_v63, %v1880_v50  ;;  %v453_v50 = vld [vmem:[%s5919_s9 + $0x78] sm:$0xff] }
 0x28c   : > { %v3842_v48 = vpop.f32.mrf.mxu0 }
 0x28d   : > { %v1932_v2 = vmax.f32 %v1881_v10, 0.0  ;;  %v455_v10 = vld [vmem:[%s5919_s9 + $0x88] sm:$0xff]  ;;  %v454_v48 = vld [vmem:[%s5919_s9 + $0x80] sm:$0xff] }
 0x28f   : > { %1978 = vmatpush1.msra.mxu1 %v1932_v2  ;;  %v456_v2 = vld [vmem:[%s5919_s9 + $0x90] sm:$0xff] }
 0x290   : > { %1979 = vmatprep.subr.mxu1 %v4098_v0 }
 0x291   : > { %1980 = vmatpush1.msra.mxu1 %v1931_v42  ;;  %v458_v42 = vld [vmem:[%s5919_s9 + $0xa0] sm:$0xf] }
 0x292   : > { %1981 = vmatprep.subr.mxu1 %v4098_v0 }
 0x293   : > { %1982 = vmatpush1.msra.mxu1 %v1930_v19  ;;  %v2107_v19 = vld [vmem:[%s5913_s3 + $0x70] sm:$0xff] }
 0x294   : > { %1983 = vmatprep.subr.mxu1 %v4098_v0  ;;  %2539 = vmatpush1.msra.mxu0 %v2107_v19 }
 0x295   : > { %1984 = vmatpush1.msra.mxu1 %v1929_v45  ;;  %2540 = vmatprep.subr.mxu0 %v4098_v0  ;;  %v2105_v45 = vld [vmem:[%s5913_s3 + $0x60] sm:$0xff] }
 0x296   : > { %1985 = vmatprep.subr.mxu1 %v4098_v0  ;;  %2541 = vmatpush1.msra.mxu0 %v2106_v9 }
 0x297   : > { %1986 = vmatpush1.msra.mxu1 %v1928_v27  ;;  %2542 = vmatprep.subr.mxu0 %v4098_v0  ;;  %v2103_v27 = vld [vmem:[%s5913_s3 + $0x50] sm:$0xff] }
 0x298   : > { %1987 = vmatprep.subr.mxu1 %v4098_v0  ;;  %2543 = vmatpush1.msra.mxu0 %v2105_v45 }
 0x299   : > { %1988 = vmatpush1.msra.mxu1 %v1927_v51  ;;  %2544 = vmatprep.subr.mxu0 %v4098_v0  ;;  %v2101_v51 = vld [vmem:[%s5913_s3 + $0x40] sm:$0xff] }
 0x29a   : > { %1989 = vmatprep.subr.mxu1 %v4098_v0  ;;  %2545 = vmatpush1.msra.mxu0 %v2104_v37 }
 0x29b   : > { %1990 = vmatpush1.msra.mxu1 %v1926_v54  ;;  %2546 = vmatprep.subr.mxu0 %v4098_v0  ;;  %v2099_v54 = vld [vmem:[%s5913_s3 + $0x30] sm:$0xff] }
 0x29c   : > { %1991 = vmatprep.subr.mxu1 %v4098_v0  ;;  %2547 = vmatpush1.msra.mxu0 %v2103_v27 }
 0x29d   : > { %1992 = vmatpush1.msra.mxu1 %v1925_v29  ;;  %2548 = vmatprep.subr.mxu0 %v4098_v0  ;;  %v2097_v29 = vld [vmem:[%s5913_s3 + $0x20] sm:$0xff] }
 0x29e   : > { %1993 = vmatprep.subr.mxu1 %v4098_v0  ;;  %2549 = vmatpush1.msra.mxu0 %v2102_v28 }
 0x29f   : > { %1994 = vmatpush1.msra.mxu1 %v1924_v15  ;;  %2550 = vmatprep.subr.mxu0 %v4098_v0  ;;  %v2095_v15 = vld [vmem:[%s5913_s3 + $0x10] sm:$0xff] }
 0x2a0   : > { %1995 = vmatprep.subr.mxu1 %v4098_v0  ;;  %2551 = vmatpush1.msra.mxu0 %v2101_v51 }
 0x2a1   : > { %1996 = vmatpush1.msra.mxu1 %v1923_v30  ;;  %2552 = vmatprep.subr.mxu0 %v4098_v0  ;;  %v2093_v30 = vld [vmem:[%s5913_s3] sm:$0xff] }
 0x2a2   : > { %1997 = vmatprep.subr.mxu1 %v4098_v0  ;;  %2553 = vmatpush1.msra.mxu0 %v2100_v5 }
 0x2a3   : > { %1998 = vmatpush1.msra.mxu1 %v1922_v57  ;;  %2554 = vmatprep.subr.mxu0 %v4098_v0  ;;  %v2119_v57 = vld [vmem:[%s5913_s3 + $0xd0] sm:$0xff] }
 0x2a4   : > { %1999 = vmatprep.subr.mxu1 %v4098_v0  ;;  %2555 = vmatpush1.msra.mxu0 %v2099_v54 }
 0x2a5   : > { %2000 = vmatpush1.msra.mxu1 %v1921_v6  ;;  %2556 = vmatprep.subr.mxu0 %v4098_v0  ;;  %v2117_v6 = vld [vmem:[%s5913_s3 + $0xc0] sm:$0xff] }
 0x2a6   : > { %2001 = vmatprep.subr.mxu1 %v4098_v0  ;;  %2557 = vmatpush1.msra.mxu0 %v2098_v13 }
 0x2a7   : > { %2002 = vmatpush1.msra.mxu1 %v1920_v24  ;;  %2558 = vmatprep.subr.mxu0 %v4098_v0  ;;  %v2116_v24 = vld [vmem:[%s5913_s3 + $0xb8] sm:$0xff] }
 0x2a8   : > { %2003 = vmatprep.subr.mxu1 %v4098_v0  ;;  %2559 = vmatpush1.msra.mxu0 %v2097_v29 }
 0x2a9   : > { %2004 = vmatpush1.msra.mxu1 %v1919_v36  ;;  %2560 = vmatprep.subr.mxu0 %v4098_v0 }
 0x2aa   : > { %2027 = vmatprep.subr.mxu1 %v4098_v0  ;;  %2561 = vmatpush1.msra.mxu0 %v2096_v38 }
 0x2ab   : > { %2562 = vmatprep.subr.mxu0 %v4098_v0 }
 0x2ac   : > { %v1895_v20 = vpop.f32.mrf.mxu1  ;;  %2563 = vmatpush1.msra.mxu0 %v2095_v15 }
 0x2ad   : > { %v1896_v23 = vadd.f32 %v5043_v63, %v1895_v20  ;;  %2564 = vmatprep.subr.mxu0 %v4098_v0  ;;  %v2115_v20 = vld [vmem:[%s5913_s3 + $0xb0] sm:$0xff] }
 0x2ae   : > { %v3851_v47 = vpop.f32.mrf.mxu1  ;;  %2565 = vmatpush1.msra.mxu0 %v2094_v46 }
 0x2af   : > { %v1935_v40 = vmax.f32 %v1896_v23, 0.0  ;;  %2566 = vmatprep.subr.mxu0 %v4098_v0 }
 0x2b0   : > { %2567 = vmatpush1.msra.mxu0 %v2093_v30 }
 0x2b1   : > { %2576 = vmatprep.subr.mxu0 %v4098_v0 }
 0x2b2   : > { %2577 = vmatpush2.msra.mxu0 %v2120_v32 }
 0x2b3   : > { %2578 = vmatprep.subr.mxu0 %v4098_v0 }
 0x2b4   : > { %2579 = vmatpush2.msra.mxu0 %v2119_v57 }
 0x2b5   : > { %2580 = vmatprep.subr.mxu0 %v4098_v0 }
 0x2b6   : > { %2581 = vmatpush2.msra.mxu0 %v2118_v22 }
 0x2b7   : > { %2582 = vmatprep.subr.mxu0 %v4098_v0 }
 0x2b8   : > { %2583 = vmatpush2.msra.mxu0 %v2117_v6 }
 0x2b9   : > { %2584 = vmatprep.subr.mxu0 %v4098_v0 }
 0x2ba   : > { %2585 = vmatpush2.msra.mxu0 %v2116_v24 }
 0x2bb   : > { %2586 = vmatprep.subr.mxu0 %v4098_v0 }
 0x2bc   : > { %2587 = vmatpush2.msra.mxu0 %v2115_v20 }
 0x2bd   : > { %2588 = vmatprep.subr.mxu0 %v4098_v0 }
 0x2c0   : > { %v1900_v31 = vpop.f32.mrf.mxu1 }
 0x2c1   : > { %v1901_v17 = vadd.f32 %v5043_v63, %v1900_v31  ;;  %v2114_v31 = vld [vmem:[%s5913_s3 + $0xa8] sm:$0xff] }
 0x2c2   : > { %v3854_v49 = vpop.f32.mrf.mxu1  ;;  %2589 = vmatpush2.msra.mxu0 %v2114_v31 }
 0x2c3   : > { %v1936_v7 = vmax.f32 %v1901_v17, 0.0  ;;  %2590 = vmatprep.subr.mxu0 %v4098_v0 }
 0x2d4   : > { %v1905_v41 = vpop.f32.mrf.mxu1 }
 0x2d5   : > { %v1906_v12 = vadd.f32 %v5043_v63, %v1905_v41  ;;  %v2113_v41 = vld [vmem:[%s5913_s3 + $0xa0] sm:$0xff] }
 0x2d6   : > { %v3857_v1 = vpop.f32.mrf.mxu1  ;;  %2591 = vmatpush2.msra.mxu0 %v2113_v41 }
 0x2d7   : > { %v1937_v26 = vmax.f32 %v1906_v12, 0.0  ;;  %2592 = vmatprep.subr.mxu0 %v4098_v0 }
 0x2e4   : > { %v1910_v34 = vpop.f32.mrf.mxu1 }
 0x2e5   : > { %v1911_v16 = vadd.f32 %v5043_v63, %v1910_v34  ;;  %v2112_v34 = vld [vmem:[%s5913_s3 + $0x98] sm:$0xff] }
 0x2e6   : > { %v3860_v18 = vpop.f32.mrf.mxu1  ;;  %2593 = vmatpush2.msra.mxu0 %v2112_v34 }
 0x2e7   : > { %v1938_v21 = vmax.f32 %v1911_v16, 0.0  ;;  %2594 = vmatprep.subr.mxu0 %v4098_v0 }
 0x2ee   : > { %v1915_v58 = vpop.f32.mrf.mxu1 }
 0x2ef   : > { %v1916_v11 = vadd.f32 %v5043_v63, %v1915_v58  ;;  %v442_v63 = vld [vmem:[%s5919_s9 + $0x20] sm:$0xff]  ;;  %v2111_v58 = vld [vmem:[%s5913_s3 + $0x90] sm:$0xff] }
 0x2f0   : > { %v3863_v35 = vpop.f32.mrf.mxu1  ;;  %2595 = vmatpush2.msra.mxu0 %v2111_v58 }
 0x2f1   : > { %v1939_v3 = vmax.f32 %v1916_v11, 0.0  ;;  %v2110_v11 = vld [vmem:[%s5913_s3 + $0x88] sm:$0xff]  ;;  %2596 = vmatprep.subr.mxu0 %v4098_v0 }
 0x2f2   : > { %2597 = vmatpush2.msra.mxu0 %v2110_v11 }
 0x2f3   : > { %2028 = vmatpush2.msra.mxu1 %v1939_v3  ;;  %2598 = vmatprep.subr.mxu0 %v4098_v0 }
 0x2f4   : > { %2029 = vmatprep.subr.mxu1 %v4098_v0 }
 0x2f5   : > { %2030 = vmatpush2.msra.mxu1 %v1938_v21 }
 0x2f6   : > { %2031 = vmatprep.subr.mxu1 %v4098_v0 }
 0x2f7   : > { %2032 = vmatpush2.msra.mxu1 %v1937_v26 }
 0x2f8   : > { %2033 = vmatprep.subr.mxu1 %v4098_v0 }
 0x2f9   : > { %2034 = vmatpush2.msra.mxu1 %v1936_v7  ;;  %v2109_v7 = vld [vmem:[%s5913_s3 + $0x80] sm:$0xff] }
 0x2fa   : > { %2035 = vmatprep.subr.mxu1 %v4098_v0  ;;  %2599 = vmatpush2.msra.mxu0 %v2109_v7 }
 0x2fb   : > { %2036 = vmatpush2.msra.mxu1 %v1935_v40 }
 0x2fc   : > { %2038 = vmatmul.mubr.f32.vlgmr.msra.gmra.mxu1 %v438_v43  ;;  %2961 = vmatprep.subr.mxu1 %v4098_v0 }
 0x2fd   : > { %3623 = vmatprep.mubr.msk.f32.mxu1 %vm1653_vm12, %v441_v52 }
 0x300   : > { %2043 = vmatmul.mubr.f32.gmra.mxu1 %v440_v55 }
 0x301   : > { %3624 = vmatprep.mubr.msk.f32.mxu1 %vm1653_vm12, %v443_v60 }
 0x304   : > { %2048 = vmatmul.mubr.f32.gmra.mxu1 %v442_v63 }
 0x305   : > { %3625 = vmatprep.mubr.msk.f32.mxu1 %vm1653_vm12, %v445_v8 }
 0x308   : > { %2053 = vmatmul.mubr.f32.gmra.mxu1 %v444_v44 }
 0x309   : > { %3626 = vmatprep.mubr.msk.f32.mxu1 %vm1653_vm12, %v447_v56 }
 0x30c   : > { %2058 = vmatmul.mubr.f32.gmra.mxu1 %v446_v62 }
 0x30d   : > { %3627 = vmatprep.mubr.msk.f32.mxu1 %vm1653_vm12, %v449_v4 }
 0x310   : > { %2063 = vmatmul.mubr.f32.gmra.mxu1 %v448_v53 }
 0x311   : > { %3628 = vmatprep.mubr.msk.f32.mxu1 %vm1653_vm12, %v451_v25 }
 0x314   : > { %2068 = vmatmul.mubr.f32.gmra.mxu1 %v450_v14 }
 0x315   : > { %3629 = vmatprep.mubr.msk.f32.mxu1 %vm1653_vm12, %v453_v50 }
 0x318   : > { %2073 = vmatmul.mubr.f32.gmra.mxu1 %v452_v61 }
 0x319   : > { %3630 = vmatprep.mubr.msk.f32.mxu1 %vm1653_vm12, %v455_v10 }
 0x31c   : > { %2078 = vmatmul.mubr.f32.gmra.mxu1 %v454_v48 }
 0x31d   : > { %3631 = vmatprep.mubr.msk.f32.mxu1 %vm1653_vm12, %v457_v39 }
 0x320   : > { %2083 = vmatmul.mubr.f32.gmra.mxu1 %v456_v2 }
 0x321   : > { %3632 = vmatprep.mubr.msk.f32.mxu1 %vm1653_vm12, %v459_v59 }
 0x324   : > { %2088 = vmatmul.mubr.f32.gmra.mxu1 %v458_v42 }
 0x3bc   : > { %v2039_v36 = vpop.f32.mrf.mxu1 }
 0x3bd   : > { %2131 = vst.msk [vmem:[#allocation3 + $0x8] sm:$0xff] %vm1609_vm10, %v2039_v36 }
 0x3be   : > { %v2041_v47 = vpop.f32.mrf.mxu1 }
 0x3c0   : > { %v2044_v49 = vpop.f32.mrf.mxu1 }
 0x3c1   : > { %2132 = vst.msk [vmem:[#allocation3 + $0x10] sm:$0xff] %vm1609_vm10, %v2044_v49 }
 0x3c2   : > { %v2046_v1 = vpop.f32.mrf.mxu1 }
 0x3c4   : > { %v2049_v18 = vpop.f32.mrf.mxu1  ;;  %v2154_v3 = vld [vmem:[#allocation3 + $0x6] sm:$0xff] }
 0x3c5   : > { %2133 = vst.msk [vmem:[#allocation3 + $0x18] sm:$0xff] %vm1609_vm10, %v2049_v18  ;;  %v2165_v52 = vld [vmem:[#allocation3 + $0x7] sm:$0xff] }
 0x3c6   : > { %v2051_v16 = vpop.f32.mrf.mxu1  ;;  %v2176_v56 = vld [vmem:[#allocation3 + $0x8] sm:$0xff] }
 0x3c8   : > { %v2054_v35 = vpop.f32.mrf.mxu1  ;;  %v2198_v12 = vld [vmem:[#allocation3 + $0xa] sm:$0xff] }
 0x3c9   : > { %v2155_v17 = vld [vmem:[#allocation3 + $0xe] sm:$0xff]  ;;  %2134 = vst.msk [vmem:[#allocation3 + $0x20] sm:$0xff] %vm1609_vm10, %v2054_v35  ;;  %2363 = vrot.lane.b32.xlu1 %v2198_v12, %s4107_s20 }
 0x3ca   : > { %v3951_v21 = vpack.i.bf16 %v2155_v17, %v2154_v3  ;;  %v2056_v23 = vpop.f32.mrf.mxu1  ;;  %v2166_v26 = vld [vmem:[#allocation3 + $0xf] sm:$0xff] }
 0x3cb   : > { %v2209_v43 = vld [vmem:[#allocation3 + $0xb] sm:$0xff]  ;;  %v3956_v55 = vpack.i.bf16 %v2166_v26, %v2165_v52 }
 0x3cc   : > { %3952 = vrot.lane.b32.xlu0 %v3951_v21, %s4107_s20  ;;  %v2059_v40 = vpop.f32.mrf.mxu1  ;;  %v2177_v63 = vld [vmem:[#allocation3 + $0x10] sm:$0xff]  ;;  %v2178_v42 = vld [vmem:[#allocation3 + $0x18] sm:$0xff] }
 0x3cd   : > { %2135 = vst.msk [vmem:[#allocation3 + $0x28] sm:$0xff] %vm1609_vm10, %v2059_v40  ;;  %2407 = vrot.lane.b32.xlu1 %v2209_v43, %s4110_s23  ;;  %v2199_v44 = vld [vmem:[#allocation3 + $0x12] sm:$0xff]  ;;  %v3961_v4 = vpack.i.bf16 %v2177_v63, %v2176_v56 }
 0x3ce   : > { %v2061_v60 = vpop.f32.mrf.mxu1  ;;  %v2156_v53 = vld [vmem:[#allocation3 + $0x16] sm:$0xff] }
 0x3cf   : > { %v2210_v10 = vld [vmem:[#allocation3 + $0x13] sm:$0xff] }
 0x3d0   : > { %3957 = vrot.lane.b32.xlu0 %v3956_v55, %s4110_s23  ;;  %v2064_v8 = vpop.f32.mrf.mxu1  ;;  %v2157_v62 = vld [vmem:[#allocation3 + $0x1e] sm:$0xff] }
 0x3d1   : > { %2136 = vst.msk [vmem:[#allocation3 + $0x30] sm:$0xff] %vm1609_vm10, %v2064_v8  ;;  %2365 = vrot.lane.b32.xlu1 %v2199_v44, %s4107_s20  ;;  %v3966_v14 = vpack.i.bf16 %v2157_v62, %v2156_v53  ;;  %v2168_v61 = vld [vmem:[#allocation3 + $0x1f] sm:$0xff]  ;;  %v2167_v48 = vld [vmem:[#allocation3 + $0x17] sm:$0xff] }
 0x3d2   : > { %v2066_v25 = vpop.f32.mrf.mxu1  ;;  %v3971_v2 = vpack.i.bf16 %v2168_v61, %v2167_v48  ;;  %v2179_v33 = vld [vmem:[#allocation3 + $0x20] sm:$0xff] }
 0x3d3   : > { %v2200_v19 = vld [vmem:[#allocation3 + $0x1a] sm:$0xff]  ;;  %v3976_v45 = vpack.i.bf16 %v2179_v33, %v2178_v42 }
 0x3d4   : > { %3962 = vrot.lane.b32.xlu0 %v3961_v4, %s4111_s24  ;;  %v2069_v50 = vpop.f32.mrf.mxu1  ;;  %v2211_v27 = vld [vmem:[#allocation3 + $0x1b] sm:$0xff]  ;;  %v2212_v51 = vld [vmem:[#allocation3 + $0x23] sm:$0xff] }
 0x3d5   : > { %3967 = vrot.lane.b32.xlu1 %v3966_v14, %s4107_s20  ;;  %2137 = vst.msk [vmem:[#allocation3 + $0x38] sm:$0xff] %vm1609_vm10, %v2069_v50  ;;  %v2201_v54 = vld [vmem:[#allocation3 + $0x22] sm:$0xff] }
 0x3d6   : > { %v2071_v39 = vpop.f32.mrf.mxu1  ;;  %v2158_v15 = vld [vmem:[#allocation3 + $0x26] sm:$0xff] }
 0x3d7   : > { %v2169_v6 = vld [vmem:[#allocation3 + $0x27] sm:$0xff] }
 0x3d8   : > { %2409 = vrot.lane.b32.xlu0 %v2210_v10, %s4110_s23  ;;  %v2074_v59 = vpop.f32.mrf.mxu1  ;;  %v2159_v13 = vld [vmem:[#allocation3 + $0x2e] sm:$0xff] }
 0x3d9   : > { %3972 = vrot.lane.b32.xlu1 %v3971_v2, %s4110_s23  ;;  %2138 = vst.msk [vmem:[#allocation3 + $0x40] sm:$0xff] %vm1609_vm10, %v2074_v59  ;;  %v2202_v38 = vld [vmem:[#allocation3 + $0x2a] sm:$0xff]  ;;  %v3981_v30 = vpack.i.bf16 %v2159_v13, %v2158_v15 }
 0x3da   : > { %v2076_v9 = vpop.f32.mrf.mxu1  ;;  %v2170_v32 = vld [vmem:[#allocation3 + $0x2f] sm:$0xff] }
 0x3db   : > { %v2213_v22 = vld [vmem:[#allocation3 + $0x2b] sm:$0xff]  ;;  %v3986_v24 = vpack.i.bf16 %v2170_v32, %v2169_v6 }
 0x3dc   : > { %2367 = vrot.lane.b32.xlu0 %v2200_v19, %s4107_s20  ;;  %v2079_v37 = vpop.f32.mrf.mxu1  ;;  %v2180_v36 = vld [vmem:[#allocation3 + $0x28] sm:$0xff]  ;;  %v2181_v20 = vld [vmem:[#allocation3 + $0x30] sm:$0xff]  ;;  %v2182_v11 = vld [vmem:[#allocation3 + $0x38] sm:$0xff] }
 0x3dd   : > { %3977 = vrot.lane.b32.xlu1 %v3976_v45, %s4111_s24  ;;  %2139 = vst.msk [vmem:[#allocation3 + $0x48] sm:$0xff] %vm1609_vm10, %v2079_v37  ;;  %v2203_v47 = vld [vmem:[#allocation3 + $0x32] sm:$0xff]  ;;  %v3991_v41 = vpack.i.bf16 %v2181_v20, %v2180_v36  ;;  %v2187_v39 = vld [vmem:[#allocation3 + $0x9] sm:$0xff] }
 0x3de   : > { %v2081_v28 = vpop.f32.mrf.mxu1  ;;  %v2160_v31 = vld [vmem:[#allocation3 + $0x36] sm:$0xff]  ;;  %v2143_v37 = vld [vmem:[#allocation3 + $0x5] sm:$0xff] }
 0x3df   : > { %v2171_v34 = vld [vmem:[#allocation3 + $0x37] sm:$0xff] }
 0x3e0   : > { %2411 = vrot.lane.b32.xlu0 %v2211_v27, %s4110_s23  ;;  %v2084_v5 = vpop.f32.mrf.mxu1  ;;  %v2161_v49 = vld [vmem:[#allocation3 + $0x3e] sm:$0xff]  ;;  %v2214_v58 = vld [vmem:[#allocation3 + $0x33] sm:$0xff] }
 0x3e1   : > { %2413 = vrot.lane.b32.xlu1 %v2212_v51, %s4110_s23  ;;  %2140 = vst.msk [vmem:[#allocation3 + $0x50] sm:$0xff] %vm1609_vm10, %v2084_v5  ;;  %v3996_v1 = vpack.i.bf16 %v2161_v49, %v2160_v31  ;;  %v2172_v18 = vld [vmem:[#allocation3 + $0x3f] sm:$0xff] }
 0x3e2   : > { %v2086_v29 = vpop.f32.mrf.mxu1  ;;  %v4001_v16 = vpack.i.bf16 %v2172_v18, %v2171_v34  ;;  %v2183_v35 = vld [vmem:[#allocation3 + $0x40] sm:$0xff] }
 0x3e3   : > { %v2204_v12 = vld [vmem:[#allocation3 + $0x3a] sm:$0xff]  ;;  %v4006_v3 = vpack.i.bf16 %v2183_v35, %v2182_v11 }
 0x3e4   : > { %2369 = vrot.lane.b32.xlu0 %v2201_v54, %s4107_s20  ;;  %v2089_v46 = vpop.f32.mrf.mxu1  ;;  %v2215_v17 = vld [vmem:[#allocation3 + $0x3b] sm:$0xff]  ;;  %v2216_v21 = vld [vmem:[#allocation3 + $0x43] sm:$0xff] }
 0x3e5   : > { %2371 = vrot.lane.b32.xlu1 %v2202_v38, %s4107_s20  ;;  %2142 = vst.msk [vmem:[#allocation3 + $0x58] sm:$0xf] %vm2141_vm15, %v2089_v46  ;;  %v2205_v23 = vld [vmem:[#allocation3 + $0x42] sm:$0xff]  ;;  %v2188_v38 = vld [vmem:[#allocation3 + $0x11] sm:$0xff]  ;;  %v2189_v34 = vld [vmem:[#allocation3 + $0x19] sm:$0xff] }
 0x3e6   : > { %v2091_v57 = vpop.f32.mrf.mxu1  ;;  %v2162_v26 = vld [vmem:[#allocation3 + $0x46] sm:$0xff] }
 0x3e7   : > { %v2173_v52 = vld [vmem:[#allocation3 + $0x47] sm:$0xff] }
 0x3e8   : > { %3982 = vrot.lane.b32.xlu0 %v3981_v30, %s4107_s20  ;;  %v2163_v7 = vld [vmem:[#allocation3 + $0x4e] sm:$0xff] }
 0x3e9   : > { %2415 = vrot.lane.b32.xlu1 %v2213_v22, %s4110_s23  ;;  %v2206_v40 = vld [vmem:[#allocation3 + $0x4a] sm:$0xff]  ;;  %v4011_v43 = vpack.i.bf16 %v2163_v7, %v2162_v26 }
 0x3ea   : > { %v2174_v55 = vld [vmem:[#allocation3 + $0x4f] sm:$0xff] }
 0x3eb   : > { %v2217_v60 = vld [vmem:[#allocation3 + $0x4b] sm:$0xff]  ;;  %v4016_v63 = vpack.i.bf16 %v2174_v55, %v2173_v52 }
 0x3ec   : > { %3987 = vrot.lane.b32.xlu0 %v3986_v24, %s4110_s23  ;;  %v2184_v8 = vld [vmem:[#allocation3 + $0x48] sm:$0xff]  ;;  %v2185_v44 = vld [vmem:[#allocation3 + $0x50] sm:$0xff]  ;;  %v2208_v14 = vld [vmem:[#allocation3 + $0x5a] sm:$0xf] }
 0x3ed   : > { %2373 = vrot.lane.b32.xlu1 %v2203_v47, %s4107_s20  ;;  %v2207_v56 = vld [vmem:[#allocation3 + $0x52] sm:$0xff]  ;;  %v4021_v62 = vpack.i.bf16 %v2185_v44, %v2184_v8  ;;  %v2219_v61 = vld [vmem:[#allocation3 + $0x5b] sm:$0xf] }
 0x3ee   : > { %v2164_v4 = vld [vmem:[#allocation3 + $0x56] sm:$0xf]  ;;  %v2144_v57 = vld [vmem:[#allocation3 + $0xd] sm:$0xff] }
 0x3ef   : > { %v2218_v53 = vld [vmem:[#allocation3 + $0x53] sm:$0xff] }
 0x3f0   : > { %3992 = vrot.lane.b32.xlu0 %v3991_v41, %s4111_s24  ;;  %v2175_v25 = vld [vmem:[#allocation3 + $0x57] sm:$0xf] }
 0x3f1   : > { %3997 = vrot.lane.b32.xlu1 %v3996_v1, %s4107_s20  ;;  %v2186_v50 = vld [vmem:[#allocation3 + $0x58] sm:$0xf] }
 0x3f2   : > { %v2145_v1 = vld [vmem:[#allocation3 + $0x15] sm:$0xff] }
 0x3f4   : > { %2417 = vrot.lane.b32.xlu0 %v2214_v58, %s4110_s23 }
 0x3f5   : > { %4002 = vrot.lane.b32.xlu1 %v4001_v16, %s4110_s23 }
 0x3f8   : > { %2375 = vrot.lane.b32.xlu0 %v2204_v12, %s4107_s20 }
 0x3f9   : > { %4007 = vrot.lane.b32.xlu1 %v4006_v3, %s4111_s24 }
 0x3fc   : > { %2419 = vrot.lane.b32.xlu0 %v2215_v17, %s4110_s23 }
 0x3fd   : > { %2421 = vrot.lane.b32.xlu1 %v2216_v21, %s4110_s23 }
 0x400   : > { %2377 = vrot.lane.b32.xlu0 %v2205_v23, %s4107_s20 }
 0x401   : > { %2379 = vrot.lane.b32.xlu1 %v2206_v40, %s4107_s20  ;;  %v2190_v40 = vld [vmem:[#allocation3 + $0x21] sm:$0xff] }
 0x404   : > { %4012 = vrot.lane.b32.xlu0 %v4011_v43, %s4107_s20  ;;  %v2146_v43 = vld [vmem:[#allocation3 + $0x1d] sm:$0xff] }
 0x405   : > { %2423 = vrot.lane.b32.xlu1 %v2217_v60, %s4110_s23 }
 0x408   : > { %4017 = vrot.lane.b32.xlu0 %v4016_v63, %s4110_s23 }
 0x409   : > { %2381 = vrot.lane.b32.xlu1 %v2207_v56, %s4107_s20 }
 0x40c   : > { %4022 = vrot.lane.b32.xlu0 %v4021_v62, %s4111_s24  ;;  %v2191_v62 = vld [vmem:[#allocation3 + $0x29] sm:$0xff] }
 0x40d   : > { %2251 = vrot.lane.b32.xlu1 %v2164_v4, %s4107_s20 }
 0x410   : > { %2425 = vrot.lane.b32.xlu0 %v2218_v53, %s4110_s23 }
 0x411   : > { %2295 = vrot.lane.b32.xlu1 %v2175_v25, %s4110_s23 }
 0x414   : > { %2383 = vrot.lane.b32.xlu0 %v2208_v14, %s4107_s20 }
 0x415   : > { %2339 = vrot.lane.b32.xlu1 %v2186_v50, %s4111_s24 }
 0x418   : > { %2427 = vrot.lane.b32.xlu0 %v2219_v61, %s4110_s23 }
 0x43b   : > { %v2364_v10 = vpop.permute.xlu1 %2363 }
 0x43c   : > { %v2475_v2 = vsel %vm1609_vm10, %v2187_v39, %v2364_v10  ;;  %v2147_v39 = vld [vmem:[#allocation3 + $0x25] sm:$0xff] }
 0x43e   : > { %v3953_v48 = vpop.permute.xlu0 %3952 }
 0x43f   : > { %v2408_v59 = vpop.permute.xlu1 %2407  ;;  %v3954_v19 = vunpack.i.l.bf16 %v3953_v48  ;;  %v3955_v28 = vunpack.i.h.bf16 %v3953_v48 }
 0x440   : > { %v2486_v42 = vsel %vm2451_vm0, %v2475_v2, %v2408_v59 }
 0x441   : > { %3634 = vmatprep.mubr.msk.f32.mxu0 %vm2463_vm1, %v2486_v42  ;;  %v2440_v51 = vsel %vm1609_vm10, %v2143_v37, %v3954_v19  ;;  %v2441_v6 = vsel %vm1609_vm10, %v2144_v57, %v3955_v28 }
 0x442   : > { %v3958_v33 = vpop.permute.xlu0 %3957 }
 0x443   : > { %v3959_v9 = vunpack.i.l.bf16 %v3958_v33  ;;  %v2366_v45 = vpop.permute.xlu1 %2365  ;;  %v3960_v54 = vunpack.i.h.bf16 %v3958_v33 }
 0x444   : > { %v2476_v30 = vsel %vm1609_vm10, %v2188_v38, %v2366_v45  ;;  %v2192_v45 = vld [vmem:[#allocation3 + $0x31] sm:$0xff] }
 0x445   : > { %v2452_v13 = vsel %vm2451_vm0, %v2440_v51, %v3959_v9  ;;  %v2453_v36 = vsel %vm2451_vm0, %v2441_v6, %v3960_v54  ;;  %v2193_v6 = vld [vmem:[#allocation3 + $0x39] sm:$0xff] }
 0x446   : > { %v3963_v27 = vpop.permute.xlu0 %3962 }
 0x447   : > { %v3964_v5 = vunpack.i.l.bf16 %v3963_v27  ;;  %v3968_v29 = vpop.permute.xlu1 %3967  ;;  %v3965_v15 = vunpack.i.h.bf16 %v3963_v27 }
 0x448   : > { %v3969_v20 = vunpack.i.l.bf16 %v3968_v29  ;;  %v3970_v12 = vunpack.i.h.bf16 %v3968_v29 }
 0x449   : > { %v2464_v46 = vsel %vm2463_vm1, %v2452_v13, %v3964_v5  ;;  %v2465_v47 = vsel %vm2463_vm1, %v2453_v36, %v3965_v15  ;;  %v2148_v5 = vld [vmem:[#allocation3 + $0x2d] sm:$0xff] }
 0x44a   : > { %2601 = vmatmul.mubr.f32.vlgmr.msra.gmra.mxu0 %v2464_v46  ;;  %v2410_v32 = vpop.permute.xlu0 %2409  ;;  %v2442_v58 = vsel %vm1609_vm10, %v2145_v1, %v3969_v20  ;;  %v2443_v55 = vsel %vm1609_vm10, %v2146_v43, %v3970_v12 }
 0x44b   : > { %v2487_v22 = vsel %vm2451_vm0, %v2476_v30, %v2410_v32  ;;  %v3973_v24 = vpop.permute.xlu1 %3972 }
 0x44c   : > { %3635 = vmatprep.mubr.msk.f32.mxu0 %vm2463_vm1, %v2487_v22  ;;  %v3974_v31 = vunpack.i.l.bf16 %v3973_v24  ;;  %v3975_v21 = vunpack.i.h.bf16 %v3973_v24  ;;  %v2149_v22 = vld [vmem:[#allocation3 + $0x35] sm:$0xff] }
 0x44e   : > { %2606 = vmatmul.mubr.f32.gmra.mxu0 %v2465_v47  ;;  %v2368_v49 = vpop.permute.xlu0 %2367  ;;  %v2454_v35 = vsel %vm2451_vm0, %v2442_v58, %v3974_v31  ;;  %v2455_v8 = vsel %vm2451_vm0, %v2443_v55, %v3975_v21 }
 0x44f   : > { %v3978_v41 = vpop.permute.xlu1 %3977  ;;  %v2477_v16 = vsel %vm1609_vm10, %v2189_v34, %v2368_v49 }
 0x450   : > { %v3979_v18 = vunpack.i.l.bf16 %v3978_v41  ;;  %v3980_v26 = vunpack.i.h.bf16 %v3978_v41 }
 0x452   : > { %v2412_v11 = vpop.permute.xlu0 %2411  ;;  %v2466_v17 = vsel %vm2463_vm1, %v2454_v35, %v3979_v18  ;;  %v2467_v44 = vsel %vm2463_vm1, %v2455_v8, %v3980_v26  ;;  %v2150_v35 = vld [vmem:[#allocation3 + $0x3d] sm:$0xff] }
 0x453   : > { %v2488_v3 = vsel %vm2451_vm0, %v2477_v16, %v2412_v11  ;;  %v2414_v23 = vpop.permute.xlu1 %2413  ;;  %v2194_v11 = vld [vmem:[#allocation3 + $0x41] sm:$0xff] }
 0x454   : > { %3636 = vmatprep.mubr.msk.f32.mxu0 %vm2463_vm1, %v2488_v3 }
 0x455   : > { %2611 = vmatmul.mubr.f32.gmra.mxu0 %v2466_v17 }
 0x456   : > { %v2370_v7 = vpop.permute.xlu0 %2369 }
 0x457   : > { %v2478_v52 = vsel %vm1609_vm10, %v2190_v40, %v2370_v7  ;;  %v2372_v60 = vpop.permute.xlu1 %2371  ;;  %v2195_v40 = vld [vmem:[#allocation3 + $0x49] sm:$0xff] }
 0x458   : > { %v2489_v63 = vsel %vm2451_vm0, %v2478_v52, %v2414_v23  ;;  %v2479_v4 = vsel %vm1609_vm10, %v2191_v62, %v2372_v60  ;;  %v2151_v62 = vld [vmem:[#allocation3 + $0x45] sm:$0xff] }
 0x459   : > { %3637 = vmatprep.mubr.msk.f32.mxu0 %vm2463_vm1, %v2489_v63 }
 0x45a   : > { %2616 = vmatmul.mubr.f32.gmra.mxu0 %v2467_v44  ;;  %v3983_v56 = vpop.permute.xlu0 %3982 }
 0x45b   : > { %v2416_v53 = vpop.permute.xlu1 %2415  ;;  %v3984_v50 = vunpack.i.l.bf16 %v3983_v56  ;;  %v3985_v2 = vunpack.i.h.bf16 %v3983_v56 }
 0x45c   : > { %v2490_v25 = vsel %vm2451_vm0, %v2479_v4, %v2416_v53 }
 0x45d   : > { %3638 = vmatprep.mubr.msk.f32.mxu0 %vm2463_vm1, %v2490_v25  ;;  %v2444_v42 = vsel %vm1609_vm10, %v2147_v39, %v3984_v50  ;;  %v2445_v13 = vsel %vm1609_vm10, %v2148_v5, %v3985_v2 }
 0x45e   : > { %v3988_v14 = vpop.permute.xlu0 %3987 }
 0x45f   : > { %v3989_v61 = vunpack.i.l.bf16 %v3988_v14  ;;  %v2374_v10 = vpop.permute.xlu1 %2373  ;;  %v3990_v33 = vunpack.i.h.bf16 %v3988_v14 }
 0x460   : > { %v2480_v28 = vsel %vm1609_vm10, %v2192_v45, %v2374_v10  ;;  %v2196_v10 = vld [vmem:[#allocation3 + $0x51] sm:$0xff] }
 0x461   : > { %v2456_v9 = vsel %vm2451_vm0, %v2444_v42, %v3989_v61  ;;  %v2457_v38 = vsel %vm2451_vm0, %v2445_v13, %v3990_v33  ;;  %v2152_v42 = vld [vmem:[#allocation3 + $0x4d] sm:$0xff] }
 0x462   : > { %v3993_v48 = vpop.permute.xlu0 %3992 }
 0x463   : > { %v3994_v59 = vunpack.i.l.bf16 %v3993_v48  ;;  %v3998_v19 = vpop.permute.xlu1 %3997  ;;  %v3995_v37 = vunpack.i.h.bf16 %v3993_v48 }
 0x464   : > { %v3999_v15 = vunpack.i.l.bf16 %v3998_v19  ;;  %v4000_v49 = vunpack.i.h.bf16 %v3998_v19 }
 0x465   : > { %v2468_v27 = vsel %vm2463_vm1, %v2456_v9, %v3994_v59  ;;  %v2469_v46 = vsel %vm2463_vm1, %v2457_v38, %v3995_v37 }
 0x466   : > { %2621 = vmatmul.mubr.f32.gmra.mxu0 %v2468_v27  ;;  %v2418_v51 = vpop.permute.xlu0 %2417  ;;  %v2446_v36 = vsel %vm1609_vm10, %v2149_v22, %v3999_v15  ;;  %v2447_v3 = vsel %vm1609_vm10, %v2150_v35, %v4000_v49 }
 0x467   : > { %v2491_v54 = vsel %vm2451_vm0, %v2480_v28, %v2418_v51  ;;  %v4003_v29 = vpop.permute.xlu1 %4002  ;;  %v2153_v28 = vld [vmem:[#allocation3 + $0x55] sm:$0xf]  ;;  %v2197_v51 = vld [vmem:[#allocation3 + $0x59] sm:$0xf] }
 0x468   : > { %3639 = vmatprep.mubr.msk.f32.mxu0 %vm2463_vm1, %v2491_v54  ;;  %v4004_v30 = vunpack.i.l.bf16 %v4003_v29  ;;  %v4005_v34 = vunpack.i.h.bf16 %v4003_v29 }
 0x46a   : > { %2626 = vmatmul.mubr.f32.gmra.mxu0 %v2469_v46  ;;  %v2376_v32 = vpop.permute.xlu0 %2375  ;;  %v2458_v31 = vsel %vm2451_vm0, %v2446_v36, %v4004_v30  ;;  %v2459_v23 = vsel %vm2451_vm0, %v2447_v3, %v4005_v34  ;;  %v2122_v30 = vld [vmem:[%s5920_s10] sm:$0xff] }
 0x46b   : > { %v4008_v57 = vpop.permute.xlu1 %4007  ;;  %v2481_v20 = vsel %vm1609_vm10, %v2193_v6, %v2376_v32 }
 0x46c   : > { %v4009_v24 = vunpack.i.l.bf16 %v4008_v57  ;;  %v4010_v58 = vunpack.i.h.bf16 %v4008_v57 }
 0x46e   : > { %v2420_v47 = vpop.permute.xlu0 %2419  ;;  %v2470_v1 = vsel %vm2463_vm1, %v2458_v31, %v4009_v24  ;;  %v2471_v26 = vsel %vm2463_vm1, %v2459_v23, %v4010_v58 }
 0x46f   : > { %v2492_v41 = vsel %vm2451_vm0, %v2481_v20, %v2420_v47  ;;  %v2422_v18 = vpop.permute.xlu1 %2421 }
 0x470   : > { %3640 = vmatprep.mubr.msk.f32.mxu0 %vm2463_vm1, %v2492_v41 }
 0x471   : > { %2631 = vmatmul.mubr.f32.gmra.mxu0 %v2470_v1 }
 0x472   : > { %v2378_v16 = vpop.permute.xlu0 %2377 }
 0x473   : > { %v2482_v12 = vsel %vm1609_vm10, %v2194_v11, %v2378_v16  ;;  %v2380_v17 = vpop.permute.xlu1 %2379 }
 0x474   : > { %v2493_v21 = vsel %vm2451_vm0, %v2482_v12, %v2422_v18  ;;  %v2483_v43 = vsel %vm1609_vm10, %v2195_v40, %v2380_v17  ;;  %v3633_v17 = vld [vmem:[%s5914_s4] ss:$0 sm:$0xff] }
 0x475   : > { %3641 = vmatprep.mubr.msk.f32.mxu0 %vm2463_vm1, %v2493_v21 }
 0x476   : > { %2636 = vmatmul.mubr.f32.gmra.mxu0 %v2471_v26  ;;  %v4013_v7 = vpop.permute.xlu0 %4012 }
 0x477   : > { %v2424_v52 = vpop.permute.xlu1 %2423  ;;  %v4014_v63 = vunpack.i.l.bf16 %v4013_v7  ;;  %v4015_v4 = vunpack.i.h.bf16 %v4013_v7 }
 0x478   : > { %v2494_v55 = vsel %vm2451_vm0, %v2483_v43, %v2424_v52 }
 0x479   : > { %3642 = vmatprep.mubr.msk.f32.mxu0 %vm2463_vm1, %v2494_v55  ;;  %v2448_v25 = vsel %vm1609_vm10, %v2151_v62, %v4014_v63  ;;  %v2449_v19 = vsel %vm1609_vm10, %v2152_v42, %v4015_v4  ;;  %v2124_v42 = vld [vmem:[%s5920_s10 + $0x10] sm:$0xff] }
 0x47a   : > { %v4018_v60 = vpop.permute.xlu0 %4017 }
 0x47b   : > { %v4019_v8 = vunpack.i.l.bf16 %v4018_v60  ;;  %v2382_v44 = vpop.permute.xlu1 %2381  ;;  %v4020_v14 = vunpack.i.h.bf16 %v4018_v60 }
 0x47c   : > { %v2484_v2 = vsel %vm1609_vm10, %v2196_v10, %v2382_v44 }
 0x47d   : > { %v2460_v61 = vsel %vm2451_vm0, %v2448_v25, %v4019_v8  ;;  %v2461_v45 = vsel %vm2451_vm0, %v2449_v19, %v4020_v14  ;;  %v2126_v19 = vld [vmem:[%s5920_s10 + $0x20] sm:$0xff] }
 0x47e   : > { %v4023_v56 = vpop.permute.xlu0 %4022 }
 0x47f   : > { %v4024_v53 = vunpack.i.l.bf16 %v4023_v56  ;;  %v2252_v50 = vpop.permute.xlu1 %2251  ;;  %v4025_v48 = vunpack.i.h.bf16 %v4023_v56 }
 0x480   : > { %v2450_v54 = vsel %vm1609_vm10, %v2153_v28, %v2252_v50  ;;  %v2796_v28 = vld [vmem:[%s5915_s5 + $0x60] sm:$0xff] }
 0x481   : > { %v2472_v39 = vsel %vm2463_vm1, %v2460_v61, %v4024_v53  ;;  %v2473_v37 = vsel %vm2463_vm1, %v2461_v45, %v4025_v48  ;;  %v2799_v45 = vld [vmem:[%s5915_s5 + $0x78] sm:$0xff] }
 0x482   : > { %2641 = vmatmul.mubr.f32.gmra.mxu0 %v2472_v39  ;;  %v2426_v59 = vpop.permute.xlu0 %2425  ;;  %2962 = vmatpush1.msra.mxu1 %v2799_v45 }
 0x483   : > { %v2495_v33 = vsel %vm2451_vm0, %v2484_v2, %v2426_v59  ;;  %v2296_v9 = vpop.permute.xlu1 %2295  ;;  %v2123_v59 = vld [vmem:[%s5920_s10 + $0x8] sm:$0xff]  ;;  %2963 = vmatprep.subr.mxu1 %v4098_v0 }
 0x484   : > { %3643 = vmatprep.mubr.msk.f32.mxu0 %vm2463_vm1, %v2495_v33  ;;  %v2462_v38 = vsel %vm2451_vm0, %v2450_v54, %v2296_v9  ;;  %v2125_v33 = vld [vmem:[%s5920_s10 + $0x18] sm:$0xff]  ;;  %v2127_v9 = vld [vmem:[%s5920_s10 + $0x28] sm:$0x3] }
 0x485   : > { %v2793_v54 = vld [vmem:[%s5915_s5 + $0x48] sm:$0xff] }
 0x486   : > { %v2384_v27 = vpop.permute.xlu0 %2383  ;;  %2646 = vmatmul.mubr.f32.gmra.mxu0 %v2473_v37  ;;  %v2798_v37 = vld [vmem:[%s5915_s5 + $0x70] sm:$0xff] }
 0x487   : > { %v2340_v5 = vpop.permute.xlu1 %2339  ;;  %v2485_v13 = vsel %vm1609_vm10, %v2197_v51, %v2384_v27  ;;  %v2797_v27 = vld [vmem:[%s5915_s5 + $0x68] sm:$0xff]  ;;  %2964 = vmatpush1.msra.mxu1 %v2798_v37  ;;  %v2795_v51 = vld [vmem:[%s5915_s5 + $0x58] sm:$0xff] }
 0x488   : > { %v2474_v46 = vsel %vm2463_vm1, %v2462_v38, %v2340_v5  ;;  %2965 = vmatprep.subr.mxu1 %v4098_v0  ;;  %v2794_v5 = vld [vmem:[%s5915_s5 + $0x50] sm:$0xff] }
 0x489   : > { %2966 = vmatpush1.msra.mxu1 %v2797_v27  ;;  %v2790_v38 = vld [vmem:[%s5915_s5 + $0x30] sm:$0xff] }
 0x48a   : > { %v2428_v29 = vpop.permute.xlu0 %2427  ;;  %2967 = vmatprep.subr.mxu1 %v4098_v0 }
 0x48b   : > { %v2496_v15 = vsel %vm2451_vm0, %v2485_v13, %v2428_v29  ;;  %2968 = vmatpush1.msra.mxu1 %v2796_v28  ;;  %v2792_v13 = vld [vmem:[%s5915_s5 + $0x40] sm:$0xff]  ;;  %v2791_v29 = vld [vmem:[%s5915_s5 + $0x38] sm:$0xff] }
 0x48c   : > { %3644 = vmatprep.mubr.msk.f32.mxu0 %vm2463_vm1, %v2496_v15  ;;  %2969 = vmatprep.subr.mxu1 %v4098_v0  ;;  %v2789_v15 = vld [vmem:[%s5915_s5 + $0x28] sm:$0xff] }
 0x48d   : > { %2651 = vmatmul.mubr.f32.gmra.mxu0 %v2474_v46  ;;  %2970 = vmatpush1.msra.mxu1 %v2795_v51  ;;  %v2788_v46 = vld [vmem:[%s5915_s5 + $0x20] sm:$0xff] }
 0x48e   : > { %3886 = vmatprep.mubr.msk.f32.mxu0 %vm2667_vm4, %v2122_v30  ;;  %2971 = vmatprep.subr.mxu1 %v4098_v0  ;;  %v2787_v30 = vld [vmem:[%s5915_s5 + $0x18] sm:$0xff] }
 0x48f   : > { %2972 = vmatpush1.msra.mxu1 %v2794_v5 }
 0x490   : > { %2973 = vmatprep.subr.mxu1 %v4098_v0 }
 0x491   : > { %2974 = vmatpush1.msra.mxu1 %v2793_v54 }
 0x492   : > { %2975 = vmatprep.subr.mxu1 %v4098_v0 }
 0x493   : > { %2976 = vmatpush1.msra.mxu1 %v2792_v13 }
 0x494   : > { %2977 = vmatprep.subr.mxu1 %v4098_v0 }
 0x495   : > { %2978 = vmatpush1.msra.mxu1 %v2791_v29 }
 0x496   : > { %2979 = vmatprep.subr.mxu1 %v4098_v0 }
 0x497   : > { %2980 = vmatpush1.msra.mxu1 %v2790_v38 }
 0x498   : > { %2981 = vmatprep.subr.mxu1 %v4098_v0 }
 0x499   : > { %2982 = vmatpush1.msra.mxu1 %v2789_v15 }
 0x49a   : > { %2983 = vmatprep.subr.mxu1 %v4098_v0 }
 0x49b   : > { %2984 = vmatpush1.msra.mxu1 %v2788_v46 }
 0x49c   : > { %2985 = vmatprep.subr.mxu1 %v4098_v0 }
 0x49d   : > { %2986 = vmatpush1.msra.mxu1 %v2787_v30 }
 0x49e   : > { %2987 = vmatprep.subr.mxu1 %v4098_v0 }
 0x50a   : > { %v2602_v32 = vpop.f32.mrf.mxu0 }
 0x50b   : > { %v2603_v10 = vadd.f32 %v3633_v17, %v2602_v32  ;;  %v2786_v32 = vld [vmem:[%s5915_s5 + $0x10] sm:$0xff] }
 0x50c   : > { %v2604_v57 = vpop.f32.mrf.mxu0  ;;  %2988 = vmatpush1.msra.mxu1 %v2786_v32 }
 0x50d   : > { %v2656_v2 = vmax.f32 %v2603_v10, 0.0  ;;  %v2785_v57 = vld [vmem:[%s5915_s5 + $0x8] sm:$0xff]  ;;  %2989 = vmatprep.subr.mxu1 %v4098_v0 }
 0x50e   : > { %v2607_v22 = vpop.f32.mrf.mxu0  ;;  %2990 = vmatpush1.msra.mxu1 %v2785_v57 }
 0x50f   : > { %v2608_v50 = vadd.f32 %v3633_v17, %v2607_v22  ;;  %v2784_v22 = vld [vmem:[%s5915_s5] sm:$0xff]  ;;  %2991 = vmatprep.subr.mxu1 %v4098_v0 }
 0x510   : > { %v2609_v6 = vpop.f32.mrf.mxu0  ;;  %2992 = vmatpush1.msra.mxu1 %v2784_v22 }
 0x511   : > { %v2657_v39 = vmax.f32 %v2608_v50, 0.0  ;;  %3017 = vmatprep.subr.mxu1 %v4098_v0 }
 0x515   : > { %v2612_v24 = vpop.f32.mrf.mxu0 }
 0x516   : > { %v2613_v25 = vadd.f32 %v3633_v17, %v2612_v24  ;;  %v2803_v24 = vld [vmem:[%s5915_s5 + $0x98] sm:$0xff] }
 0x517   : > { %v2614_v36 = vpop.f32.mrf.mxu0  ;;  %3018 = vmatpush2.msra.mxu1 %v2803_v24 }
 0x518   : > { %v2658_v48 = vmax.f32 %v2613_v25, 0.0  ;;  %3019 = vmatprep.subr.mxu1 %v4098_v0 }
 0x51a   : > { %v2617_v20 = vpop.f32.mrf.mxu0 }
 0x51b   : > { %v2618_v4 = vadd.f32 %v3633_v17, %v2617_v20  ;;  %v2802_v20 = vld [vmem:[%s5915_s5 + $0x90] sm:$0xff] }
 0x51c   : > { %v2619_v47 = vpop.f32.mrf.mxu0  ;;  %3020 = vmatpush2.msra.mxu1 %v2802_v20 }
 0x51d   : > { %v2659_v61 = vmax.f32 %v2618_v4, 0.0  ;;  %3021 = vmatprep.subr.mxu1 %v4098_v0 }
 0x526   : > { %v2622_v31 = vpop.f32.mrf.mxu0 }
 0x527   : > { %v2623_v56 = vadd.f32 %v3633_v17, %v2622_v31  ;;  %v2801_v31 = vld [vmem:[%s5915_s5 + $0x88] sm:$0xff] }
 0x528   : > { %v2624_v49 = vpop.f32.mrf.mxu0  ;;  %3022 = vmatpush2.msra.mxu1 %v2801_v31 }
 0x529   : > { %v2660_v14 = vmax.f32 %v2623_v56, 0.0  ;;  %v2800_v49 = vld [vmem:[%s5915_s5 + $0x80] sm:$0xff]  ;;  %3023 = vmatprep.subr.mxu1 %v4098_v0 }
 0x52a   : > { %v2627_v41 = vpop.f32.mrf.mxu0  ;;  %3024 = vmatpush2.msra.mxu1 %v2800_v49 }
 0x52b   : > { %v2628_v8 = vadd.f32 %v3633_v17, %v2627_v41 }
 0x52c   : > { %v2629_v1 = vpop.f32.mrf.mxu0 }
 0x52d   : > { %v2661_v53 = vmax.f32 %v2628_v8, 0.0 }
 0x531   : > { %v2632_v34 = vpop.f32.mrf.mxu0 }
 0x532   : > { %v2633_v60 = vadd.f32 %v3633_v17, %v2632_v34 }
 0x533   : > { %v2634_v18 = vpop.f32.mrf.mxu0 }
 0x534   : > { %v2662_v62 = vmax.f32 %v2633_v60, 0.0 }
 0x536   : > { %v2637_v58 = vpop.f32.mrf.mxu0 }
 0x537   : > { %v2638_v52 = vadd.f32 %v3633_v17, %v2637_v58 }
 0x538   : > { %v2639_v16 = vpop.f32.mrf.mxu0 }
 0x539   : > { %v2663_v44 = vmax.f32 %v2638_v52, 0.0 }
 0x542   : > { %v2642_v11 = vpop.f32.mrf.mxu0 }
 0x543   : > { %v2643_v40 = vadd.f32 %v3633_v17, %v2642_v11 }
 0x544   : > { %v2644_v35 = vpop.f32.mrf.mxu0 }
 0x545   : > { %v2664_v63 = vmax.f32 %v2643_v40, 0.0 }
 0x546   : > { %v2647_v12 = vpop.f32.mrf.mxu0 }
 0x547   : > { %v2648_v23 = vadd.f32 %v3633_v17, %v2647_v12 }
 0x548   : > { %v2649_v3 = vpop.f32.mrf.mxu0 }
 0x549   : > { %v2665_v55 = vmax.f32 %v2648_v23, 0.0 }
 0x54d   : > { %v2652_v21 = vpop.f32.mrf.mxu0 }
 0x54e   : > { %v2653_v26 = vadd.f32 %v3633_v17, %v2652_v21 }
 0x54f   : > { %v2654_v7 = vpop.f32.mrf.mxu0 }
 0x550   : > { %v2666_v43 = vmax.f32 %v2653_v26, 0.0 }
 0x552   : > { %3864 = vmatprep.subr.msk.mxu0 %vm1745_vm2, %v2666_v43 }
 0x553   : > { %3865 = vmatpush3.msk.msra.mxu0 %vm1745_vm2, %v2666_v43  ;;  %vm2808_vm2 = vcmask 254976  }
 0x554   : > { %3866 = vmatprep.subr.mxu0 %v2665_v55  ;;  %2809 = vst.msk [vmem:[#allocation4 + $0x6] sm:$0x3] %vm2808_vm2, %v4098_v0  ;;  %2810 = vst.msk [vmem:[#allocation4 + $0x32] sm:$0x3] %vm2808_vm2, %v4098_v0 }
 0x555   : > { %3867 = vmatpush3.msra.mxu0 %v2665_v55 }
 0x556   : > { %3868 = vmatprep.subr.mxu0 %v2664_v63 }
 0x557   : > { %3869 = vmatpush3.msra.mxu0 %v2664_v63 }
 0x558   : > { %3870 = vmatprep.subr.mxu0 %v2663_v44 }
 0x559   : > { %3871 = vmatpush3.msra.mxu0 %v2663_v44 }
 0x55a   : > { %3872 = vmatprep.subr.mxu0 %v2662_v62 }
 0x55b   : > { %3873 = vmatpush3.msra.mxu0 %v2662_v62 }
 0x55c   : > { %3874 = vmatprep.subr.mxu0 %v2661_v53 }
 0x55d   : > { %3875 = vmatpush3.msra.mxu0 %v2661_v53 }
 0x55e   : > { %3876 = vmatprep.subr.mxu0 %v2660_v14 }
 0x55f   : > { %3877 = vmatpush3.msra.mxu0 %v2660_v14 }
 0x560   : > { %3878 = vmatprep.subr.mxu0 %v2659_v61 }
 0x561   : > { %3879 = vmatpush3.msra.mxu0 %v2659_v61 }
 0x562   : > { %3880 = vmatprep.subr.mxu0 %v2658_v48 }
 0x563   : > { %3881 = vmatpush3.msra.mxu0 %v2658_v48 }
 0x564   : > { %3882 = vmatprep.subr.mxu0 %v2657_v39 }
 0x565   : > { %3883 = vmatpush3.msra.mxu0 %v2657_v39 }
 0x566   : > { %3884 = vmatprep.subr.mxu0 %v2656_v2 }
 0x567   : > { %3885 = vmatpush3.msra.mxu0 %v2656_v2 }
 0x568   : > { %3887 = vmatmul.mubr.msk.f32.vlgmr.msra.gmra.mxu0 %vm2667_vm4, %v2123_v59  ;;  %3895 = vmatprep.subr.mxu0 %v4098_v0 }
 0x569   : > { %3889 = vmatprep.mubr.msk.f32.mxu0 %vm2667_vm4, %v2124_v42 }
 0x56c   : > { %3890 = vmatmul.mubr.msk.f32.gmra.mxu0 %vm2667_vm4, %v2125_v33 }
 0x56d   : > { %3892 = vmatprep.mubr.msk.f32.mxu0 %vm2667_vm4, %v2126_v19 }
 0x570   : > { %3893 = vmatmul.mubr.msk.f32.gmra.mxu0 %vm2667_vm4, %v2127_v9 }
 0x571   : > { %3907 = vmatprep.mubr.msk.f32.mxu0 %vm4106_vm3, %v4098_v0 }
 0x628   : > { %v3888_v6 = vpop.f32.mrf.mxu0 }
 0x629   : > { %2812 = vst.msk [vmem:[#allocation4 + $0x10] sm:$0xff] %vm1609_vm10, %v3888_v6 }
 0x62a   : > { %v2755_v36 = vpop.f32.mrf.mxu0 }
 0x62b   : > { %2811 = vst.msk [vmem:[#allocation4 + $0x8] sm:$0xff] %vm1609_vm10, %v2755_v36 }
 0x62c   : > { %v3891_v47 = vpop.f32.mrf.mxu0 }
 0x62d   : > { %2814 = vst.msk [vmem:[#allocation4 + $0x20] sm:$0xff] %vm1609_vm10, %v3891_v47 }
 0x62e   : > { %v2765_v41 = vpop.f32.mrf.mxu0 }
 0x62f   : > { %2813 = vst.msk [vmem:[#allocation4 + $0x18] sm:$0xff] %vm1609_vm10, %v2765_v41 }
 0x630   : > { %v3894_v1 = vpop.f32.mrf.mxu0  ;;  %v2830_v34 = vld [vmem:[#allocation4 + $0x10] sm:$0xff] }
 0x631   : > { %2816 = vst.msk [vmem:[#allocation4 + $0x30] sm:$0x3] %vm2808_vm2, %v3894_v1 }
 0x632   : > { %v2775_v18 = vpop.f32.mrf.mxu0  ;;  %v2829_v58 = vld [vmem:[#allocation4 + $0x8] sm:$0xff] }
 0x633   : > { %v2823_v16 = vld [vmem:[#allocation4 + $0x7] sm:$0xff]  ;;  %v2824_v11 = vld [vmem:[#allocation4 + $0xf] sm:$0xff]  ;;  %2815 = vst.msk [vmem:[#allocation4 + $0x28] sm:$0xff] %vm1609_vm10, %v2775_v18  ;;  %v4031_v35 = vpack.i.bf16 %v2830_v34, %v2829_v58 }
 0x634   : > { %v4026_v12 = vpack.i.bf16 %v2824_v11, %v2823_v16  ;;  %v2841_v3 = vld [vmem:[#allocation4 + $0xa] sm:$0xff]  ;;  %v2832_v52 = vld [vmem:[#allocation4 + $0x20] sm:$0xff] }
 0x635   : > { %3653 = vmatprep.mubr.msk.f32.mxu1 %vm1609_vm10, %v2841_v3  ;;  %4032 = vrot.lane.b32.xlu1 %v4031_v35, %s4110_s23  ;;  %v2835_v17 = vld [vmem:[#allocation4 + $0x9] sm:$0xff] }
 0x636   : > { %4027 = vrot.lane.b32.xlu0 %v4026_v12, %s4107_s20  ;;  %v2836_v21 = vld [vmem:[#allocation4 + $0x11] sm:$0xff]  ;;  %v2826_v26 = vld [vmem:[#allocation4 + $0x1f] sm:$0xff] }
 0x637   : > { %v2825_v23 = vld [vmem:[#allocation4 + $0x17] sm:$0xff]  ;;  %v4036_v7 = vpack.i.bf16 %v2836_v21, %v2835_v17  ;;  %v2817_v48 = vld [vmem:[#allocation4 + $0x6] sm:$0xff]  ;;  %v2818_v45 = vld [vmem:[#allocation4 + $0xe] sm:$0xff] }
 0x638   : > { %v4041_v40 = vpack.i.bf16 %v2826_v26, %v2825_v23  ;;  %v2831_v43 = vld [vmem:[#allocation4 + $0x18] sm:$0xff]  ;;  %v2834_v53 = vld [vmem:[#allocation4 + $0x30] sm:$0x3]  ;;  %v2846_v23 = vld [vmem:[#allocation4 + $0x32] sm:$0x3] }
 0x639   : > { %v2837_v55 = vld [vmem:[#allocation4 + $0x19] sm:$0xff]  ;;  %v4046_v63 = vpack.i.bf16 %v2832_v52, %v2831_v43  ;;  %v2840_v25 = vld [vmem:[#allocation4 + $0x31] sm:$0x3] }
 0x63a   : > { %4037 = vrot.lane.b32.xlu0 %v4036_v7, %s4111_s24  ;;  %4042 = vrot.lane.b32.xlu1 %v4041_v40, %s4107_s20  ;;  %v2838_v60 = vld [vmem:[#allocation4 + $0x21] sm:$0xff]  ;;  %v2828_v62 = vld [vmem:[#allocation4 + $0x2f] sm:$0x3]  ;;  %v2842_v13 = vld [vmem:[#allocation4 + $0x12] sm:$0xff] }
 0x63b   : > { %v4051_v8 = vpack.i.bf16 %v2838_v60, %v2837_v55  ;;  %v2833_v44 = vld [vmem:[#allocation4 + $0x28] sm:$0xff]  ;;  %v2819_v15 = vld [vmem:[#allocation4 + $0x16] sm:$0xff]  ;;  %v2820_v47 = vld [vmem:[#allocation4 + $0x1e] sm:$0xff] }
 0x63c   : > { %v2827_v56 = vld [vmem:[#allocation4 + $0x27] sm:$0xff]  ;;  %v2843_v36 = vld [vmem:[#allocation4 + $0x1a] sm:$0xff] }
 0x63d   : > { %v2839_v4 = vld [vmem:[#allocation4 + $0x29] sm:$0xff] }
 0x63e   : > { %4047 = vrot.lane.b32.xlu0 %v4046_v63, %s4110_s23  ;;  %4052 = vrot.lane.b32.xlu1 %v4051_v8, %s4111_s24  ;;  %v2844_v34 = vld [vmem:[#allocation4 + $0x22] sm:$0xff]  ;;  %v2845_v12 = vld [vmem:[#allocation4 + $0x2a] sm:$0xff] }
 0x63f   : > { %v2821_v58 = vld [vmem:[#allocation4 + $0x26] sm:$0xff]  ;;  %v2822_v17 = vld [vmem:[#allocation4 + $0x2e] sm:$0x3] }
 0x642   : > { %2885 = vrot.lane.b32.xlu1 %v2833_v44, %s4110_s23  ;;  %2861 = vrot.lane.b32.xlu0 %v2827_v56, %s4107_s20 }
 0x646   : > { %2863 = vrot.lane.b32.xlu1 %v2828_v62, %s4107_s20  ;;  %2909 = vrot.lane.b32.xlu0 %v2839_v4, %s4111_s24 }
 0x64a   : > { %2887 = vrot.lane.b32.xlu0 %v2834_v53, %s4110_s23  ;;  %2911 = vrot.lane.b32.xlu1 %v2840_v25, %s4111_s24 }
 0x6a7   : > { %v4033_v14 = vpop.permute.xlu1 %4032 }
 0x6a8   : > { %v4028_v50 = vpop.permute.xlu0 %4027  ;;  %v4034_v10 = vunpack.i.l.bf16 %v4033_v14  ;;  %v4035_v19 = vunpack.i.h.bf16 %v4033_v14  ;;  %v3652_v14 = vld [vmem:[%s5916_s6] ss:$0 sm:$0xff] }
 0x6a9   : > { %v4029_v61 = vunpack.i.l.bf16 %v4028_v50  ;;  %v4030_v39 = vunpack.i.h.bf16 %v4028_v50 }
 0x6ab   : > { %v2919_v2 = vsel %vm1609_vm10, %v2817_v48, %v4029_v61  ;;  %v2920_v51 = vsel %vm1609_vm10, %v2818_v45, %v4030_v39 }
 0x6ac   : > { %v4038_v59 = vpop.permute.xlu0 %4037  ;;  %v4043_v42 = vpop.permute.xlu1 %4042  ;;  %v2925_v9 = vsel %vm2451_vm0, %v2919_v2, %v4034_v10  ;;  %v2926_v38 = vsel %vm2451_vm0, %v2920_v51, %v4035_v19  ;;  %v2806_v51 = vld [vmem:[%s5921_s11 + $0x8] sm:$0xff] }
 0x6ad   : > { %v4039_v33 = vunpack.i.l.bf16 %v4038_v59  ;;  %v4040_v37 = vunpack.i.h.bf16 %v4038_v59  ;;  %v4044_v27 = vunpack.i.l.bf16 %v4043_v42  ;;  %v4045_v46 = vunpack.i.h.bf16 %v4043_v42 }
 0x6af   : > { %v2931_v28 = vsel %vm2463_vm1, %v2925_v9, %v4039_v33  ;;  %v2932_v32 = vsel %vm2463_vm1, %v2926_v38, %v4040_v37  ;;  %v2921_v57 = vsel %vm1609_vm10, %v2819_v15, %v4044_v27  ;;  %v2922_v41 = vsel %vm1609_vm10, %v2820_v47, %v4045_v46  ;;  %v3253_v38 = vld [vmem:[%s5917_s7 + $0x70] sm:$0xff]  ;;  %v3268_v15 = vld [vmem:[%s5917_s7 + $0xe8] sm:$0xff]  ;;  %v3302_v46 = vld [vmem:[%s5917_s7 + $0x1f8] sm:$0xff] }
 0x6b0   : > { %3026 = vmatmul.mubr.f32.vlgmr.msra.gmra.mxu1 %v2931_v28  ;;  %v4048_v5 = vpop.permute.xlu0 %4047  ;;  %v4053_v54 = vpop.permute.xlu1 %4052  ;;  %v2805_v28 = vld [vmem:[%s5921_s11] sm:$0xff]  ;;  %v3266_v47 = vld [vmem:[%s5917_s7 + $0xd8] sm:$0xff] }
 0x6b1   : > { %v4049_v29 = vunpack.i.l.bf16 %v4048_v5  ;;  %3654 = vmatprep.mubr.msk.f32.mxu1 %vm1609_vm10, %v2842_v13  ;;  %v4054_v30 = vunpack.i.l.bf16 %v4053_v54  ;;  %v4050_v22 = vunpack.i.h.bf16 %v4048_v5  ;;  %v4055_v31 = vunpack.i.h.bf16 %v4053_v54  ;;  %v2807_v5 = vld [vmem:[%s5921_s11 + $0x10] sm:$0x1f]  ;;  %v3270_v54 = vld [vmem:[%s5917_s7 + $0xf8] sm:$0xff] }
 0x6b2   : > { %v3254_v13 = vld [vmem:[%s5917_s7 + $0x78] sm:$0xff]  ;;  %3719 = vmatprep.subr.mxu1 %v3270_v54 }
 0x6b3   : > { %v2927_v20 = vsel %vm2451_vm0, %v2921_v57, %v4049_v29  ;;  %v2928_v18 = vsel %vm2451_vm0, %v2922_v41, %v4050_v22  ;;  %v3269_v29 = vld [vmem:[%s5917_s7 + $0xf0] sm:$0xff]  ;;  %3720 = vmatpush3.msra.mxu1 %v3254_v13  ;;  %v3267_v22 = vld [vmem:[%s5917_s7 + $0xe0] sm:$0xff] }
 0x6b4   : > { %3031 = vmatmul.mubr.f32.gmra.mxu1 %v2932_v32  ;;  %v2886_v6 = vpop.permute.xlu1 %2885  ;;  %v2862_v24 = vpop.permute.xlu0 %2861  ;;  %v2933_v49 = vsel %vm2463_vm1, %v2927_v20, %v4054_v30  ;;  %v2934_v35 = vsel %vm2463_vm1, %v2928_v18, %v4055_v31  ;;  %3721 = vmatprep.subr.mxu1 %v3269_v29  ;;  %v3252_v30 = vld [vmem:[%s5917_s7 + $0x68] sm:$0xff]  ;;  %v3286_v32 = vld [vmem:[%s5917_s7 + $0x178] sm:$0xff]  ;;  %v3301_v57 = vld [vmem:[%s5917_s7 + $0x1f0] sm:$0xff] }
 0x6b5   : > { %3655 = vmatprep.mubr.msk.f32.mxu1 %vm1609_vm10, %v2843_v36  ;;  %v2923_v11 = vsel %vm1609_vm10, %v2821_v58, %v2862_v24  ;;  %3722 = vmatpush3.msra.mxu1 %v3253_v38  ;;  %v3251_v24 = vld [vmem:[%s5917_s7 + $0x60] sm:$0xff]  ;;  %v3300_v36 = vld [vmem:[%s5917_s7 + $0x1e8] sm:$0xff]  ;;  %v3249_v18 = vld [vmem:[%s5917_s7 + $0x50] sm:$0xff] }
 0x6b6   : > { %v2929_v21 = vsel %vm2451_vm0, %v2923_v11, %v2886_v6  ;;  %v3285_v6 = vld [vmem:[%s5917_s7 + $0x170] sm:$0xff]  ;;  %3723 = vmatprep.subr.mxu1 %v3268_v15  ;;  %v3284_v20 = vld [vmem:[%s5917_s7 + $0x168] sm:$0xff]  ;;  %v3299_v31 = vld [vmem:[%s5917_s7 + $0x1e0] sm:$0xff] }
 0x6b7   : > { %3724 = vmatpush3.msra.mxu1 %v3252_v30  ;;  %v3283_v41 = vld [vmem:[%s5917_s7 + $0x160] sm:$0xff]  ;;  %v3282_v58 = vld [vmem:[%s5917_s7 + $0x158] sm:$0xff]  ;;  %v3297_v11 = vld [vmem:[%s5917_s7 + $0x1d0] sm:$0xff] }
 0x6b8   : > { %3036 = vmatmul.mubr.f32.gmra.mxu1 %v2933_v49  ;;  %v2910_v1 = vpop.permute.xlu0 %2909  ;;  %v2864_v16 = vpop.permute.xlu1 %2863  ;;  %3725 = vmatprep.subr.mxu1 %v3267_v22  ;;  %v3250_v49 = vld [vmem:[%s5917_s7 + $0x58] sm:$0xff]  ;;  %v3273_v29 = vld [vmem:[%s5917_s7 + $0x110] sm:$0xff]  ;;  %v3288_v38 = vld [vmem:[%s5917_s7 + $0x188] sm:$0xff] }
 0x6b9   : > { %3656 = vmatprep.mubr.msk.f32.mxu1 %vm1609_vm10, %v2844_v34  ;;  %v2924_v26 = vsel %vm1609_vm10, %v2822_v17, %v2864_v16  ;;  %v2935_v7 = vsel %vm2463_vm1, %v2929_v21, %v2910_v1  ;;  %3726 = vmatpush3.msra.mxu1 %v3251_v24  ;;  %v3265_v1 = vld [vmem:[%s5917_s7 + $0xd0] sm:$0xff]  ;;  %v3298_v34 = vld [vmem:[%s5917_s7 + $0x1d8] sm:$0xff]  ;;  %v3264_v16 = vld [vmem:[%s5917_s7 + $0xc8] sm:$0xff] }
 0x6ba   : > { %3727 = vmatprep.subr.mxu1 %v3266_v47  ;;  %v3296_v17 = vld [vmem:[%s5917_s7 + $0x1c8] sm:$0xff]  ;;  %v3247_v21 = vld [vmem:[%s5917_s7 + $0x40] sm:$0xff] }
 0x6bb   : > { %3728 = vmatpush3.msra.mxu1 %v3250_v49 }
 0x6bc   : > { %3041 = vmatmul.mubr.f32.gmra.mxu1 %v2934_v35  ;;  %v2888_v3 = vpop.permute.xlu0 %2887  ;;  %v2912_v43 = vpop.permute.xlu1 %2911  ;;  %3729 = vmatprep.subr.mxu1 %v3265_v1  ;;  %v3248_v35 = vld [vmem:[%s5917_s7 + $0x48] sm:$0xff] }
 0x6bd   : > { %3657 = vmatprep.mubr.msk.f32.mxu1 %vm1609_vm10, %v2845_v12  ;;  %v2930_v40 = vsel %vm2451_vm0, %v2924_v26, %v2888_v3  ;;  %v3281_v12 = vld [vmem:[%s5917_s7 + $0x150] sm:$0xff]  ;;  %3730 = vmatpush3.msra.mxu1 %v3249_v18  ;;  %v3263_v3 = vld [vmem:[%s5917_s7 + $0xc0] sm:$0xff]  ;;  %v3262_v26 = vld [vmem:[%s5917_s7 + $0xb8] sm:$0xff] }
 0x6be   : > { %v2936_v52 = vsel %vm2463_vm1, %v2930_v40, %v2912_v43  ;;  %3731 = vmatprep.subr.mxu1 %v3264_v16  ;;  %v3246_v40 = vld [vmem:[%s5917_s7 + $0x38] sm:$0xff]  ;;  %v3279_v43 = vld [vmem:[%s5917_s7 + $0x140] sm:$0xff] }
 0x6bf   : > { %3732 = vmatpush3.msra.mxu1 %v3248_v35 }
 0x6c0   : > { %3046 = vmatmul.mubr.f32.gmra.mxu1 %v2935_v7  ;;  %v3295_v7 = vld [vmem:[%s5917_s7 + $0x1c0] sm:$0xff]  ;;  %3733 = vmatprep.subr.mxu1 %v3263_v3 }
 0x6c1   : > { %3658 = vmatprep.mubr.msk.f32.mxu1 %vm1609_vm10, %v2846_v23  ;;  %v3280_v23 = vld [vmem:[%s5917_s7 + $0x148] sm:$0xff]  ;;  %3734 = vmatpush3.msra.mxu1 %v3247_v21 }
 0x6c2   : > { %3735 = vmatprep.subr.mxu1 %v3262_v26 }
 0x6c3   : > { %3736 = vmatpush3.msra.mxu1 %v3246_v40 }
 0x6c4   : > { %3051 = vmatmul.mubr.f32.gmra.mxu1 %v2936_v52  ;;  %v3261_v52 = vld [vmem:[%s5917_s7 + $0xb0] sm:$0xff] }
 0x6c5   : > { %3737 = vmatprep.subr.mxu1 %v3261_v52 }
 0x770   : > { %v3027_v55 = vpop.f32.mrf.mxu1 }
 0x771   : > { %v3028_v9 = vadd.f32 %v3652_v14, %v3027_v55  ;;  %v3294_v55 = vld [vmem:[%s5917_s7 + $0x1b8] sm:$0xff] }
 0x772   : > { %v3029_v60 = vpop.f32.mrf.mxu1 }
 0x773   : > { %v3056_v27 = vmax.f32 %v3028_v9, 0.0  ;;  %v3245_v60 = vld [vmem:[%s5917_s7 + $0x30] sm:$0xff]  ;;  %v3239_v9 = vld [vmem:[%s5917_s7] sm:$0xff] }
 0x774   : > { %v3032_v63 = vpop.f32.mrf.mxu1  ;;  %3738 = vmatpush3.msra.mxu1 %v3245_v60 }
 0x775   : > { %v3033_v33 = vadd.f32 %v3652_v14, %v3032_v63  ;;  %v3278_v63 = vld [vmem:[%s5917_s7 + $0x138] sm:$0xff] }
 0x776   : > { %v3034_v8 = vpop.f32.mrf.mxu1 }
 0x777   : > { %v3057_v37 = vmax.f32 %v3033_v33, 0.0  ;;  %v3260_v8 = vld [vmem:[%s5917_s7 + $0xa8] sm:$0xff]  ;;  %v3255_v33 = vld [vmem:[%s5917_s7 + $0x80] sm:$0xff] }
 0x778   : > { %v3037_v44 = vpop.f32.mrf.mxu1  ;;  %3739 = vmatprep.subr.mxu1 %v3260_v8 }
 0x779   : > { %v3038_v59 = vadd.f32 %v3652_v14, %v3037_v44  ;;  %v3293_v44 = vld [vmem:[%s5917_s7 + $0x1b0] sm:$0xff] }
 0x77a   : > { %v3039_v56 = vpop.f32.mrf.mxu1 }
 0x77b   : > { %v3058_v45 = vmax.f32 %v3038_v59, 0.0  ;;  %v3244_v56 = vld [vmem:[%s5917_s7 + $0x28] sm:$0xff] }
 0x77c   : > { %v3042_v62 = vpop.f32.mrf.mxu1  ;;  %3740 = vmatpush3.msra.mxu1 %v3244_v56  ;;  %v3240_v59 = vld [vmem:[%s5917_s7 + $0x8] sm:$0xff] }
 0x77d   : > { %v3043_v39 = vadd.f32 %v3652_v14, %v3042_v62  ;;  %v3259_v62 = vld [vmem:[%s5917_s7 + $0xa0] sm:$0xff] }
 0x77e   : > { %v3044_v4 = vpop.f32.mrf.mxu1  ;;  %3741 = vmatprep.subr.mxu1 %v3259_v62 }
 0x77f   : > { %v3059_v19 = vmax.f32 %v3043_v39, 0.0  ;;  %v3243_v4 = vld [vmem:[%s5917_s7 + $0x20] sm:$0xff]  ;;  %v3256_v39 = vld [vmem:[%s5917_s7 + $0x88] sm:$0xff] }
 0x780   : > { %v3047_v53 = vpop.f32.mrf.mxu1  ;;  %3742 = vmatpush3.msra.mxu1 %v3243_v4 }
 0x781   : > { %v3048_v61 = vadd.f32 %v3652_v14, %v3047_v53  ;;  %v3258_v53 = vld [vmem:[%s5917_s7 + $0x98] sm:$0xff] }
 0x782   : > { %v3049_v25 = vpop.f32.mrf.mxu1  ;;  %3743 = vmatprep.subr.mxu1 %v3258_v53 }
 0x783   : > { %v3060_v42 = vmax.f32 %v3048_v61, 0.0  ;;  %v3242_v25 = vld [vmem:[%s5917_s7 + $0x18] sm:$0xff]  ;;  %v3292_v61 = vld [vmem:[%s5917_s7 + $0x1a8] sm:$0xff] }
 0x784   : > { %v3052_v50 = vpop.f32.mrf.mxu1  ;;  %3744 = vmatpush3.msra.mxu1 %v3242_v25 }
 0x785   : > { %v3053_v10 = vadd.f32 %v3652_v14, %v3052_v50  ;;  %v3277_v14 = vld [vmem:[%s5917_s7 + $0x130] sm:$0xff] }
 0x786   : > { %v3054_v48 = vpop.f32.mrf.mxu1  ;;  %v3257_v50 = vld [vmem:[%s5917_s7 + $0x90] sm:$0xff] }
 0x787   : > { %v3061_v2 = vmax.f32 %v3053_v10, 0.0  ;;  %v3241_v10 = vld [vmem:[%s5917_s7 + $0x10] sm:$0xff]  ;;  %v3276_v48 = vld [vmem:[%s5917_s7 + $0x128] sm:$0xff]  ;;  %3745 = vmatprep.subr.mxu1 %v3257_v50 }
 0x788   : > { %3746 = vmatpush3.msra.mxu1 %v3241_v10 }
 0x789   : > { %3896 = vmatpush3.msk.msra.mxu0 %vm3072_vm5, %v3061_v2  ;;  %v3291_v2 = vld [vmem:[%s5917_s7 + $0x1a0] sm:$0xff]  ;;  %3747 = vmatprep.subr.mxu1 %v3256_v39 }
 0x78a   : > { %3897 = vmatprep.subr.mxu0 %v4098_v0  ;;  %3748 = vmatpush3.msra.mxu1 %v3240_v59 }
 0x78b   : > { %3898 = vmatpush3.msra.mxu0 %v3060_v42  ;;  %v3275_v42 = vld [vmem:[%s5917_s7 + $0x120] sm:$0xff]  ;;  %3749 = vmatprep.subr.mxu1 %v3255_v33 }
 0x78c   : > { %3899 = vmatprep.subr.mxu0 %v4098_v0  ;;  %3750 = vmatpush3.msra.mxu1 %v3239_v9  ;;  %v3317_v9 = vld [vmem:[%s5917_s7 + $0x270] sm:$0xff] }
 0x78d   : > { %3900 = vmatpush3.msra.mxu0 %v3059_v19  ;;  %v3290_v19 = vld [vmem:[%s5917_s7 + $0x198] sm:$0xff]  ;;  %3466 = vmatprep.subr.mxu1 %v4098_v0 }
 0x78e   : > { %3901 = vmatprep.subr.mxu0 %v4098_v0 }
 0x78f   : > { %3902 = vmatpush3.msra.mxu0 %v3058_v45  ;;  %v3274_v45 = vld [vmem:[%s5917_s7 + $0x118] sm:$0xff] }
 0x790   : > { %3903 = vmatprep.subr.mxu0 %v4098_v0 }
 0x791   : > { %3904 = vmatpush3.msra.mxu0 %v3057_v37 }
 0x792   : > { %3905 = vmatprep.subr.mxu0 %v4098_v0 }
 0x793   : > { %3906 = vmatpush3.msra.mxu0 %v3056_v27  ;;  %v3289_v27 = vld [vmem:[%s5917_s7 + $0x190] sm:$0xff] }
 0x794   : > { %3908 = vmatmul.mubr.msk.f32.vlgmr.msra.gmra.mxu0 %vm3062_vm6, %v2805_v28  ;;  %3754 = vmatprep.subr.mxu0 %v3302_v46 }
 0x795   : > { %3910 = vmatprep.mubr.msk.f32.mxu0 %vm4106_vm3, %v4098_v0  ;;  %3755 = vmatpush3.msra.mxu0 %v3286_v32 }
 0x796   : > { %3756 = vmatprep.subr.mxu0 %v3301_v57  ;;  %v3272_v57 = vld [vmem:[%s5917_s7 + $0x108] sm:$0xff] }
 0x797   : > { %3757 = vmatpush3.msra.mxu0 %v3285_v6  ;;  %v3287_v6 = vld [vmem:[%s5917_s7 + $0x180] sm:$0xff] }
 0x798   : > { %3911 = vmatmul.mubr.msk.f32.gmra.mxu0 %vm3062_vm6, %v2806_v51  ;;  %3758 = vmatprep.subr.mxu0 %v3300_v36 }
 0x799   : > { %3913 = vmatprep.mubr.msk.f32.mxu0 %vm4106_vm3, %v4098_v0  ;;  %3759 = vmatpush3.msra.mxu0 %v3284_v20  ;;  %vm3544_vm3 = vcmask 122880  }
 0x79a   : > { %3760 = vmatprep.subr.mxu0 %v3299_v31  ;;  %v3271_v31 = vld [vmem:[%s5917_s7 + $0x100] sm:$0xff] }
 0x79b   : > { %3761 = vmatpush3.msra.mxu0 %v3283_v41 }
 0x79c   : > { %3914 = vmatmul.mubr.msk.f32.gmra.mxu0 %vm3062_vm6, %v2807_v5  ;;  %3762 = vmatprep.subr.mxu0 %v3298_v34 }
 0x79d   : > { %3763 = vmatpush3.msra.mxu0 %v3282_v58 }
 0x79e   : > { %3764 = vmatprep.subr.mxu0 %v3297_v11 }
 0x79f   : > { %3765 = vmatpush3.msra.mxu0 %v3281_v12 }
 0x7a0   : > { %3766 = vmatprep.subr.mxu0 %v3296_v17 }
 0x7a1   : > { %3767 = vmatpush3.msra.mxu0 %v3280_v23 }
 0x7a2   : > { %3768 = vmatprep.subr.mxu0 %v3295_v7 }
 0x7a3   : > { %3769 = vmatpush3.msra.mxu0 %v3279_v43 }
 0x7a4   : > { %3770 = vmatprep.subr.mxu0 %v3294_v55 }
 0x7a5   : > { %3771 = vmatpush3.msra.mxu0 %v3278_v63 }
 0x7a6   : > { %3772 = vmatprep.subr.mxu0 %v3293_v44 }
 0x7a7   : > { %3773 = vmatpush3.msra.mxu0 %v3277_v14 }
 0x7a8   : > { %3774 = vmatprep.subr.mxu0 %v3292_v61  ;;  %v3318_v61 = vld [vmem:[%s5917_s7 + $0x278] sm:$0xff] }
 0x7a9   : > { %3775 = vmatpush3.msra.mxu0 %v3276_v48 }
 0x7aa   : > { %3776 = vmatprep.subr.mxu0 %v3291_v2 }
 0x7ab   : > { %3777 = vmatpush3.msra.mxu0 %v3275_v42 }
 0x7ac   : > { %3778 = vmatprep.subr.mxu0 %v3290_v19 }
 0x7ad   : > { %3779 = vmatpush3.msra.mxu0 %v3274_v45 }
 0x7ae   : > { %3780 = vmatprep.subr.mxu0 %v3289_v27 }
 0x7af   : > { %3781 = vmatpush3.msra.mxu0 %v3273_v29  ;;  %v3314_v29 = vld [vmem:[%s5917_s7 + $0x258] sm:$0xff] }
 0x7b0   : > { %3782 = vmatprep.subr.mxu0 %v3288_v38  ;;  %v3313_v38 = vld [vmem:[%s5917_s7 + $0x250] sm:$0xff] }
 0x7b1   : > { %3783 = vmatpush3.msra.mxu0 %v3272_v57  ;;  %v3308_v57 = vld [vmem:[%s5917_s7 + $0x228] sm:$0xff] }
 0x7b2   : > { %3784 = vmatprep.subr.mxu0 %v3287_v6  ;;  %v3306_v6 = vld [vmem:[%s5917_s7 + $0x218] sm:$0xff] }
 0x7b3   : > { %3785 = vmatpush3.msra.mxu0 %v3271_v31  ;;  %v3322_v31 = vld [vmem:[%s5917_s7 + $0x298] sm:$0xff] }
 0x854   : > { %v5750_v37 = vpop.f32.mrf.mxu0 }
 0x855   : > { %v3161_v28 = vrot.slane %v5750_v37, 2  ;;  %v3175_v51 = vrot.slane %v5750_v37, 6  ;;  %v3157_v5 = vrot.slane %v5750_v37, 1  ;;  %v3171_v54 = vrot.slane %v5750_v37, 5 }
 0x856   : > { %v3909_v13 = vpop.f32.mrf.mxu0  ;;  %v3165_v30 = vrot.slane %v5750_v37, 3  ;;  %v3179_v32 = vrot.slane %v5750_v37, 7  ;;  %v3169_v40 = vrot.slane %v5750_v37, 4 }
 0x857   : > { %v4061_v15 = vpack.i.bf16 %v3161_v28, %v3175_v51  ;;  %v4056_v46 = vpack.i.bf16 %v3157_v5, %v3171_v54  ;;  %v3316_v51 = vld [vmem:[%s5917_s7 + $0x268] sm:$0xff]  ;;  %v3315_v13 = vld [vmem:[%s5917_s7 + $0x260] sm:$0xff] }
 0x858   : > { %v5771_v22 = vpop.f32.mrf.mxu0  ;;  %v4066_v34 = vpack.i.bf16 %v3165_v30, %v3179_v32  ;;  %v3310_v30 = vld [vmem:[%s5917_s7 + $0x238] sm:$0xff]  ;;  %v3309_v32 = vld [vmem:[%s5917_s7 + $0x230] sm:$0xff] }
 0x859   : > { %4062 = vrot.lane.b32.xlu1 %v4061_v15, %s4110_s23  ;;  %4057 = vrot.lane.b32.xlu0 %v4056_v46, %s4107_s20  ;;  %v3184_v24 = vrot.slane %v5771_v22, 1  ;;  %v3198_v36 = vrot.slane %v5771_v22, 5  ;;  %v3188_v20 = vrot.slane %v5771_v22, 2  ;;  %v3202_v47 = vrot.slane %v5771_v22, 6  ;;  %v3312_v15 = vld [vmem:[%s5917_s7 + $0x248] sm:$0xff]  ;;  %v3311_v46 = vld [vmem:[%s5917_s7 + $0x240] sm:$0xff] }
 0x85a   : > { %v3912_v49 = vpop.f32.mrf.mxu0  ;;  %v3192_v41 = vrot.slane %v5771_v22, 3  ;;  %v3206_v1 = vrot.slane %v5771_v22, 7  ;;  %v3196_v2 = vrot.slane %v5771_v22, 4 }
 0x85b   : > { %v4071_v18 = vpack.i.bf16 %v3184_v24, %v3198_v36  ;;  %v4076_v16 = vpack.i.bf16 %v3188_v20, %v3202_v47  ;;  %v3305_v24 = vld [vmem:[%s5917_s7 + $0x210] sm:$0xff]  ;;  %v3304_v36 = vld [vmem:[%s5917_s7 + $0x208] sm:$0xff]  ;;  %v3303_v20 = vld [vmem:[%s5917_s7 + $0x200] sm:$0xff] }
 0x85c   : > { %v5787_v58 = vpop.f32.mrf.mxu0  ;;  %v4081_v11 = vpack.i.bf16 %v3192_v41, %v3206_v1  ;;  %v3321_v49 = vld [vmem:[%s5917_s7 + $0x290] sm:$0xff]  ;;  %v3320_v41 = vld [vmem:[%s5917_s7 + $0x288] sm:$0xff] }
 0x85d   : > { %4067 = vrot.lane.b32.xlu0 %v4066_v34, %s4111_s24  ;;  %4072 = vrot.lane.b32.xlu1 %v4071_v18, %s4107_s20  ;;  %v3223_v12 = vrot.slane %v5787_v58, 1  ;;  %v3227_v3 = vrot.slane %v5787_v58, 2  ;;  %v3231_v17 = vrot.slane %v5787_v58, 3  ;;  %v3235_v39 = vrot.slane %v5787_v58, 4 }
 0x85e   : > { %v3915_v35 = vpop.f32.mrf.mxu0 }
 0x861   : > { %4077 = vrot.lane.b32.xlu0 %v4076_v16, %s4110_s23  ;;  %4082 = vrot.lane.b32.xlu1 %v4081_v11, %s4111_s24  ;;  %v3319_v16 = vld [vmem:[%s5917_s7 + $0x280] sm:$0xff] }
 0x865   : > { %3224 = vrot.lane.b32.xlu0 %v3223_v12, %s4107_s20  ;;  %3228 = vrot.lane.b32.xlu1 %v3227_v3, %s4110_s23 }
 0x869   : > { %3232 = vrot.lane.b32.xlu0 %v3231_v17, %s4111_s24 }
 0x8cb   : > { %v4063_v21 = vpop.permute.xlu1 %4062  ;;  %v4058_v23 = vpop.permute.xlu0 %4057 }
 0x8cc   : > { %v4060_v26 = vunpack.i.h.bf16 %v4058_v23  ;;  %v4059_v7 = vunpack.i.l.bf16 %v4058_v23  ;;  %v4065_v43 = vunpack.i.h.bf16 %v4063_v21  ;;  %v4064_v52 = vunpack.i.l.bf16 %v4063_v21  ;;  %v3323_v23 = vld [vmem:[%s5918_s8] sm:$0x1] }
 0x8ce   : > { %v3210_v55 = vsel %vm1609_vm10, %v5750_v37, %v4060_v26  ;;  %v3213_v60 = vsel %vm1609_vm10, %v3169_v40, %v4059_v7 }
 0x8cf   : > { %v4068_v63 = vpop.permute.xlu0 %4067  ;;  %v4073_v8 = vpop.permute.xlu1 %4072  ;;  %v3214_v53 = vsel %vm2451_vm0, %v3213_v60, %v4064_v52  ;;  %v3211_v25 = vsel %vm2451_vm0, %v3210_v55, %v4065_v43 }
 0x8d0   : > { %v4070_v44 = vunpack.i.h.bf16 %v4068_v63  ;;  %v4069_v56 = vunpack.i.l.bf16 %v4068_v63  ;;  %v4075_v62 = vunpack.i.h.bf16 %v4073_v8  ;;  %v4074_v4 = vunpack.i.l.bf16 %v4073_v8 }
 0x8d2   : > { %v3215_v14 = vsel %vm2463_vm1, %v3214_v53, %v4069_v56  ;;  %v3212_v50 = vsel %vm2463_vm1, %v3211_v25, %v4070_v44  ;;  %v3216_v45 = vsel %vm1609_vm10, %v5771_v22, %v4075_v62  ;;  %v3219_v37 = vsel %vm1609_vm10, %v3196_v2, %v4074_v4  ;;  %v3307_v22 = vld [vmem:[%s5917_s7 + $0x220] sm:$0xff] }
 0x8d3   : > { %3390 = vmatprep.mubr.f32.mxu1 %v3215_v14  ;;  %v4078_v10 = vpop.permute.xlu0 %4077  ;;  %v4083_v48 = vpop.permute.xlu1 %4082 }
 0x8d4   : > { %v4080_v59 = vunpack.i.h.bf16 %v4078_v10  ;;  %v4079_v42 = vunpack.i.l.bf16 %v4078_v10  ;;  %3391 = vmatmul.mubr.f32.vlgmr.msra.gmra.mxu1 %v3212_v50  ;;  %v4085_v33 = vunpack.i.h.bf16 %v4083_v48  ;;  %v4084_v19 = vunpack.i.l.bf16 %v4083_v48 }
 0x8d5   : > { %3467 = vmatpush1.msra.mxu1 %v3318_v61  ;;  %3663 = vmatprep.mubr.msk.f32.mxu1 %vm1609_vm10, %v3235_v39 }
 0x8d6   : > { %v3217_v27 = vsel %vm2451_vm0, %v3216_v45, %v4080_v59  ;;  %3468 = vmatprep.subr.mxu1 %v4098_v0  ;;  %v3220_v28 = vsel %vm2451_vm0, %v3219_v37, %v4079_v42 }
 0x8d7   : > { %3469 = vmatpush1.msra.mxu1 %v3317_v9  ;;  %v3221_v5 = vsel %vm2463_vm1, %v3220_v28, %v4084_v19  ;;  %v3218_v54 = vsel %vm2463_vm1, %v3217_v27, %v4085_v33  ;;  %v3225_v47 = vpop.permute.xlu0 %3224  ;;  %v3229_v34 = vpop.permute.xlu1 %3228 }
 0x8d8   : > { %3470 = vmatprep.subr.mxu1 %v4098_v0  ;;  %3460 = vmatprep.mubr.f32.mxu0 %v3221_v5  ;;  %v3236_v1 = vsel %vm1609_vm10, %v5787_v58, %v3225_v47 }
 0x8d9   : > { %3471 = vmatpush1.msra.mxu1 %v3316_v51  ;;  %3461 = vmatmul.mubr.f32.vlgmr.msra.gmra.mxu0 %v3218_v54  ;;  %v3237_v11 = vsel %vm2451_vm0, %v3236_v1, %v3229_v34 }
 0x8da   : > { %3472 = vmatprep.subr.mxu1 %v4098_v0 }
 0x8db   : > { %3473 = vmatpush1.msra.mxu1 %v3315_v13  ;;  %v3233_v18 = vpop.permute.xlu0 %3232 }
 0x8dc   : > { %3474 = vmatprep.subr.mxu1 %v4098_v0  ;;  %v3238_v35 = vsel %vm2463_vm1, %v3237_v11, %v3233_v18 }
 0x8dd   : > { %3475 = vmatpush1.msra.mxu1 %v3314_v29 }
 0x8de   : > { %3476 = vmatprep.subr.mxu1 %v4098_v0 }
 0x8df   : > { %3477 = vmatpush1.msra.mxu1 %v3313_v38 }
 0x8e0   : > { %3478 = vmatprep.subr.mxu1 %v4098_v0 }
 0x8e1   : > { %3479 = vmatpush1.msra.mxu1 %v3312_v15 }
 0x8e2   : > { %3480 = vmatprep.subr.mxu1 %v4098_v0 }
 0x8e3   : > { %3481 = vmatpush1.msra.mxu1 %v3311_v46 }
 0x8e4   : > { %3482 = vmatprep.subr.mxu1 %v4098_v0 }
 0x8e5   : > { %3483 = vmatpush1.msra.mxu1 %v3310_v30 }
 0x8e6   : > { %3484 = vmatprep.subr.mxu1 %v4098_v0 }
 0x8e7   : > { %3485 = vmatpush1.msra.mxu1 %v3309_v32 }
 0x8e8   : > { %3486 = vmatprep.subr.mxu1 %v4098_v0 }
 0x8e9   : > { %3487 = vmatpush1.msra.mxu1 %v3308_v57 }
 0x8ea   : > { %3488 = vmatprep.subr.mxu1 %v4098_v0 }
 0x8eb   : > { %3489 = vmatpush1.msra.mxu1 %v3307_v22 }
 0x8ec   : > { %3490 = vmatprep.subr.mxu1 %v4098_v0 }
 0x8ed   : > { %3491 = vmatpush1.msra.mxu1 %v3306_v6 }
 0x8ee   : > { %3492 = vmatprep.subr.mxu1 %v4098_v0 }
 0x8ef   : > { %3493 = vmatpush1.msra.mxu1 %v3305_v24 }
 0x8f0   : > { %3494 = vmatprep.subr.mxu1 %v4098_v0 }
 0x8f1   : > { %3495 = vmatpush1.msra.mxu1 %v3304_v36 }
 0x8f2   : > { %3496 = vmatprep.subr.mxu1 %v4098_v0 }
 0x8f3   : > { %3497 = vmatpush1.msra.mxu1 %v3303_v20 }
 0x8f4   : > { %3522 = vmatprep.subr.mxu1 %v4098_v0 }
 0x8f5   : > { %3523 = vmatpush2.msra.mxu1 %v3322_v31 }
 0x8f6   : > { %3524 = vmatprep.subr.mxu1 %v4098_v0 }
 0x8f7   : > { %3525 = vmatpush2.msra.mxu1 %v3321_v49 }
 0x8f8   : > { %3526 = vmatprep.subr.mxu1 %v4098_v0 }
 0x8f9   : > { %3527 = vmatpush2.msra.mxu1 %v3320_v41 }
 0x8fa   : > { %3528 = vmatprep.subr.mxu1 %v4098_v0 }
 0x8fb   : > { %3529 = vmatpush2.msra.mxu1 %v3319_v16 }
 0x8fc   : > { %3531 = vmatmul.mubr.f32.vlgmr.msra.gmra.mxu1 %v3238_v35 }
 0x994   : > { %v3751_v12 = vpop.f32.mrf.mxu1 }
 0x996   : > { %v3752_v3 = vpop.f32.mrf.mxu1 }
 0x997   : > { %v3753_v21 = vadd.f32 %v3752_v3, %v3751_v12 }
 0x999   : > { %v3786_v58 = vpop.f32.mrf.mxu0  ;;  %v3393_v7 = vadd.f32 %v3753_v21, %v3323_v23 }
 0x99b   : > { %v3787_v17 = vpop.f32.mrf.mxu0 }
 0x99c   : > { %v3788_v26 = vadd.f32 %v3787_v17, %v3786_v58 }
 0x99e   : > { %v3463_v40 = vadd.f32 %v3788_v26, %v3393_v7 }
 0x9bc   : > { %v3532_v43 = vpop.f32.mrf.mxu1 }
 0x9bd   : > { %v3533_v52 = vadd.f32 %v3532_v43, %v3463_v40 }
 0x9be   : > { %v3534_v0 = vpop.f32.mrf.mxu1 }
 0x9bf   : > { %v3536_v55 = vmax.f32 %v3533_v52, -16.0 }
 0x9c1   : > { %v3537_v60 = vmin.f32 %v3536_v55, 8.0 }
 0x9c3   : > { %v3538_v63 = vsub.f32 0.0, %v3537_v60 }
 0x9c5   : > { %v3539_v8 = vmul.f32 1.442695, %v3538_v63 }
 0x9c7   : > { %4086 = vpow2.f32 %v3539_v8 }
 0x9d4   : > { %v4087_v44 = vpop.eup %4086 }
 0x9d5   : > { %v3541_v56 = vadd.f32 1.0, %v4087_v44 }
 0x9d7   : > { %4088 = vrcp.f32 %v3541_v56 }
 0x9e4   : > { %v4089_v62 = vpop.eup %4088 }
 0x9e5   : > { %3545 = vst.msk [vmem:[%s409_s29] sm:$0x1] %vm3544_vm3, %v4089_v62 }
 0x9e6 PF: > { %s22_s21 = sadd.s32 1, %s4096_s21  }
 0x9e7   : > { %p19_p4 = scmp.ge.s32.totalorder %s22_s21, 4  }
 0x9e9   :  { %21 = sbr.rel (!%p19_p4) target bundleno = 1 (0x1), region = 98 }

</bundles_post_ra>
